<compile_context>
chip_gen: v5e
topology: v5e:2x2
jax: 0.10.0
libtpu: 0.0.40
codegen_flags: <defaults>
</compile_context>

<pallas_src>
import functools

import jax
import jax.numpy as jnp
from jax.experimental import pallas as pl
from jax.experimental.pallas import tpu as pltpu

_TM_MAX = 512  # row tile for the 1x1-conv GEMM (f32 streams; ~85% of HBM roofline per tile)


# --------------------------------------------------------------------------- #
# Kernel 1: fused  ReLU -> 1x1 conv -> + bias -> + residual (upsampled x)
# --------------------------------------------------------------------------- #
def _relu_conv1x1_add_kernel(skip_ref, xup_ref, w_ref, b_ref, o_ref):
    s = jnp.maximum(skip_ref[...], 0.0).astype(jnp.bfloat16)      # ReLU, then bf16 MXU operand
    acc = jnp.dot(s, w_ref[...], preferred_element_type=jnp.float32)
    acc = acc + b_ref[...] + xup_ref[...]                         # f32 epilogue
    o_ref[...] = acc.astype(o_ref.dtype)


def relu_conv1x1_add(skip2d, xup2d, w, bias):
    """out = relu(skip2d) @ w + bias + xup2d, tiled over rows with a parallel grid."""
    m, cin = skip2d.shape
    cout = w.shape[1]
    tm = m if m <= _TM_MAX else _TM_MAX
    return pl.pallas_call(
        _relu_conv1x1_add_kernel,
        out_shape=jax.ShapeDtypeStruct((m, cout), jnp.float32),
        grid_spec=pltpu.PrefetchScalarGridSpec(
            num_scalar_prefetch=0,
            grid=(pl.cdiv(m, tm),),
            in_specs=[
                pl.BlockSpec((tm, cin), lambda i: (i, 0)),     # activation stream
                pl.BlockSpec((tm, cout), lambda i: (i, 0)),    # residual stream
                pl.BlockSpec((cin, cout), lambda i: (0, 0)),   # resident weight
                pl.BlockSpec((1, cout), lambda i: (0, 0)),     # resident bias
            ],
            out_specs=pl.BlockSpec((tm, cout), lambda i: (i, 0)),
        ),
        compiler_params=pltpu.CompilerParams(dimension_semantics=("parallel",)),
    )(skip2d, xup2d, w.astype(jnp.bfloat16), bias)


# --------------------------------------------------------------------------- #
# Kernel 2: fused  ReLU -> 3x3 conv (pad=1, stride=1) -> + bias   (implicit GEMM)
# --------------------------------------------------------------------------- #
def _relu_conv3x3_kernel(f_ref, w_ref, b_ref, o_ref, *, H, W):
    # f_ref : (1, (H+3)*(W+2), Cin)  zero-padded image, rows flattened row-major
    # w_ref : (9, Cin, Cout) bf16    tap index t = 3*di + dj
    # b_ref : (1, Cout) f32
    # o_ref : (1, H*(W+2), Cout)     junk columns j in [W, W+2) are sliced off by caller
    wp = W + 2
    cout = o_ref.shape[2]
    x0 = jnp.maximum(f_ref[0], 0.0).astype(jnp.bfloat16)   # ReLU(pad(x)) == pad(ReLU(x))
    acc = jnp.zeros((H * wp, cout), jnp.float32)
    for di in range(3):                                    # unrolled implicit GEMM over the 9 taps
        for dj in range(3):
            off = di * wp + dj                             # static sublane offset
            win = x0[off:off + H * wp, :]
            acc = acc + jnp.dot(win, w_ref[3 * di + dj],
                                preferred_element_type=jnp.float32)
    acc = acc + b_ref[...]
    o_ref[0] = acc.astype(o_ref.dtype)


def relu_conv3x3(x_nhwc, w_hwio, bias):
    """out = conv3x3(relu(x_nhwc), w_hwio) + bias  (NHWC, SAME padding)."""
    n, h, w, cin = x_nhwc.shape
    cout = w_hwio.shape[-1]
    wp = w + 2
    # Zero pad: 1 left/top/right, 2 bottom (extra row keeps the last shifted window
    # of the flattened slab in bounds; it only feeds discarded junk rows).
    xp = jnp.pad(x_nhwc, ((0, 0), (1, 2), (1, 1), (0, 0)))
    flat = xp.reshape(n, (h + 3) * wp, cin)                 # free, contiguous reshape in XLA
    w9 = w_hwio.reshape(9, cin, cout).astype(jnp.bfloat16)
    # TODO(synk): for very large spatial maps, add row-band tiling with a manual
    # halo DMA; one padded image per grid step fits VMEM at decoder resolutions.
    out = pl.pallas_call(
        functools.partial(_relu_conv3x3_kernel, H=h, W=w),
        out_shape=jax.ShapeDtypeStruct((n, h * wp, cout), jnp.float32),
        grid_spec=pltpu.PrefetchScalarGridSpec(
            num_scalar_prefetch=0,
            grid=(n,),
            in_specs=[
                pl.BlockSpec((1, (h + 3) * wp, cin), lambda i: (i, 0, 0)),
                pl.BlockSpec((9, cin, cout), lambda i: (0, 0, 0)),   # resident weight
                pl.BlockSpec((1, cout), lambda i: (0, 0)),           # resident bias
            ],
            out_specs=pl.BlockSpec((1, h * wp, cout), lambda i: (i, 0, 0)),
        ),
        compiler_params=pltpu.CompilerParams(dimension_semantics=("parallel",)),
    )(flat, w9, bias)
    # Drop the two junk columns introduced by the flattened-window trick.
    return out.reshape(n, h, wp, cout)[:, :, :w, :]


# --------------------------------------------------------------------------- #
# Bilinear upsample (F.interpolate, mode='bilinear', align_corners=False)
# --------------------------------------------------------------------------- #
def _resize_coords(in_size, out_size):
    scale = in_size / out_size
    src = (jnp.arange(out_size, dtype=jnp.float32) + 0.5) * scale - 0.5
    src = jnp.clip(src, 0.0, in_size - 1)
    lo = jnp.floor(src).astype(jnp.int32)
    hi = jnp.minimum(lo + 1, in_size - 1)
    return lo, hi, src - lo.astype(jnp.float32)


# TODO(synk): bilinear upsample stays as plain-JAX gather+lerp glue; a Pallas
# version would need in-kernel gathers for negligible gain at these sizes.
def bilinear_resize_nhwc(x, out_h, out_w):
    _, h, w, _ = x.shape
    if (h, w) == (out_h, out_w):
        return x
    lo_h, hi_h, fh = _resize_coords(h, out_h)
    lo_w, hi_w, fw = _resize_coords(w, out_w)
    top, bot = jnp.take(x, lo_h, axis=1), jnp.take(x, hi_h, axis=1)
    xr = top * (1.0 - fh.reshape(1, -1, 1, 1)) + bot * fh.reshape(1, -1, 1, 1)
    lft, rgt = jnp.take(xr, lo_w, axis=2), jnp.take(xr, hi_w, axis=2)
    return lft * (1.0 - fw.reshape(1, 1, -1, 1)) + rgt * fw.reshape(1, 1, -1, 1)


# --------------------------------------------------------------------------- #
# Decoder forward (norm=False path: ReluConv == ReLU -> Conv2d)
# --------------------------------------------------------------------------- #
def upsample_block(p, skip_nhwc, x_nhwc):
    n, hs, ws, cs = skip_nhwc.shape
    xup = bilinear_resize_nhwc(x_nhwc, hs, ws)               # (n, hs, ws, cmid)
    cmid = xup.shape[-1]
    summed = relu_conv1x1_add(skip_nhwc.reshape(n * hs * ws, cs),
                              xup.reshape(n * hs * ws, cmid),
                              p['skip']['w'], p['skip']['b'])
    summed = summed.reshape(n, hs, ws, cmid)
    return relu_conv3x3(summed, p['blend']['w'], p['blend']['b'])


@jax.jit
def decoder_forward(params, x32, x16, x8, x4):
    to_nhwc = lambda t: jnp.transpose(t, (0, 2, 3, 1))
    x32, x16, x8, x4 = map(to_nhwc, (x32, x16, x8, x4))
    out = upsample_block(params['up1'], x16, x32)
    out = upsample_block(params['up2'], x8, out)
    out = upsample_block(params['up3'], x4, out)
    return jnp.transpose(out, (0, 3, 1, 2))                  # back to NCHW


# --------------------------------------------------------------------------- #
# Deterministic parameter init (shapes mirror the PyTorch __init__)
# --------------------------------------------------------------------------- #
def _conv_params(key, cout, cin, k):
    kw, kb = jax.random.split(key)
    w = jax.random.normal(kw, (cout, cin, k, k), jnp.float32) / jnp.sqrt(cin * k * k)
    b = jax.random.normal(kb, (cout,), jnp.float32) * 0.05
    if k == 1:
        wm = jnp.transpose(w[:, :, 0, 0], (1, 0))            # (cin, cout)
    else:
        wm = jnp.transpose(w, (2, 3, 1, 0))                  # (kh, kw, cin, cout) == HWIO
    return {'w': wm, 'b': b.reshape(1, cout)}


def init_decoder_params(key, features=(16, 32, 64, 64), in_dim=64):
    k1, k2, k3, k4, k5, k6 = jax.random.split(key, 6)
    return {
        'up1': {'skip':  _conv_params(k1, in_dim,       features[-2], 1),
                'blend': _conv_params(k2, features[-2], in_dim,       3)},
        'up2': {'skip':  _conv_params(k3, features[-2], features[-3], 1),
                'blend': _conv_params(k4, features[-3], features[-2], 3)},
        'up3': {'skip':  _conv_params(k5, features[-3], features[-4], 1),
                'blend': _conv_params(k6, features[-4], features[-3], 3)},
    }


# --------------------------------------------------------------------------- #
# Pure-XLA f32 reference (for a numerical sanity check of the Pallas path)
# --------------------------------------------------------------------------- #
def _ref_upsample_block(p, skip, x):
    n, hs, ws, _ = skip.shape
    xup = bilinear_resize_nhwc(x, hs, ws)
    s = jnp.einsum('nhwc,cd->nhwd', jnp.maximum(skip, 0.0), p['skip']['w'],
                   precision=jax.lax.Precision.HIGHEST)
    summed = s + p['skip']['b'].reshape(1, 1, 1, -1) + xup
    y = jax.lax.conv_general_dilated(
        jnp.maximum(summed, 0.0), p['blend']['w'], (1, 1), 'SAME',
        dimension_numbers=('NHWC', 'HWIO', 'NHWC'),
        precision=jax.lax.Precision.HIGHEST)
    return y + p['blend']['b'].reshape(1, 1, 1, -1)


def ref_decoder_forward(params, x32, x16, x8, x4):
    to_nhwc = lambda t: jnp.transpose(t, (0, 2, 3, 1))
    x32, x16, x8, x4 = map(to_nhwc, (x32, x16, x8, x4))
    out = _ref_upsample_block(params['up1'], x16, x32)
    out = _ref_upsample_block(params['up2'], x8, out)
    out = _ref_upsample_block(params['up3'], x4, out)
    return jnp.transpose(out, (0, 3, 1, 2))


# --------------------------------------------------------------------------- #
if __name__ == "__main__":
    key = jax.random.PRNGKey(0)
    kp, k32, k16, k8, k4 = jax.random.split(key, 5)
    params = init_decoder_params(kp)

    # NCHW inputs matching the encoder pyramid that feeds this decoder
    # (features=[16, 32, 64, 64], in_dim=64).
    x32 = jax.random.normal(k32, (2, 64, 2, 2), jnp.float32)
    x16 = jax.random.normal(k16, (2, 64, 4, 4), jnp.float32)
    x8 = jax.random.normal(k8, (2, 32, 8, 8), jnp.float32)
    x4 = jax.random.normal(k4, (2, 16, 16, 16), jnp.float32)

    out = decoder_forward(params, x32, x16, x8, x4)
    out = jax.block_until_ready(out)
    assert out.shape == (2, 16, 16, 16), out.shape
    assert bool(jnp.isfinite(out).all())

    # Numerical check vs pure-XLA f32 reference (kernels use bf16 MXU operands).
    ref = ref_decoder_forward(params, x32, x16, x8, x4)
    err = float(jnp.max(jnp.abs(out - ref)))
    tol = 5e-2 * (float(jnp.max(jnp.abs(ref))) + 1.0)
    assert err < tol, (err, tol)
    print("KERNEL_OK")
</pallas_src>

<mosaic_0001>
module attributes {stable_mosaic.version = 11 : i64} {
  func.func @_relu_conv1x1_add_kernel(%arg0: i32, %arg1: memref<32x64xf32, #tpu.memory_space<vmem>>, %arg2: memref<32x64xf32, #tpu.memory_space<vmem>>, %arg3: memref<64x64xbf16, #tpu.memory_space<vmem>>, %arg4: memref<1x64xf32, #tpu.memory_space<vmem>>, %arg5: memref<32x64xf32, #tpu.memory_space<vmem>>) attributes {dimension_semantics = [#tpu.dimension_semantics<parallel>], iteration_bounds = array<i64: 1>, scalar_prefetch = 0 : i64, scratch_operands = 0 : i64, tpu.core_type = #tpu.core_type<tc>, window_params = [{transform_indices = @transform_0, window_bounds = array<i64: 32, 64>}, {transform_indices = @transform_1, window_bounds = array<i64: 32, 64>}, {pipeline_mode = #tpu.pipeline_mode<synchronous>, transform_indices = @transform_2, window_bounds = array<i64: 64, 64>}, {pipeline_mode = #tpu.pipeline_mode<synchronous>, transform_indices = @transform_3, window_bounds = array<i64: 1, 64>}, {transform_indices = @transform_4, window_bounds = array<i64: 32, 64>}]} {
    %c0 = arith.constant 0 : index
    %c0_0 = arith.constant 0 : index
    %0 = vector.load %arg1[%c0, %c0_0] : memref<32x64xf32, #tpu.memory_space<vmem>>, vector<32x64xf32>
    %cst = arith.constant 0.000000e+00 : f32
    %1 = vector.broadcast %cst : f32 to vector<32x64xf32>
    %2 = arith.maximumf %0, %1 : vector<32x64xf32>
    %3 = arith.truncf %2 : vector<32x64xf32> to vector<32x64xbf16>
    %c0_1 = arith.constant 0 : index
    %c0_2 = arith.constant 0 : index
    %4 = vector.load %arg3[%c0_1, %c0_2] : memref<64x64xbf16, #tpu.memory_space<vmem>>, vector<64x64xbf16>
    %cst_3 = arith.constant dense<0.000000e+00> : vector<32x64xf32>
    %5 = tpu.matmul %3, %4, %cst_3 {dimension_numbers = #tpu.dot_dimension_numbers<[1], [0], [0], [1], [0, 0, 1, 1], [], []>} : vector<32x64xbf16>, vector<64x64xbf16>, vector<32x64xf32> -> vector<32x64xf32>
    %c0_4 = arith.constant 0 : index
    %c0_5 = arith.constant 0 : index
    %6 = vector.load %arg4[%c0_4, %c0_5] : memref<1x64xf32, #tpu.memory_space<vmem>>, vector<1x64xf32>
    %7 = vector.broadcast %6 : vector<1x64xf32> to vector<32x64xf32>
    %8 = arith.addf %5, %7 : vector<32x64xf32>
    %c0_6 = arith.constant 0 : index
    %c0_7 = arith.constant 0 : index
    %9 = vector.load %arg2[%c0_6, %c0_7] : memref<32x64xf32, #tpu.memory_space<vmem>>, vector<32x64xf32>
    %10 = arith.addf %8, %9 : vector<32x64xf32>
    %c0_8 = arith.constant 0 : index
    %c0_9 = arith.constant 0 : index
    %11 = vector.load %arg5[%c0_8, %c0_9] : memref<32x64xf32, #tpu.memory_space<vmem>>, vector<32x64xf32>
    tpu.vector_store %arg5[%c0_8, %c0_9], %10 {strides = array<i32>} : memref<32x64xf32, #tpu.memory_space<vmem>>, vector<32x64xf32>,
    return
  }
  func.func @transform_0(%arg0: i32) -> (i32, i32) {
    %c0_i32 = arith.constant 0 : i32
    %c0_i32_0 = arith.constant 0 : i32
    return %arg0, %c0_i32 : i32, i32
  }
  func.func @transform_1(%arg0: i32) -> (i32, i32) {
    %c0_i32 = arith.constant 0 : i32
    %c0_i32_0 = arith.constant 0 : i32
    return %arg0, %c0_i32 : i32, i32
  }
  func.func @transform_2(%arg0: i32) -> (i32, i32) {
    %c0_i32 = arith.constant 0 : i32
    %c0_i32_0 = arith.constant 0 : i32
    %c0_i32_1 = arith.constant 0 : i32
    return %c0_i32, %c0_i32_0 : i32, i32
  }
  func.func @transform_3(%arg0: i32) -> (i32, i32) {
    %c0_i32 = arith.constant 0 : i32
    %c0_i32_0 = arith.constant 0 : i32
    %c0_i32_1 = arith.constant 0 : i32
    return %c0_i32, %c0_i32_0 : i32, i32
  }
  func.func @transform_4(%arg0: i32) -> (i32, i32) {
    %c0_i32 = arith.constant 0 : i32
    %c0_i32_0 = arith.constant 0 : i32
    return %arg0, %c0_i32 : i32, i32
  }
}

module attributes {stable_mosaic.version = 11 : i64} {
  func.func @_relu_conv3x3_kernel(%arg0: i32, %arg1: memref<1x42x64xf32, #tpu.memory_space<vmem>>, %arg2: memref<9x64x64xbf16, #tpu.memory_space<vmem>>, %arg3: memref<1x64xf32, #tpu.memory_space<vmem>>, %arg4: memref<1x24x64xf32, #tpu.memory_space<vmem>>) attributes {dimension_semantics = [#tpu.dimension_semantics<parallel>], iteration_bounds = array<i64: 2>, scalar_prefetch = 0 : i64, scratch_operands = 0 : i64, tpu.core_type = #tpu.core_type<tc>, window_params = [{transform_indices = @transform_0, window_bounds = array<i64: 1, 42, 64>}, {pipeline_mode = #tpu.pipeline_mode<synchronous>, transform_indices = @transform_1, window_bounds = array<i64: 9, 64, 64>}, {pipeline_mode = #tpu.pipeline_mode<synchronous>, transform_indices = @transform_2, window_bounds = array<i64: 1, 64>}, {transform_indices = @transform_3, window_bounds = array<i64: 1, 24, 64>}]} {
    %c0 = arith.constant 0 : index
    %c0_0 = arith.constant 0 : index
    %c0_1 = arith.constant 0 : index
    %0 = vector.load %arg1[%c0, %c0_0, %c0_1] : memref<1x42x64xf32, #tpu.memory_space<vmem>>, vector<1x42x64xf32>
    %1 = vector.shape_cast %0 : vector<1x42x64xf32> to vector<42x64xf32>
    %cst = arith.constant 0.000000e+00 : f32
    %2 = vector.broadcast %cst : f32 to vector<42x64xf32>
    %3 = arith.maximumf %1, %2 : vector<42x64xf32>
    %4 = arith.truncf %3 : vector<42x64xf32> to vector<42x64xbf16>
    %cst_2 = arith.constant 0.000000e+00 : f32
    %5 = vector.broadcast %cst_2 : f32 to vector<24x64xf32>
    %6 = vector.extract_strided_slice %4 {offsets = [0, 0], sizes = [24, 64], strides = [1, 1]} : vector<42x64xbf16> to vector<24x64xbf16>
    %c0_3 = arith.constant 0 : index
    %c0_4 = arith.constant 0 : index
    %c0_5 = arith.constant 0 : index
    %7 = vector.load %arg2[%c0_3, %c0_4, %c0_5] : memref<9x64x64xbf16, #tpu.memory_space<vmem>>, vector<1x64x64xbf16>
    %8 = vector.shape_cast %7 : vector<1x64x64xbf16> to vector<64x64xbf16>
    %cst_6 = arith.constant dense<0.000000e+00> : vector<24x64xf32>
    %9 = tpu.matmul %6, %8, %cst_6 {dimension_numbers = #tpu.dot_dimension_numbers<[1], [0], [0], [1], [0, 0, 1, 1], [], []>} : vector<24x64xbf16>, vector<64x64xbf16>, vector<24x64xf32> -> vector<24x64xf32>
    %10 = arith.addf %5, %9 : vector<24x64xf32>
    %11 = vector.extract_strided_slice %4 {offsets = [1, 0], sizes = [24, 64], strides = [1, 1]} : vector<42x64xbf16> to vector<24x64xbf16>
    %c1 = arith.constant 1 : index
    %c0_7 = arith.constant 0 : index
    %c0_8 = arith.constant 0 : index
    %12 = vector.load %arg2[%c1, %c0_7, %c0_8] : memref<9x64x64xbf16, #tpu.memory_space<vmem>>, vector<1x64x64xbf16>
    %13 = vector.shape_cast %12 : vector<1x64x64xbf16> to vector<64x64xbf16>
    %cst_9 = arith.constant dense<0.000000e+00> : vector<24x64xf32>
    %14 = tpu.matmul %11, %13, %cst_9 {dimension_numbers = #tpu.dot_dimension_numbers<[1], [0], [0], [1], [0, 0, 1, 1], [], []>} : vector<24x64xbf16>, vector<64x64xbf16>, vector<24x64xf32> -> vector<24x64xf32>
    %15 = arith.addf %10, %14 : vector<24x64xf32>
    %16 = vector.extract_strided_slice %4 {offsets = [2, 0], sizes = [24, 64], strides = [1, 1]} : vector<42x64xbf16> to vector<24x64xbf16>
    %c2 = arith.constant 2 : index
    %c0_10 = arith.constant 0 : index
    %c0_11 = arith.constant 0 : index
    %17 = vector.load %arg2[%c2, %c0_10, %c0_11] : memref<9x64x64xbf16, #tpu.memory_space<vmem>>, vector<1x64x64xbf16>
    %18 = vector.shape_cast %17 : vector<1x64x64xbf16> to vector<64x64xbf16>
    %cst_12 = arith.constant dense<0.000000e+00> : vector<24x64xf32>
    %19 = tpu.matmul %16, %18, %cst_12 {dimension_numbers = #tpu.dot_dimension_numbers<[1], [0], [0], [1], [0, 0, 1, 1], [], []>} : vector<24x64xbf16>, vector<64x64xbf16>, vector<24x64xf32> -> vector<24x64xf32>
    %20 = arith.addf %15, %19 : vector<24x64xf32>
    %21 = vector.extract_strided_slice %4 {offsets = [6, 0], sizes = [24, 64], strides = [1, 1]} : vector<42x64xbf16> to vector<24x64xbf16>
    %c3 = arith.constant 3 : index
    %c0_13 = arith.constant 0 : index
    %c0_14 = arith.constant 0 : index
    %22 = vector.load %arg2[%c3, %c0_13, %c0_14] : memref<9x64x64xbf16, #tpu.memory_space<vmem>>, vector<1x64x64xbf16>
    %23 = vector.shape_cast %22 : vector<1x64x64xbf16> to vector<64x64xbf16>
    %cst_15 = arith.constant dense<0.000000e+00> : vector<24x64xf32>
    %24 = tpu.matmul %21, %23, %cst_15 {dimension_numbers = #tpu.dot_dimension_numbers<[1], [0], [0], [1], [0, 0, 1, 1], [], []>} : vector<24x64xbf16>, vector<64x64xbf16>, vector<24x64xf32> -> vector<24x64xf32>
    %25 = arith.addf %20, %24 : vector<24x64xf32>
    %26 = vector.extract_strided_slice %4 {offsets = [7, 0], sizes = [24, 64], strides = [1, 1]} : vector<42x64xbf16> to vector<24x64xbf16>
    %c4 = arith.constant 4 : index
    %c0_16 = arith.constant 0 : index
    %c0_17 = arith.constant 0 : index
    %27 = vector.load %arg2[%c4, %c0_16, %c0_17] : memref<9x64x64xbf16, #tpu.memory_space<vmem>>, vector<1x64x64xbf16>
    %28 = vector.shape_cast %27 : vector<1x64x64xbf16> to vector<64x64xbf16>
    %cst_18 = arith.constant dense<0.000000e+00> : vector<24x64xf32>
    %29 = tpu.matmul %26, %28, %cst_18 {dimension_numbers = #tpu.dot_dimension_numbers<[1], [0], [0], [1], [0, 0, 1, 1], [], []>} : vector<24x64xbf16>, vector<64x64xbf16>, vector<24x64xf32> -> vector<24x64xf32>
    %30 = arith.addf %25, %29 : vector<24x64xf32>
    %31 = vector.extract_strided_slice %4 {offsets = [8, 0], sizes = [24, 64], strides = [1, 1]} : vector<42x64xbf16> to vector<24x64xbf16>
    %c5 = arith.constant 5 : index
    %c0_19 = arith.constant 0 : index
    %c0_20 = arith.constant 0 : index
    %32 = vector.load %arg2[%c5, %c0_19, %c0_20] : memref<9x64x64xbf16, #tpu.memory_space<vmem>>, vector<1x64x64xbf16>
    %33 = vector.shape_cast %32 : vector<1x64x64xbf16> to vector<64x64xbf16>
    %cst_21 = arith.constant dense<0.000000e+00> : vector<24x64xf32>
    %34 = tpu.matmul %31, %33, %cst_21 {dimension_numbers = #tpu.dot_dimension_numbers<[1], [0], [0], [1], [0, 0, 1, 1], [], []>} : vector<24x64xbf16>, vector<64x64xbf16>, vector<24x64xf32> -> vector<24x64xf32>
    %35 = arith.addf %30, %34 : vector<24x64xf32>
    %36 = vector.extract_strided_slice %4 {offsets = [12, 0], sizes = [24, 64], strides = [1, 1]} : vector<42x64xbf16> to vector<24x64xbf16>
    %c6 = arith.constant 6 : index
    %c0_22 = arith.constant 0 : index
    %c0_23 = arith.constant 0 : index
    %37 = vector.load %arg2[%c6, %c0_22, %c0_23] : memref<9x64x64xbf16, #tpu.memory_space<vmem>>, vector<1x64x64xbf16>
    %38 = vector.shape_cast %37 : vector<1x64x64xbf16> to vector<64x64xbf16>
    %cst_24 = arith.constant dense<0.000000e+00> : vector<24x64xf32>
    %39 = tpu.matmul %36, %38, %cst_24 {dimension_numbers = #tpu.dot_dimension_numbers<[1], [0], [0], [1], [0, 0, 1, 1], [], []>} : vector<24x64xbf16>, vector<64x64xbf16>, vector<24x64xf32> -> vector<24x64xf32>
    %40 = arith.addf %35, %39 : vector<24x64xf32>
    %41 = vector.extract_strided_slice %4 {offsets = [13, 0], sizes = [24, 64], strides = [1, 1]} : vector<42x64xbf16> to vector<24x64xbf16>
    %c7 = arith.constant 7 : index
    %c0_25 = arith.constant 0 : index
    %c0_26 = arith.constant 0 : index
    %42 = vector.load %arg2[%c7, %c0_25, %c0_26] : memref<9x64x64xbf16, #tpu.memory_space<vmem>>, vector<1x64x64xbf16>
    %43 = vector.shape_cast %42 : vector<1x64x64xbf16> to vector<64x64xbf16>
    %cst_27 = arith.constant dense<0.000000e+00> : vector<24x64xf32>
    %44 = tpu.matmul %41, %43, %cst_27 {dimension_numbers = #tpu.dot_dimension_numbers<[1], [0], [0], [1], [0, 0, 1, 1], [], []>} : vector<24x64xbf16>, vector<64x64xbf16>, vector<24x64xf32> -> vector<24x64xf32>
    %45 = arith.addf %40, %44 : vector<24x64xf32>
    %46 = vector.extract_strided_slice %4 {offsets = [14, 0], sizes = [24, 64], strides = [1, 1]} : vector<42x64xbf16> to vector<24x64xbf16>
    %c8 = arith.constant 8 : index
    %c0_28 = arith.constant 0 : index
    %c0_29 = arith.constant 0 : index
    %47 = vector.load %arg2[%c8, %c0_28, %c0_29] : memref<9x64x64xbf16, #tpu.memory_space<vmem>>, vector<1x64x64xbf16>
    %48 = vector.shape_cast %47 : vector<1x64x64xbf16> to vector<64x64xbf16>
    %cst_30 = arith.constant dense<0.000000e+00> : vector<24x64xf32>
    %49 = tpu.matmul %46, %48, %cst_30 {dimension_numbers = #tpu.dot_dimension_numbers<[1], [0], [0], [1], [0, 0, 1, 1], [], []>} : vector<24x64xbf16>, vector<64x64xbf16>, vector<24x64xf32> -> vector<24x64xf32>
    %50 = arith.addf %45, %49 : vector<24x64xf32>
    %c0_31 = arith.constant 0 : index
    %c0_32 = arith.constant 0 : index
    %51 = vector.load %arg3[%c0_31, %c0_32] : memref<1x64xf32, #tpu.memory_space<vmem>>, vector<1x64xf32>
    %52 = vector.broadcast %51 : vector<1x64xf32> to vector<24x64xf32>
    %53 = arith.addf %50, %52 : vector<24x64xf32>
    %c0_33 = arith.constant 0 : index
    %c0_34 = arith.constant 0 : index
    %c0_35 = arith.constant 0 : index
    %54 = vector.load %arg4[%c0_33, %c0_34, %c0_35] : memref<1x24x64xf32, #tpu.memory_space<vmem>>, vector<1x24x64xf32>
    %55 = vector.shape_cast %54 : vector<1x24x64xf32> to vector<24x64xf32>
    %56 = vector.shape_cast %53 : vector<24x64xf32> to vector<1x24x64xf32>
    tpu.vector_store %arg4[%c0_33, %c0_34, %c0_35], %56 {strides = array<i32>} : memref<1x24x64xf32, #tpu.memory_space<vmem>>, vector<1x24x64xf32>,
    return
  }
  func.func @transform_0(%arg0: i32) -> (i32, i32, i32) {
    %c0_i32 = arith.constant 0 : i32
    %c0_i32_0 = arith.constant 0 : i32
    %c0_i32_1 = arith.constant 0 : i32
    return %arg0, %c0_i32, %c0_i32_0 : i32, i32, i32
  }
  func.func @transform_1(%arg0: i32) -> (i32, i32, i32) {
    %c0_i32 = arith.constant 0 : i32
    %c0_i32_0 = arith.constant 0 : i32
    %c0_i32_1 = arith.constant 0 : i32
    %c0_i32_2 = arith.constant 0 : i32
    return %c0_i32, %c0_i32_0, %c0_i32_1 : i32, i32, i32
  }
  func.func @transform_2(%arg0: i32) -> (i32, i32) {
    %c0_i32 = arith.constant 0 : i32
    %c0_i32_0 = arith.constant 0 : i32
    %c0_i32_1 = arith.constant 0 : i32
    return %c0_i32, %c0_i32_0 : i32, i32
  }
  func.func @transform_3(%arg0: i32) -> (i32, i32, i32) {
    %c0_i32 = arith.constant 0 : i32
    %c0_i32_0 = arith.constant 0 : i32
    %c0_i32_1 = arith.constant 0 : i32
    return %arg0, %c0_i32, %c0_i32_0 : i32, i32, i32
  }
}

module attributes {stable_mosaic.version = 11 : i64} {
  func.func @_relu_conv1x1_add_kernel(%arg0: i32, %arg1: memref<128x32xf32, #tpu.memory_space<vmem>>, %arg2: memref<128x64xf32, #tpu.memory_space<vmem>>, %arg3: memref<32x64xbf16, #tpu.memory_space<vmem>>, %arg4: memref<1x64xf32, #tpu.memory_space<vmem>>, %arg5: memref<128x64xf32, #tpu.memory_space<vmem>>) attributes {dimension_semantics = [#tpu.dimension_semantics<parallel>], iteration_bounds = array<i64: 1>, scalar_prefetch = 0 : i64, scratch_operands = 0 : i64, tpu.core_type = #tpu.core_type<tc>, window_params = [{transform_indices = @transform_0, window_bounds = array<i64: 128, 32>}, {transform_indices = @transform_1, window_bounds = array<i64: 128, 64>}, {pipeline_mode = #tpu.pipeline_mode<synchronous>, transform_indices = @transform_2, window_bounds = array<i64: 32, 64>}, {pipeline_mode = #tpu.pipeline_mode<synchronous>, transform_indices = @transform_3, window_bounds = array<i64: 1, 64>}, {transform_indices = @transform_4, window_bounds = array<i64: 128, 64>}]} {
    %c0 = arith.constant 0 : index
    %c0_0 = arith.constant 0 : index
    %0 = vector.load %arg1[%c0, %c0_0] : memref<128x32xf32, #tpu.memory_space<vmem>>, vector<128x32xf32>
    %cst = arith.constant 0.000000e+00 : f32
    %1 = vector.broadcast %cst : f32 to vector<128x32xf32>
    %2 = arith.maximumf %0, %1 : vector<128x32xf32>
    %3 = arith.truncf %2 : vector<128x32xf32> to vector<128x32xbf16>
    %c0_1 = arith.constant 0 : index
    %c0_2 = arith.constant 0 : index
    %4 = vector.load %arg3[%c0_1, %c0_2] : memref<32x64xbf16, #tpu.memory_space<vmem>>, vector<32x64xbf16>
    %cst_3 = arith.constant dense<0.000000e+00> : vector<128x64xf32>
    %5 = tpu.matmul %3, %4, %cst_3 {dimension_numbers = #tpu.dot_dimension_numbers<[1], [0], [0], [1], [0, 0, 1, 1], [], []>} : vector<128x32xbf16>, vector<32x64xbf16>, vector<128x64xf32> -> vector<128x64xf32>
    %c0_4 = arith.constant 0 : index
    %c0_5 = arith.constant 0 : index
    %6 = vector.load %arg4[%c0_4, %c0_5] : memref<1x64xf32, #tpu.memory_space<vmem>>, vector<1x64xf32>
    %7 = vector.broadcast %6 : vector<1x64xf32> to vector<128x64xf32>
    %8 = arith.addf %5, %7 : vector<128x64xf32>
    %c0_6 = arith.constant 0 : index
    %c0_7 = arith.constant 0 : index
    %9 = vector.load %arg2[%c0_6, %c0_7] : memref<128x64xf32, #tpu.memory_space<vmem>>, vector<128x64xf32>
    %10 = arith.addf %8, %9 : vector<128x64xf32>
    %c0_8 = arith.constant 0 : index
    %c0_9 = arith.constant 0 : index
    %11 = vector.load %arg5[%c0_8, %c0_9] : memref<128x64xf32, #tpu.memory_space<vmem>>, vector<128x64xf32>
    tpu.vector_store %arg5[%c0_8, %c0_9], %10 {strides = array<i32>} : memref<128x64xf32, #tpu.memory_space<vmem>>, vector<128x64xf32>,
    return
  }
  func.func @transform_0(%arg0: i32) -> (i32, i32) {
    %c0_i32 = arith.constant 0 : i32
    %c0_i32_0 = arith.constant 0 : i32
    return %arg0, %c0_i32 : i32, i32
  }
  func.func @transform_1(%arg0: i32) -> (i32, i32) {
    %c0_i32 = arith.constant 0 : i32
    %c0_i32_0 = arith.constant 0 : i32
    return %arg0, %c0_i32 : i32, i32
  }
  func.func @transform_2(%arg0: i32) -> (i32, i32) {
    %c0_i32 = arith.constant 0 : i32
    %c0_i32_0 = arith.constant 0 : i32
    %c0_i32_1 = arith.constant 0 : i32
    return %c0_i32, %c0_i32_0 : i32, i32
  }
  func.func @transform_3(%arg0: i32) -> (i32, i32) {
    %c0_i32 = arith.constant 0 : i32
    %c0_i32_0 = arith.constant 0 : i32
    %c0_i32_1 = arith.constant 0 : i32
    return %c0_i32, %c0_i32_0 : i32, i32
  }
  func.func @transform_4(%arg0: i32) -> (i32, i32) {
    %c0_i32 = arith.constant 0 : i32
    %c0_i32_0 = arith.constant 0 : i32
    return %arg0, %c0_i32 : i32, i32
  }
}

module attributes {stable_mosaic.version = 11 : i64} {
  func.func @_relu_conv3x3_kernel(%arg0: i32, %arg1: memref<1x110x64xf32, #tpu.memory_space<vmem>>, %arg2: memref<9x64x32xbf16, #tpu.memory_space<vmem>>, %arg3: memref<1x32xf32, #tpu.memory_space<vmem>>, %arg4: memref<1x80x32xf32, #tpu.memory_space<vmem>>) attributes {dimension_semantics = [#tpu.dimension_semantics<parallel>], iteration_bounds = array<i64: 2>, scalar_prefetch = 0 : i64, scratch_operands = 0 : i64, tpu.core_type = #tpu.core_type<tc>, window_params = [{transform_indices = @transform_0, window_bounds = array<i64: 1, 110, 64>}, {pipeline_mode = #tpu.pipeline_mode<synchronous>, transform_indices = @transform_1, window_bounds = array<i64: 9, 64, 32>}, {pipeline_mode = #tpu.pipeline_mode<synchronous>, transform_indices = @transform_2, window_bounds = array<i64: 1, 32>}, {transform_indices = @transform_3, window_bounds = array<i64: 1, 80, 32>}]} {
    %c0 = arith.constant 0 : index
    %c0_0 = arith.constant 0 : index
    %c0_1 = arith.constant 0 : index
    %0 = vector.load %arg1[%c0, %c0_0, %c0_1] : memref<1x110x64xf32, #tpu.memory_space<vmem>>, vector<1x110x64xf32>
    %1 = vector.shape_cast %0 : vector<1x110x64xf32> to vector<110x64xf32>
    %cst = arith.constant 0.000000e+00 : f32
    %2 = vector.broadcast %cst : f32 to vector<110x64xf32>
    %3 = arith.maximumf %1, %2 : vector<110x64xf32>
    %4 = arith.truncf %3 : vector<110x64xf32> to vector<110x64xbf16>
    %cst_2 = arith.constant 0.000000e+00 : f32
    %5 = vector.broadcast %cst_2 : f32 to vector<80x32xf32>
    %6 = vector.extract_strided_slice %4 {offsets = [0, 0], sizes = [80, 64], strides = [1, 1]} : vector<110x64xbf16> to vector<80x64xbf16>
    %c0_3 = arith.constant 0 : index
    %c0_4 = arith.constant 0 : index
    %c0_5 = arith.constant 0 : index
    %7 = vector.load %arg2[%c0_3, %c0_4, %c0_5] : memref<9x64x32xbf16, #tpu.memory_space<vmem>>, vector<1x64x32xbf16>
    %8 = vector.shape_cast %7 : vector<1x64x32xbf16> to vector<64x32xbf16>
    %cst_6 = arith.constant dense<0.000000e+00> : vector<80x32xf32>
    %9 = tpu.matmul %6, %8, %cst_6 {dimension_numbers = #tpu.dot_dimension_numbers<[1], [0], [0], [1], [0, 0, 1, 1], [], []>} : vector<80x64xbf16>, vector<64x32xbf16>, vector<80x32xf32> -> vector<80x32xf32>
    %10 = arith.addf %5, %9 : vector<80x32xf32>
    %11 = vector.extract_strided_slice %4 {offsets = [1, 0], sizes = [80, 64], strides = [1, 1]} : vector<110x64xbf16> to vector<80x64xbf16>
    %c1 = arith.constant 1 : index
    %c0_7 = arith.constant 0 : index
    %c0_8 = arith.constant 0 : index
    %12 = vector.load %arg2[%c1, %c0_7, %c0_8] : memref<9x64x32xbf16, #tpu.memory_space<vmem>>, vector<1x64x32xbf16>
    %13 = vector.shape_cast %12 : vector<1x64x32xbf16> to vector<64x32xbf16>
    %cst_9 = arith.constant dense<0.000000e+00> : vector<80x32xf32>
    %14 = tpu.matmul %11, %13, %cst_9 {dimension_numbers = #tpu.dot_dimension_numbers<[1], [0], [0], [1], [0, 0, 1, 1], [], []>} : vector<80x64xbf16>, vector<64x32xbf16>, vector<80x32xf32> -> vector<80x32xf32>
    %15 = arith.addf %10, %14 : vector<80x32xf32>
    %16 = vector.extract_strided_slice %4 {offsets = [2, 0], sizes = [80, 64], strides = [1, 1]} : vector<110x64xbf16> to vector<80x64xbf16>
    %c2 = arith.constant 2 : index
    %c0_10 = arith.constant 0 : index
    %c0_11 = arith.constant 0 : index
    %17 = vector.load %arg2[%c2, %c0_10, %c0_11] : memref<9x64x32xbf16, #tpu.memory_space<vmem>>, vector<1x64x32xbf16>
    %18 = vector.shape_cast %17 : vector<1x64x32xbf16> to vector<64x32xbf16>
    %cst_12 = arith.constant dense<0.000000e+00> : vector<80x32xf32>
    %19 = tpu.matmul %16, %18, %cst_12 {dimension_numbers = #tpu.dot_dimension_numbers<[1], [0], [0], [1], [0, 0, 1, 1], [], []>} : vector<80x64xbf16>, vector<64x32xbf16>, vector<80x32xf32> -> vector<80x32xf32>
    %20 = arith.addf %15, %19 : vector<80x32xf32>
    %21 = vector.extract_strided_slice %4 {offsets = [10, 0], sizes = [80, 64], strides = [1, 1]} : vector<110x64xbf16> to vector<80x64xbf16>
    %c3 = arith.constant 3 : index
    %c0_13 = arith.constant 0 : index
    %c0_14 = arith.constant 0 : index
    %22 = vector.load %arg2[%c3, %c0_13, %c0_14] : memref<9x64x32xbf16, #tpu.memory_space<vmem>>, vector<1x64x32xbf16>
    %23 = vector.shape_cast %22 : vector<1x64x32xbf16> to vector<64x32xbf16>
    %cst_15 = arith.constant dense<0.000000e+00> : vector<80x32xf32>
    %24 = tpu.matmul %21, %23, %cst_15 {dimension_numbers = #tpu.dot_dimension_numbers<[1], [0], [0], [1], [0, 0, 1, 1], [], []>} : vector<80x64xbf16>, vector<64x32xbf16>, vector<80x32xf32> -> vector<80x32xf32>
    %25 = arith.addf %20, %24 : vector<80x32xf32>
    %26 = vector.extract_strided_slice %4 {offsets = [11, 0], sizes = [80, 64], strides = [1, 1]} : vector<110x64xbf16> to vector<80x64xbf16>
    %c4 = arith.constant 4 : index
    %c0_16 = arith.constant 0 : index
    %c0_17 = arith.constant 0 : index
    %27 = vector.load %arg2[%c4, %c0_16, %c0_17] : memref<9x64x32xbf16, #tpu.memory_space<vmem>>, vector<1x64x32xbf16>
    %28 = vector.shape_cast %27 : vector<1x64x32xbf16> to vector<64x32xbf16>
    %cst_18 = arith.constant dense<0.000000e+00> : vector<80x32xf32>
    %29 = tpu.matmul %26, %28, %cst_18 {dimension_numbers = #tpu.dot_dimension_numbers<[1], [0], [0], [1], [0, 0, 1, 1], [], []>} : vector<80x64xbf16>, vector<64x32xbf16>, vector<80x32xf32> -> vector<80x32xf32>
    %30 = arith.addf %25, %29 : vector<80x32xf32>
    %31 = vector.extract_strided_slice %4 {offsets = [12, 0], sizes = [80, 64], strides = [1, 1]} : vector<110x64xbf16> to vector<80x64xbf16>
    %c5 = arith.constant 5 : index
    %c0_19 = arith.constant 0 : index
    %c0_20 = arith.constant 0 : index
    %32 = vector.load %arg2[%c5, %c0_19, %c0_20] : memref<9x64x32xbf16, #tpu.memory_space<vmem>>, vector<1x64x32xbf16>
    %33 = vector.shape_cast %32 : vector<1x64x32xbf16> to vector<64x32xbf16>
    %cst_21 = arith.constant dense<0.000000e+00> : vector<80x32xf32>
    %34 = tpu.matmul %31, %33, %cst_21 {dimension_numbers = #tpu.dot_dimension_numbers<[1], [0], [0], [1], [0, 0, 1, 1], [], []>} : vector<80x64xbf16>, vector<64x32xbf16>, vector<80x32xf32> -> vector<80x32xf32>
    %35 = arith.addf %30, %34 : vector<80x32xf32>
    %36 = vector.extract_strided_slice %4 {offsets = [20, 0], sizes = [80, 64], strides = [1, 1]} : vector<110x64xbf16> to vector<80x64xbf16>
    %c6 = arith.constant 6 : index
    %c0_22 = arith.constant 0 : index
    %c0_23 = arith.constant 0 : index
    %37 = vector.load %arg2[%c6, %c0_22, %c0_23] : memref<9x64x32xbf16, #tpu.memory_space<vmem>>, vector<1x64x32xbf16>
    %38 = vector.shape_cast %37 : vector<1x64x32xbf16> to vector<64x32xbf16>
    %cst_24 = arith.constant dense<0.000000e+00> : vector<80x32xf32>
    %39 = tpu.matmul %36, %38, %cst_24 {dimension_numbers = #tpu.dot_dimension_numbers<[1], [0], [0], [1], [0, 0, 1, 1], [], []>} : vector<80x64xbf16>, vector<64x32xbf16>, vector<80x32xf32> -> vector<80x32xf32>
    %40 = arith.addf %35, %39 : vector<80x32xf32>
    %41 = vector.extract_strided_slice %4 {offsets = [21, 0], sizes = [80, 64], strides = [1, 1]} : vector<110x64xbf16> to vector<80x64xbf16>
    %c7 = arith.constant 7 : index
    %c0_25 = arith.constant 0 : index
    %c0_26 = arith.constant 0 : index
    %42 = vector.load %arg2[%c7, %c0_25, %c0_26] : memref<9x64x32xbf16, #tpu.memory_space<vmem>>, vector<1x64x32xbf16>
    %43 = vector.shape_cast %42 : vector<1x64x32xbf16> to vector<64x32xbf16>
    %cst_27 = arith.constant dense<0.000000e+00> : vector<80x32xf32>
    %44 = tpu.matmul %41, %43, %cst_27 {dimension_numbers = #tpu.dot_dimension_numbers<[1], [0], [0], [1], [0, 0, 1, 1], [], []>} : vector<80x64xbf16>, vector<64x32xbf16>, vector<80x32xf32> -> vector<80x32xf32>
    %45 = arith.addf %40, %44 : vector<80x32xf32>
    %46 = vector.extract_strided_slice %4 {offsets = [22, 0], sizes = [80, 64], strides = [1, 1]} : vector<110x64xbf16> to vector<80x64xbf16>
    %c8 = arith.constant 8 : index
    %c0_28 = arith.constant 0 : index
    %c0_29 = arith.constant 0 : index
    %47 = vector.load %arg2[%c8, %c0_28, %c0_29] : memref<9x64x32xbf16, #tpu.memory_space<vmem>>, vector<1x64x32xbf16>
    %48 = vector.shape_cast %47 : vector<1x64x32xbf16> to vector<64x32xbf16>
    %cst_30 = arith.constant dense<0.000000e+00> : vector<80x32xf32>
    %49 = tpu.matmul %46, %48, %cst_30 {dimension_numbers = #tpu.dot_dimension_numbers<[1], [0], [0], [1], [0, 0, 1, 1], [], []>} : vector<80x64xbf16>, vector<64x32xbf16>, vector<80x32xf32> -> vector<80x32xf32>
    %50 = arith.addf %45, %49 : vector<80x32xf32>
    %c0_31 = arith.constant 0 : index
    %c0_32 = arith.constant 0 : index
    %51 = vector.load %arg3[%c0_31, %c0_32] : memref<1x32xf32, #tpu.memory_space<vmem>>, vector<1x32xf32>
    %52 = vector.broadcast %51 : vector<1x32xf32> to vector<80x32xf32>
    %53 = arith.addf %50, %52 : vector<80x32xf32>
    %c0_33 = arith.constant 0 : index
    %c0_34 = arith.constant 0 : index
    %c0_35 = arith.constant 0 : index
    %54 = vector.load %arg4[%c0_33, %c0_34, %c0_35] : memref<1x80x32xf32, #tpu.memory_space<vmem>>, vector<1x80x32xf32>
    %55 = vector.shape_cast %54 : vector<1x80x32xf32> to vector<80x32xf32>
    %56 = vector.shape_cast %53 : vector<80x32xf32> to vector<1x80x32xf32>
    tpu.vector_store %arg4[%c0_33, %c0_34, %c0_35], %56 {strides = array<i32>} : memref<1x80x32xf32, #tpu.memory_space<vmem>>, vector<1x80x32xf32>,
    return
  }
  func.func @transform_0(%arg0: i32) -> (i32, i32, i32) {
    %c0_i32 = arith.constant 0 : i32
    %c0_i32_0 = arith.constant 0 : i32
    %c0_i32_1 = arith.constant 0 : i32
    return %arg0, %c0_i32, %c0_i32_0 : i32, i32, i32
  }
  func.func @transform_1(%arg0: i32) -> (i32, i32, i32) {
    %c0_i32 = arith.constant 0 : i32
    %c0_i32_0 = arith.constant 0 : i32
    %c0_i32_1 = arith.constant 0 : i32
    %c0_i32_2 = arith.constant 0 : i32
    return %c0_i32, %c0_i32_0, %c0_i32_1 : i32, i32, i32
  }
  func.func @transform_2(%arg0: i32) -> (i32, i32) {
    %c0_i32 = arith.constant 0 : i32
    %c0_i32_0 = arith.constant 0 : i32
    %c0_i32_1 = arith.constant 0 : i32
    return %c0_i32, %c0_i32_0 : i32, i32
  }
  func.func @transform_3(%arg0: i32) -> (i32, i32, i32) {
    %c0_i32 = arith.constant 0 : i32
    %c0_i32_0 = arith.constant 0 : i32
    %c0_i32_1 = arith.constant 0 : i32
    return %arg0, %c0_i32, %c0_i32_0 : i32, i32, i32
  }
}

module attributes {stable_mosaic.version = 11 : i64} {
  func.func @_relu_conv1x1_add_kernel(%arg0: i32, %arg1: memref<512x16xf32, #tpu.memory_space<vmem>>, %arg2: memref<512x32xf32, #tpu.memory_space<vmem>>, %arg3: memref<16x32xbf16, #tpu.memory_space<vmem>>, %arg4: memref<1x32xf32, #tpu.memory_space<vmem>>, %arg5: memref<512x32xf32, #tpu.memory_space<vmem>>) attributes {dimension_semantics = [#tpu.dimension_semantics<parallel>], iteration_bounds = array<i64: 1>, scalar_prefetch = 0 : i64, scratch_operands = 0 : i64, tpu.core_type = #tpu.core_type<tc>, window_params = [{transform_indices = @transform_0, window_bounds = array<i64: 512, 16>}, {transform_indices = @transform_1, window_bounds = array<i64: 512, 32>}, {pipeline_mode = #tpu.pipeline_mode<synchronous>, transform_indices = @transform_2, window_bounds = array<i64: 16, 32>}, {pipeline_mode = #tpu.pipeline_mode<synchronous>, transform_indices = @transform_3, window_bounds = array<i64: 1, 32>}, {transform_indices = @transform_4, window_bounds = array<i64: 512, 32>}]} {
    %c0 = arith.constant 0 : index
    %c0_0 = arith.constant 0 : index
    %0 = vector.load %arg1[%c0, %c0_0] : memref<512x16xf32, #tpu.memory_space<vmem>>, vector<512x16xf32>
    %cst = arith.constant 0.000000e+00 : f32
    %1 = vector.broadcast %cst : f32 to vector<512x16xf32>
    %2 = arith.maximumf %0, %1 : vector<512x16xf32>
    %3 = arith.truncf %2 : vector<512x16xf32> to vector<512x16xbf16>
    %c0_1 = arith.constant 0 : index
    %c0_2 = arith.constant 0 : index
    %4 = vector.load %arg3[%c0_1, %c0_2] : memref<16x32xbf16, #tpu.memory_space<vmem>>, vector<16x32xbf16>
    %cst_3 = arith.constant dense<0.000000e+00> : vector<512x32xf32>
    %5 = tpu.matmul %3, %4, %cst_3 {dimension_numbers = #tpu.dot_dimension_numbers<[1], [0], [0], [1], [0, 0, 1, 1], [], []>} : vector<512x16xbf16>, vector<16x32xbf16>, vector<512x32xf32> -> vector<512x32xf32>
    %c0_4 = arith.constant 0 : index
    %c0_5 = arith.constant 0 : index
    %6 = vector.load %arg4[%c0_4, %c0_5] : memref<1x32xf32, #tpu.memory_space<vmem>>, vector<1x32xf32>
    %7 = vector.broadcast %6 : vector<1x32xf32> to vector<512x32xf32>
    %8 = arith.addf %5, %7 : vector<512x32xf32>
    %c0_6 = arith.constant 0 : index
    %c0_7 = arith.constant 0 : index
    %9 = vector.load %arg2[%c0_6, %c0_7] : memref<512x32xf32, #tpu.memory_space<vmem>>, vector<512x32xf32>
    %10 = arith.addf %8, %9 : vector<512x32xf32>
    %c0_8 = arith.constant 0 : index
    %c0_9 = arith.constant 0 : index
    %11 = vector.load %arg5[%c0_8, %c0_9] : memref<512x32xf32, #tpu.memory_space<vmem>>, vector<512x32xf32>
    tpu.vector_store %arg5[%c0_8, %c0_9], %10 {strides = array<i32>} : memref<512x32xf32, #tpu.memory_space<vmem>>, vector<512x32xf32>,
    return
  }
  func.func @transform_0(%arg0: i32) -> (i32, i32) {
    %c0_i32 = arith.constant 0 : i32
    %c0_i32_0 = arith.constant 0 : i32
    return %arg0, %c0_i32 : i32, i32
  }
  func.func @transform_1(%arg0: i32) -> (i32, i32) {
    %c0_i32 = arith.constant 0 : i32
    %c0_i32_0 = arith.constant 0 : i32
    return %arg0, %c0_i32 : i32, i32
  }
  func.func @transform_2(%arg0: i32) -> (i32, i32) {
    %c0_i32 = arith.constant 0 : i32
    %c0_i32_0 = arith.constant 0 : i32
    %c0_i32_1 = arith.constant 0 : i32
    return %c0_i32, %c0_i32_0 : i32, i32
  }
  func.func @transform_3(%arg0: i32) -> (i32, i32) {
    %c0_i32 = arith.constant 0 : i32
    %c0_i32_0 = arith.constant 0 : i32
    %c0_i32_1 = arith.constant 0 : i32
    return %c0_i32, %c0_i32_0 : i32, i32
  }
  func.func @transform_4(%arg0: i32) -> (i32, i32) {
    %c0_i32 = arith.constant 0 : i32
    %c0_i32_0 = arith.constant 0 : i32
    return %arg0, %c0_i32 : i32, i32
  }
}

module attributes {stable_mosaic.version = 11 : i64} {
  func.func @_relu_conv3x3_kernel(%arg0: i32, %arg1: memref<1x342x32xf32, #tpu.memory_space<vmem>>, %arg2: memref<9x32x16xbf16, #tpu.memory_space<vmem>>, %arg3: memref<1x16xf32, #tpu.memory_space<vmem>>, %arg4: memref<1x288x16xf32, #tpu.memory_space<vmem>>) attributes {dimension_semantics = [#tpu.dimension_semantics<parallel>], iteration_bounds = array<i64: 2>, scalar_prefetch = 0 : i64, scratch_operands = 0 : i64, tpu.core_type = #tpu.core_type<tc>, window_params = [{transform_indices = @transform_0, window_bounds = array<i64: 1, 342, 32>}, {pipeline_mode = #tpu.pipeline_mode<synchronous>, transform_indices = @transform_1, window_bounds = array<i64: 9, 32, 16>}, {pipeline_mode = #tpu.pipeline_mode<synchronous>, transform_indices = @transform_2, window_bounds = array<i64: 1, 16>}, {transform_indices = @transform_3, window_bounds = array<i64: 1, 288, 16>}]} {
    %c0 = arith.constant 0 : index
    %c0_0 = arith.constant 0 : index
    %c0_1 = arith.constant 0 : index
    %0 = vector.load %arg1[%c0, %c0_0, %c0_1] : memref<1x342x32xf32, #tpu.memory_space<vmem>>, vector<1x342x32xf32>
    %1 = vector.shape_cast %0 : vector<1x342x32xf32> to vector<342x32xf32>
    %cst = arith.constant 0.000000e+00 : f32
    %2 = vector.broadcast %cst : f32 to vector<342x32xf32>
    %3 = arith.maximumf %1, %2 : vector<342x32xf32>
    %4 = arith.truncf %3 : vector<342x32xf32> to vector<342x32xbf16>
    %cst_2 = arith.constant 0.000000e+00 : f32
    %5 = vector.broadcast %cst_2 : f32 to vector<288x16xf32>
    %6 = vector.extract_strided_slice %4 {offsets = [0, 0], sizes = [288, 32], strides = [1, 1]} : vector<342x32xbf16> to vector<288x32xbf16>
    %c0_3 = arith.constant 0 : index
    %c0_4 = arith.constant 0 : index
    %c0_5 = arith.constant 0 : index
    %7 = vector.load %arg2[%c0_3, %c0_4, %c0_5] : memref<9x32x16xbf16, #tpu.memory_space<vmem>>, vector<1x32x16xbf16>
    %8 = vector.shape_cast %7 : vector<1x32x16xbf16> to vector<32x16xbf16>
    %cst_6 = arith.constant dense<0.000000e+00> : vector<288x16xf32>
    %9 = tpu.matmul %6, %8, %cst_6 {dimension_numbers = #tpu.dot_dimension_numbers<[1], [0], [0], [1], [0, 0, 1, 1], [], []>} : vector<288x32xbf16>, vector<32x16xbf16>, vector<288x16xf32> -> vector<288x16xf32>
    %10 = arith.addf %5, %9 : vector<288x16xf32>
    %11 = vector.extract_strided_slice %4 {offsets = [1, 0], sizes = [288, 32], strides = [1, 1]} : vector<342x32xbf16> to vector<288x32xbf16>
    %c1 = arith.constant 1 : index
    %c0_7 = arith.constant 0 : index
    %c0_8 = arith.constant 0 : index
    %12 = vector.load %arg2[%c1, %c0_7, %c0_8] : memref<9x32x16xbf16, #tpu.memory_space<vmem>>, vector<1x32x16xbf16>
    %13 = vector.shape_cast %12 : vector<1x32x16xbf16> to vector<32x16xbf16>
    %cst_9 = arith.constant dense<0.000000e+00> : vector<288x16xf32>
    %14 = tpu.matmul %11, %13, %cst_9 {dimension_numbers = #tpu.dot_dimension_numbers<[1], [0], [0], [1], [0, 0, 1, 1], [], []>} : vector<288x32xbf16>, vector<32x16xbf16>, vector<288x16xf32> -> vector<288x16xf32>
    %15 = arith.addf %10, %14 : vector<288x16xf32>
    %16 = vector.extract_strided_slice %4 {offsets = [2, 0], sizes = [288, 32], strides = [1, 1]} : vector<342x32xbf16> to vector<288x32xbf16>
    %c2 = arith.constant 2 : index
    %c0_10 = arith.constant 0 : index
    %c0_11 = arith.constant 0 : index
    %17 = vector.load %arg2[%c2, %c0_10, %c0_11] : memref<9x32x16xbf16, #tpu.memory_space<vmem>>, vector<1x32x16xbf16>
    %18 = vector.shape_cast %17 : vector<1x32x16xbf16> to vector<32x16xbf16>
    %cst_12 = arith.constant dense<0.000000e+00> : vector<288x16xf32>
    %19 = tpu.matmul %16, %18, %cst_12 {dimension_numbers = #tpu.dot_dimension_numbers<[1], [0], [0], [1], [0, 0, 1, 1], [], []>} : vector<288x32xbf16>, vector<32x16xbf16>, vector<288x16xf32> -> vector<288x16xf32>
    %20 = arith.addf %15, %19 : vector<288x16xf32>
    %21 = vector.extract_strided_slice %4 {offsets = [18, 0], sizes = [288, 32], strides = [1, 1]} : vector<342x32xbf16> to vector<288x32xbf16>
    %c3 = arith.constant 3 : index
    %c0_13 = arith.constant 0 : index
    %c0_14 = arith.constant 0 : index
    %22 = vector.load %arg2[%c3, %c0_13, %c0_14] : memref<9x32x16xbf16, #tpu.memory_space<vmem>>, vector<1x32x16xbf16>
    %23 = vector.shape_cast %22 : vector<1x32x16xbf16> to vector<32x16xbf16>
    %cst_15 = arith.constant dense<0.000000e+00> : vector<288x16xf32>
    %24 = tpu.matmul %21, %23, %cst_15 {dimension_numbers = #tpu.dot_dimension_numbers<[1], [0], [0], [1], [0, 0, 1, 1], [], []>} : vector<288x32xbf16>, vector<32x16xbf16>, vector<288x16xf32> -> vector<288x16xf32>
    %25 = arith.addf %20, %24 : vector<288x16xf32>
    %26 = vector.extract_strided_slice %4 {offsets = [19, 0], sizes = [288, 32], strides = [1, 1]} : vector<342x32xbf16> to vector<288x32xbf16>
    %c4 = arith.constant 4 : index
    %c0_16 = arith.constant 0 : index
    %c0_17 = arith.constant 0 : index
    %27 = vector.load %arg2[%c4, %c0_16, %c0_17] : memref<9x32x16xbf16, #tpu.memory_space<vmem>>, vector<1x32x16xbf16>
    %28 = vector.shape_cast %27 : vector<1x32x16xbf16> to vector<32x16xbf16>
    %cst_18 = arith.constant dense<0.000000e+00> : vector<288x16xf32>
    %29 = tpu.matmul %26, %28, %cst_18 {dimension_numbers = #tpu.dot_dimension_numbers<[1], [0], [0], [1], [0, 0, 1, 1], [], []>} : vector<288x32xbf16>, vector<32x16xbf16>, vector<288x16xf32> -> vector<288x16xf32>
    %30 = arith.addf %25, %29 : vector<288x16xf32>
    %31 = vector.extract_strided_slice %4 {offsets = [20, 0], sizes = [288, 32], strides = [1, 1]} : vector<342x32xbf16> to vector<288x32xbf16>
    %c5 = arith.constant 5 : index
    %c0_19 = arith.constant 0 : index
    %c0_20 = arith.constant 0 : index
    %32 = vector.load %arg2[%c5, %c0_19, %c0_20] : memref<9x32x16xbf16, #tpu.memory_space<vmem>>, vector<1x32x16xbf16>
    %33 = vector.shape_cast %32 : vector<1x32x16xbf16> to vector<32x16xbf16>
    %cst_21 = arith.constant dense<0.000000e+00> : vector<288x16xf32>
    %34 = tpu.matmul %31, %33, %cst_21 {dimension_numbers = #tpu.dot_dimension_numbers<[1], [0], [0], [1], [0, 0, 1, 1], [], []>} : vector<288x32xbf16>, vector<32x16xbf16>, vector<288x16xf32> -> vector<288x16xf32>
    %35 = arith.addf %30, %34 : vector<288x16xf32>
    %36 = vector.extract_strided_slice %4 {offsets = [36, 0], sizes = [288, 32], strides = [1, 1]} : vector<342x32xbf16> to vector<288x32xbf16>
    %c6 = arith.constant 6 : index
    %c0_22 = arith.constant 0 : index
    %c0_23 = arith.constant 0 : index
    %37 = vector.load %arg2[%c6, %c0_22, %c0_23] : memref<9x32x16xbf16, #tpu.memory_space<vmem>>, vector<1x32x16xbf16>
    %38 = vector.shape_cast %37 : vector<1x32x16xbf16> to vector<32x16xbf16>
    %cst_24 = arith.constant dense<0.000000e+00> : vector<288x16xf32>
    %39 = tpu.matmul %36, %38, %cst_24 {dimension_numbers = #tpu.dot_dimension_numbers<[1], [0], [0], [1], [0, 0, 1, 1], [], []>} : vector<288x32xbf16>, vector<32x16xbf16>, vector<288x16xf32> -> vector<288x16xf32>
    %40 = arith.addf %35, %39 : vector<288x16xf32>
    %41 = vector.extract_strided_slice %4 {offsets = [37, 0], sizes = [288, 32], strides = [1, 1]} : vector<342x32xbf16> to vector<288x32xbf16>
    %c7 = arith.constant 7 : index
    %c0_25 = arith.constant 0 : index
    %c0_26 = arith.constant 0 : index
    %42 = vector.load %arg2[%c7, %c0_25, %c0_26] : memref<9x32x16xbf16, #tpu.memory_space<vmem>>, vector<1x32x16xbf16>
    %43 = vector.shape_cast %42 : vector<1x32x16xbf16> to vector<32x16xbf16>
    %cst_27 = arith.constant dense<0.000000e+00> : vector<288x16xf32>
    %44 = tpu.matmul %41, %43, %cst_27 {dimension_numbers = #tpu.dot_dimension_numbers<[1], [0], [0], [1], [0, 0, 1, 1], [], []>} : vector<288x32xbf16>, vector<32x16xbf16>, vector<288x16xf32> -> vector<288x16xf32>
    %45 = arith.addf %40, %44 : vector<288x16xf32>
    %46 = vector.extract_strided_slice %4 {offsets = [38, 0], sizes = [288, 32], strides = [1, 1]} : vector<342x32xbf16> to vector<288x32xbf16>
    %c8 = arith.constant 8 : index
    %c0_28 = arith.constant 0 : index
    %c0_29 = arith.constant 0 : index
    %47 = vector.load %arg2[%c8, %c0_28, %c0_29] : memref<9x32x16xbf16, #tpu.memory_space<vmem>>, vector<1x32x16xbf16>
    %48 = vector.shape_cast %47 : vector<1x32x16xbf16> to vector<32x16xbf16>
    %cst_30 = arith.constant dense<0.000000e+00> : vector<288x16xf32>
    %49 = tpu.matmul %46, %48, %cst_30 {dimension_numbers = #tpu.dot_dimension_numbers<[1], [0], [0], [1], [0, 0, 1, 1], [], []>} : vector<288x32xbf16>, vector<32x16xbf16>, vector<288x16xf32> -> vector<288x16xf32>
    %50 = arith.addf %45, %49 : vector<288x16xf32>
    %c0_31 = arith.constant 0 : index
    %c0_32 = arith.constant 0 : index
    %51 = vector.load %arg3[%c0_31, %c0_32] : memref<1x16xf32, #tpu.memory_space<vmem>>, vector<1x16xf32>
    %52 = vector.broadcast %51 : vector<1x16xf32> to vector<288x16xf32>
    %53 = arith.addf %50, %52 : vector<288x16xf32>
    %c0_33 = arith.constant 0 : index
    %c0_34 = arith.constant 0 : index
    %c0_35 = arith.constant 0 : index
    %54 = vector.load %arg4[%c0_33, %c0_34, %c0_35] : memref<1x288x16xf32, #tpu.memory_space<vmem>>, vector<1x288x16xf32>
    %55 = vector.shape_cast %54 : vector<1x288x16xf32> to vector<288x16xf32>
    %56 = vector.shape_cast %53 : vector<288x16xf32> to vector<1x288x16xf32>
    tpu.vector_store %arg4[%c0_33, %c0_34, %c0_35], %56 {strides = array<i32>} : memref<1x288x16xf32, #tpu.memory_space<vmem>>, vector<1x288x16xf32>,
    return
  }
  func.func @transform_0(%arg0: i32) -> (i32, i32, i32) {
    %c0_i32 = arith.constant 0 : i32
    %c0_i32_0 = arith.constant 0 : i32
    %c0_i32_1 = arith.constant 0 : i32
    return %arg0, %c0_i32, %c0_i32_0 : i32, i32, i32
  }
  func.func @transform_1(%arg0: i32) -> (i32, i32, i32) {
    %c0_i32 = arith.constant 0 : i32
    %c0_i32_0 = arith.constant 0 : i32
    %c0_i32_1 = arith.constant 0 : i32
    %c0_i32_2 = arith.constant 0 : i32
    return %c0_i32, %c0_i32_0, %c0_i32_1 : i32, i32, i32
  }
  func.func @transform_2(%arg0: i32) -> (i32, i32) {
    %c0_i32 = arith.constant 0 : i32
    %c0_i32_0 = arith.constant 0 : i32
    %c0_i32_1 = arith.constant 0 : i32
    return %c0_i32, %c0_i32_0 : i32, i32
  }
  func.func @transform_3(%arg0: i32) -> (i32, i32, i32) {
    %c0_i32 = arith.constant 0 : i32
    %c0_i32_0 = arith.constant 0 : i32
    %c0_i32_1 = arith.constant 0 : i32
    return %arg0, %c0_i32, %c0_i32_0 : i32, i32, i32
  }
}

</mosaic_0001>

<bundles_post_ra>
// kernel: decoder_forward.6
= control target key start
LH: loop header
LB: loop body
LE: loop exit
PB: predicated region body
PF: predicated region fallthrough
CT: control target
= control target key end

     0   :  { %9 = vsyncpa [#allocation3], 0  ;;  %s298_s0 = inlined_call_operand.hbm [shape: f32[32,64], index: 0, kind: input, shape index: {}]   ;;  %s299_s1 = inlined_call_operand.vmem [shape: f32[32,64], index: 1, kind: input, shape index: {}]   ;;  %s300_s2 = inlined_call_operand.vmem [shape: bf16[64,64], index: 2, kind: input, shape index: {}]   ;;  %s301_s3 = inlined_call_operand.hbm [shape: f32[1,64], index: 3, kind: input, shape index: {}]   ;;  %s302_s4 = inlined_call_operand.vmem [shape: f32[32,64], index: 4, kind: output, shape index: {}]  }
   0x1   :  { %s15_s17 = sshll.u32 %s298_s0, 4  ;;  %s16_s17 = int_to_ptr.hbm [resolvable:$true] %s15_s17 }
   0x2   :  { %10 = vsyncpa [#allocation5], 0  ;;  %s221_s18 = smov [#allocation2]   ;;  %s33_s22 = sshll.u32 %s301_s3, 4  ;;  %s34_s22 = int_to_ptr.hbm [resolvable:$true] %s33_s22 }
   0x3   :  { %s17_s19 = sshll.u32 %s221_s18, 4  ;;  %s222_s23 = smov 128   ;;  %s18_s19 = int_to_ptr.vmem [resolvable:$true] %s17_s19 }
   0x4   :  { %s223_s24 = smov 8   ;;  %s224_s25 = smov [#allocation4]  }
   0x5   :  { %23 = dma.hbm_to_vmem [thread:$0]  %s16_s17, 512, %s18_s19, [#allocation3], %s222_s23, %s222_s23, %s223_s24  }
   0x6   :  { %s35_s26 = sshll.u32 %s224_s25, 4  ;;  %s36_s26 = int_to_ptr.vmem [resolvable:$true] %s35_s26 }
   0x7   :  { %38 = dma.hbm_to_vmem [thread:$0]  %s34_s22, 16, %s36_s26, [#allocation5]  }
   0x8   :  { %217 = dma.done.wait [#allocation3], 512  }
   0x9   :  { %218 = vsyncadd [#allocation3], 4294966784 }
   0xa   :  { %219 = dma.done.wait [#allocation5], 16  }
   0xb   :  { %220 = vsyncadd [#allocation5], 4294967280  ;;  %v159_v0 = vld [vmem:[%s300_s2 + $0x18] sm:$0xff]  ;;  %v158_v1 = vld [vmem:[%s300_s2 + $0x10] sm:$0xff]  ;;  %vm94_vm0 = vcmask 523264  }
   0xc   :  { %105 = vmatpush.bf16.msra.mxu0 %v159_v0  ;;  %160 = vmatpush.bf16.msra.mxu1 %v159_v0  ;;  %v157_v2 = vld [vmem:[%s300_s2 + $0x8] sm:$0xff]  ;;  %v48_v3 = vld [vmem:[#allocation2] sm:$0xff]  ;;  %v50_v5 = vld [vmem:[#allocation2 + $0x10] sm:$0xff] }
   0xd   :  { %v49_v4 = vld [vmem:[#allocation2 + $0x8] sm:$0xff]  ;;  %v51_v6 = vld [vmem:[#allocation2 + $0x18] sm:$0xff]  ;;  %v52_v7 = vmax.f32 %v48_v3, 0.0  ;;  %v54_v9 = vmax.f32 %v50_v5, 0.0  ;;  %v156_v11 = vld [vmem:[%s300_s2] sm:$0xff] }
   0xe   :  { %v53_v8 = vmax.f32 %v49_v4, 0.0  ;;  %v55_v10 = vmax.f32 %v51_v6, 0.0  ;;  %v168_v14 = vld [vmem:[#allocation4] ss:$0 sm:$0xff]  ;;  %v122_v18 = vld [vmem:[%s299_s1 + $0x10] sm:$0xff]  ;;  %v121_v24 = vld [vmem:[%s299_s1 + $0x8] sm:$0xff] }
   0xf   :  { %v120_v16 = vld [vmem:[%s299_s1] sm:$0xff]  ;;  %v123_v26 = vld [vmem:[%s299_s1 + $0x18] sm:$0xff] }
  0x10   :  { %106 = vmatpush.bf16.msra.mxu0 %v158_v1  ;;  %161 = vmatpush.bf16.msra.mxu1 %v158_v1  ;;  %v56_v12 = vpack.c.bf16 %v53_v8, %v52_v7  ;;  %v57_v13 = vpack.c.bf16 %v55_v10, %v54_v9 }
  0x14   :  { %107 = vmatpush.bf16.msra.mxu0 %v157_v2  ;;  %162 = vmatpush.bf16.msra.mxu1 %v157_v2 }
  0x18   :  { %108 = vmatpush.bf16.msra.mxu0 %v156_v11  ;;  %163 = vmatpush.bf16.msra.mxu1 %v156_v11 }
  0x1b   :  { %154 = vmatmul.msk.bf16.vlgmr.msra.gmra.mxu0 %vm94_vm0, %v56_v12  ;;  %155 = vmatmul.msk.bf16.vlgmr.msra.gmra.mxu1 %vm94_vm0, %v57_v13 }
  0x98   :  { %v110_v15 = vpop.f32.mrf.mxu0  ;;  %v115_v17 = vpop.f32.mrf.mxu1 }
  0x99   :  { %v111_v19 = vadd.f32 %v168_v14, %v110_v15  ;;  %v116_v20 = vadd.f32 %v168_v14, %v115_v17 }
  0x9b   :  { %v124_v21 = vadd.f32 %v120_v16, %v111_v19  ;;  %v126_v22 = vadd.f32 %v122_v18, %v116_v20 }
  0x9d   :  { %128 = vst.msk [vmem:[%s302_s4] sm:$0xff] %vm94_vm0, %v124_v21 }
  0x9e   :  { %130 = vst.msk [vmem:[%s302_s4 + $0x10] sm:$0xff] %vm94_vm0, %v126_v22 }
  0xa0   :  { %v112_v23 = vpop.f32.mrf.mxu0  ;;  %v117_v25 = vpop.f32.mrf.mxu1 }
  0xa1   :  { %v113_v27 = vadd.f32 %v168_v14, %v112_v23  ;;  %v118_v28 = vadd.f32 %v168_v14, %v117_v25 }
  0xa3   :  { %v125_v29 = vadd.f32 %v121_v24, %v113_v27  ;;  %v127_v30 = vadd.f32 %v123_v26, %v118_v28 }
  0xa5   :  { %129 = vst.msk [vmem:[%s302_s4 + $0x8] sm:$0xff] %vm94_vm0, %v125_v29 }
  0xa6   :  { %131 = vst.msk [vmem:[%s302_s4 + $0x18] sm:$0xff] %vm94_vm0, %v127_v30 }
  0xa7   :  { %136 = vsyncpa [#allocation3], 1 }
  0xa8   :  { %137 = vsyncpa [#allocation5], 1 }

// kernel: decoder_forward.7
= control target key start
LH: loop header
LB: loop body
LE: loop exit
PB: predicated region body
PF: predicated region fallthrough
CT: control target
= control target key end

     0   :  { %s1171_s12 = smov 0   ;;  %s1374_s0 = inlined_call_operand.vmem [shape: f32[2,42,64], index: 0, kind: input, shape index: {}]   ;;  %s1375_s1 = inlined_call_operand.vmem [shape: bf16[9,64,64], index: 1, kind: input, shape index: {}]   ;;  %s1376_s2 = inlined_call_operand.vmem [shape: f32[1,64], index: 2, kind: input, shape index: {}]   ;;  %s1377_s3 = inlined_call_operand.vmem [shape: f32[2,24,64], index: 3, kind: output, shape index: {}]  }
   0x1 LB: > { %s857_s13 = sadd.s32 4294967295, %s1149_s12   ;;  %p861_p0 = scmp.ge.s32.totalorder %s1149_s12, 1  ;;  %s1149_s12 = sphi %s1171_s12, %s13_s12  }
   0x2   : > { %p137_p1 = scmp.lt.s32.totalorder %s1149_s12, 3 }
   0x4   : > { %p138_p2 = pnand %p861_p0, %p137_p1 }
   0x5   : > { %p161_p3 = scmp.lt.s32.totalorder (!%p138_p2), %s857_s13, 1 }
   0x6   : > { %141 = sbr.rel (%p138_p2) target bundleno = 232 (0xe8), region = 32 }
   0xb   : > { %v1099_v0 = vld [vmem:[%s1375_s1 + $0x38] sm:$0xff]  ;;  %v1098_v3 = vld [vmem:[%s1375_s1 + $0x30] sm:$0xff]  ;;  %s1379_s13 = smov (!%p161_p3, %s857_s13), 1  ;;  %v1097_v6 = vld [vmem:[%s1375_s1 + $0x28] sm:$0xff]  ;;  %vm336_vm0 = vcmask 1046528   ;;  %vm400_vm1 = vcmask 1044480  }
   0xc   : > { %v1103_v1 = vld [vmem:[%s1375_s1 + $0x58] sm:$0xff]  ;;  %1128 = vmatpush.bf16.msra.mxu1 %v1099_v0  ;;  %265 = vmatpush.bf16.msra.mxu0 %v1099_v0  ;;  %v1102_v4 = vld [vmem:[%s1375_s1 + $0x50] sm:$0xff]  ;;  %s1132_s26 = smul.u32 48, %s1379_s13  ;;  %v1101_v7 = vld [vmem:[%s1375_s1 + $0x48] sm:$0xff]  ;;  %vm254_vm2 = vcmask 523264   ;;  %vm597_vm5 = vcmask 1045504  }
   0xd   : > { %v1107_v2 = vld [vmem:[%s1375_s1 + $0x78] sm:$0xff]  ;;  %374 = vmatpush.bf16.msra.mxu2 %v1103_v1  ;;  %v1106_v5 = vld [vmem:[%s1375_s1 + $0x70] sm:$0xff]  ;;  %v1105_v8 = vld [vmem:[%s1375_s1 + $0x68] sm:$0xff]  ;;  %vm214_vm3 = vsmask.f32 7424  ;;  %s1133_s15 = smul.u32 24, %s1379_s13 }
   0xe   : > { %438 = vmatpush.bf16.msra.mxu3 %v1107_v2  ;;  %s1212_s8 = scalar_lea.vmem %s1374_s0, %s1132_s26  ;;  %v1096_v17 = vld [vmem:[%s1375_s1 + $0x20] sm:$0xff]  ;;  %v1095_v21 = vld [vmem:[%s1375_s1 + $0x18] sm:$0xff]  ;;  %v1094_v34 = vld [vmem:[%s1375_s1 + $0x10] sm:$0xff]  ;;  %vm464_vm4 = vsmask.f32 4352 }
   0xf   : > { %v174_v9 = vld [vmem:[%s1212_s8 + $0x10] sm:$0xff]  ;;  %v175_v10 = vld [vmem:[%s1212_s8 + $0x18] sm:$0xff]  ;;  %v172_v11 = vld [vmem:[%s1212_s8] sm:$0xff]  ;;  %vm661_vm6 = vsmask.f32 5376  ;;  %s170_s20 = scalar_lea.vmem %s1377_s3, %s1133_s15 }
  0x10   : > { %1129 = vmatpush.bf16.msra.mxu1 %v1098_v3  ;;  %266 = vmatpush.bf16.msra.mxu0 %v1098_v3  ;;  %v179_v12 = vmax.f32 %v174_v9, 0.0  ;;  %v180_v13 = vmax.f32 %v175_v10, 0.0  ;;  %v173_v14 = vld [vmem:[%s1212_s8 + $0x8] sm:$0xff]  ;;  %v177_v15 = vmax.f32 %v172_v11, 0.0  ;;  %v1100_v23 = vld [vmem:[%s1375_s1 + $0x40] sm:$0xff]  ;;  %v1111_v28 = vld [vmem:[%s1375_s1 + $0x98] sm:$0xff] }
  0x11   : > { %375 = vmatpush.bf16.msra.mxu2 %v1102_v4  ;;  %v178_v16 = vmax.f32 %v173_v14, 0.0  ;;  %v1104_v27 = vld [vmem:[%s1375_s1 + $0x60] sm:$0xff]  ;;  %v1119_v30 = vld [vmem:[%s1375_s1 + $0xd8] sm:$0xff]  ;;  %v1110_v43 = vld [vmem:[%s1375_s1 + $0x90] sm:$0xff] }
  0x12   : > { %439 = vmatpush.bf16.msra.mxu3 %v1106_v5  ;;  %v184_v18 = vpack.c.bf16 %v179_v12, %v179_v12  ;;  %v185_v19 = vpack.c.bf16 %v180_v13, %v180_v13  ;;  %v182_v20 = vpack.c.bf16 %v177_v15, %v177_v15  ;;  %v1123_v31 = vld [vmem:[%s1375_s1 + $0xf8] sm:$0xff]  ;;  %v1118_v44 = vld [vmem:[%s1375_s1 + $0xd0] sm:$0xff]  ;;  %v176_v47 = vld [vmem:[%s1212_s8 + $0x20] sm:$0xff] }
  0x13   : > { %v1224_v22 = vpack.c.bf16 %v178_v16, %v178_v16  ;;  %v1122_v46 = vld [vmem:[%s1375_s1 + $0xf0] sm:$0xff]  ;;  %v1093_v51 = vld [vmem:[%s1375_s1 + $0x8] sm:$0xff]  ;;  %v181_v56 = vmax.f32 %v176_v47, 0.0  ;;  %v1092_v59 = vld [vmem:[%s1375_s1] sm:$0xff] }
  0x14   : > { %1130 = vmatpush.bf16.msra.mxu1 %v1097_v6  ;;  %267 = vmatpush.bf16.msra.mxu0 %v1097_v6  ;;  %v1229_v24 = vunpack.c.l.b16 %v184_v18  ;;  %v1231_v25 = vunpack.c.l.b16 %v185_v19  ;;  %v208_v26 = vunpack.c.l.b16 %v182_v20  ;;  %v1109_v54 = vld [vmem:[%s1375_s1 + $0x88] sm:$0xff]  ;;  %v1115_v60 = vld [vmem:[%s1375_s1 + $0xb8] sm:$0xff]  ;;  %v1108_v61 = vld [vmem:[%s1375_s1 + $0x80] sm:$0xff] }
  0x15   : > { %376 = vmatpush.bf16.msra.mxu2 %v1101_v7  ;;  %v209_v29 = vunpack.c.l.b16 %v1224_v22  ;;  %v1117_v55 = vld [vmem:[%s1375_s1 + $0xc8] sm:$0xff]  ;;  %v1116_v62 = vld [vmem:[%s1375_s1 + $0xc0] sm:$0xff]  ;;  %v186_v63 = vpack.c.bf16 %v181_v56, %v181_v56  ;;  %v1127_v0 = vld [vmem:[%s1375_s1 + $0x118] sm:$0xff] }
  0x16   : > { %440 = vmatpush.bf16.msra.mxu3 %v1105_v8  ;;  %v1248_v32 = vpack.c.b16 %v1231_v25, %v1229_v24  ;;  %v1121_v57 = vld [vmem:[%s1375_s1 + $0xe8] sm:$0xff]  ;;  %v1120_v1 = vld [vmem:[%s1375_s1 + $0xe0] sm:$0xff]  ;;  %v1114_v3 = vld [vmem:[%s1375_s1 + $0xb0] sm:$0xff] }
  0x17   : > { %v1252_v33 = vpack.c.b16 %v209_v29, %v208_v26  ;;  %v595_v7 = vunpack.c.l.b16 %v186_v63  ;;  %v1126_v8 = vld [vmem:[%s1375_s1 + $0x110] sm:$0xff]  ;;  %v532_v9 = vpack.c.b16 %v1229_v24, %v209_v29  ;;  %v1113_v12 = vld [vmem:[%s1375_s1 + $0xa8] sm:$0xff]  ;;  %v1112_v20 = vld [vmem:[%s1375_s1 + $0xa0] sm:$0xff] }
  0x18   : > { %1131 = vmatpush.bf16.msra.mxu1 %v1096_v17  ;;  %268 = vmatpush.bf16.msra.mxu0 %v1096_v17  ;;  %v223_v35 = vshll.u32 %v1248_v32, 16  ;;  %v227_v36 = vshrl.u32 %v1248_v32, 16  ;;  %v338_v37 = vrot.slane %v1248_v32, 1  ;;  %v402_v38 = vrot.slane %v1248_v32, 3  ;;  %v1125_v14 = vld [vmem:[%s1375_s1 + $0x108] sm:$0xff] }
  0x19   : > { %377 = vmatpush.bf16.msra.mxu2 %v1100_v23  ;;  %v216_v39 = vshrl.u32 %v1252_v33, 16  ;;  %v218_v40 = vshll.u32 %v1252_v33, 16  ;;  %v337_v41 = vrot.slane %v1252_v33, 1  ;;  %v401_v42 = vrot.slane %v1252_v33, 3 }
  0x1a   : > { %441 = vmatpush.bf16.msra.mxu3 %v1104_v27  ;;  %v225_v45 = vrot.slane %v223_v35, 1  ;;  %v468_v2 = vrot.slane %v227_v36, 3  ;;  %v469_v6 = vrot.slane %v223_v35, 4  ;;  %v596_v13 = vpack.c.b16 %v595_v7, %v1231_v25 }
  0x1b   : > { %v220_v48 = vrot.slane %v218_v40, 1  ;;  %v339_v49 = vsel %vm336_vm0, %v337_v41, %v338_v37  ;;  %v403_v50 = vsel %vm400_vm1, %v401_v42, %v402_v38  ;;  %v465_v4 = vrot.slane %v216_v39, 3 }
  0x1c   : > { %313 = vmatpush.bf16.msrb.mxu1 %v1095_v21  ;;  %506 = vmatpush.bf16.msrb.mxu0 %v1111_v28  ;;  %v229_v52 = vor.u32 %v227_v36, %v225_v45  ;;  %v466_v5 = vrot.slane %v218_v40, 4  ;;  %v470_v11 = vor.u32 %v469_v6, %v468_v2  ;;  %v662_v15 = vshrl.u32 %v532_v9, 16  ;;  %v1124_v21 = vld [vmem:[%s1375_s1 + $0x100] sm:$0xff] }
  0x1d   : > { %635 = vmatpush.bf16.msrb.mxu2 %v1119_v30  ;;  %958 = vmatmul.msk.bf16.vlgmr.msra.gmra.mxu3 %vm254_vm2, %v403_v50  ;;  %v221_v53 = vor.u32 %v220_v48, %v216_v39  ;;  %v665_v17 = vshll.u32 %v532_v9, 16  ;;  %v670_v18 = vshrl.u32 %v596_v13, 16  ;;  %v673_v19 = vshll.u32 %v596_v13, 16 }
  0x1e   : > { %712 = vmatpush.bf16.msrb.mxu3 %v1123_v31  ;;  %932 = vmatmul.msk.bf16.vlgmr.msra.gmra.mxu2 %vm254_vm2, %v339_v49  ;;  %v467_v10 = vor.u32 %v466_v5, %v465_v4  ;;  %v664_v22 = vrot.slane %v662_v15, 2  ;;  %v598_v28 = vrot.slane %v532_v9, 2  ;;  %v599_v29 = vrot.slane %v596_v13, 2 }
  0x1f   : > { %889 = vmatmul.msk.bf16.vlgmr.msra.gmra.mxu1 %vm254_vm2, %v229_v52  ;;  %v226_v58 = vsel %vm214_vm3, %v221_v53, %v225_v45  ;;  %v667_v23 = vrot.slane %v665_v17, 3  ;;  %v672_v26 = vrot.slane %v670_v18, 2  ;;  %v675_v27 = vrot.slane %v673_v19, 3 }
  0x20   : > { %314 = vmatpush.bf16.msrb.mxu1 %v1094_v34  ;;  %507 = vmatpush.bf16.msrb.mxu0 %v1110_v43  ;;  %v471_v16 = vsel %vm464_vm4, %v467_v10, %v470_v11  ;;  %v600_v32 = vsel %vm597_vm5, %v598_v28, %v599_v29  ;;  %v279_v34 = vpack.c.b16 %v1229_v24, %v1229_v24  ;;  %v738_v35 = vrot.slane %v532_v9, 3 }
  0x21   : > { %636 = vmatpush.bf16.msrb.mxu2 %v1118_v44  ;;  %888 = vmatmul.msk.bf16.vlgmr.msra.gmra.mxu0 %vm254_vm2, %v226_v58  ;;  %v668_v30 = vor.u32 %v667_v23, %v664_v22  ;;  %v676_v31 = vor.u32 %v675_v27, %v672_v26  ;;  %v739_v36 = vrot.slane %v596_v13, 3  ;;  %v533_v24 = vpack.c.b16 %v1231_v25, %v1231_v25 }
  0x22   : > { %713 = vmatpush.bf16.msrb.mxu3 %v1122_v46 }
  0x24   : > { %315 = vmatpush.bf16.msrb.mxu1 %v1093_v51  ;;  %508 = vmatpush.bf16.msrb.mxu0 %v1109_v54 }
  0x25   : > { %637 = vmatpush.bf16.msrb.mxu2 %v1117_v55 }
  0x26   : > { %714 = vmatpush.bf16.msrb.mxu3 %v1121_v57 }
  0x28   : > { %316 = vmatpush.bf16.msrb.mxu1 %v1092_v59  ;;  %509 = vmatpush.bf16.msrb.mxu0 %v1108_v61 }
  0x29   : > { %638 = vmatpush.bf16.msrb.mxu2 %v1116_v62 }
  0x2a   : > { %715 = vmatpush.bf16.msrb.mxu3 %v1120_v1 }
  0x2c   : > { %568 = vmatpush.bf16.msra.mxu1 %v1115_v60  ;;  %775 = vmatpush.bf16.msra.mxu0 %v1127_v0 }
  0x2d   : > { %959 = vmatmul.msk.bf16.gmra.mxu3 %vm254_vm2, %v402_v38 }
  0x2e   : > { %933 = vmatmul.msk.bf16.gmra.mxu2 %vm254_vm2, %v338_v37  ;;  %v740_v37 = vsel %vm400_vm1, %v738_v35, %v739_v36 }
  0x2f   : > { %906 = vmatmul.msk.bf16.vlgmr.msrb.gmra.mxu1 %vm254_vm2, %v1252_v33  ;;  %v677_v33 = vsel %vm661_vm6, %v668_v30, %v676_v31 }
  0x30   : > { %569 = vmatpush.bf16.msra.mxu1 %v1114_v3  ;;  %776 = vmatpush.bf16.msra.mxu0 %v1126_v8 }
  0x31   : > { %984 = vmatmul.msk.bf16.vlgmr.msrb.gmra.mxu0 %vm254_vm2, %v471_v16 }
  0x34   : > { %570 = vmatpush.bf16.msra.mxu1 %v1113_v12  ;;  %777 = vmatpush.bf16.msra.mxu0 %v1125_v14  ;;  %v1142_v12 = vld [vmem:[%s1376_s2] ss:$0 sm:$0xff] }
  0x38   : > { %571 = vmatpush.bf16.msra.mxu1 %v1112_v20  ;;  %778 = vmatpush.bf16.msra.mxu0 %v1124_v21 }
  0x3d   : > { %1062 = vmatmul.msk.bf16.vlgmr.msrb.gmra.mxu3 %vm254_vm2, %v677_v33 }
  0x3e   : > { %1036 = vmatmul.msk.bf16.vlgmr.msrb.gmra.mxu2 %vm254_vm2, %v600_v32 }
  0x3f   : > { %907 = vmatmul.msk.bf16.gmra.mxu1 %vm254_vm2, %v279_v34 }
  0x41   : > { %985 = vmatmul.msk.bf16.gmra.mxu0 %vm254_vm2, %v470_v11 }
  0x4d   : > { %1063 = vmatmul.msk.bf16.gmra.mxu3 %vm254_vm2, %v676_v31 }
  0x4e   : > { %1037 = vmatmul.msk.bf16.gmra.mxu2 %vm254_vm2, %v599_v29 }
  0x4f   : > { %1010 = vmatmul.msk.bf16.vlgmr.msra.gmra.mxu1 %vm254_vm2, %v532_v9 }
  0x51   : > { %1088 = vmatmul.msk.bf16.vlgmr.msra.gmra.mxu0 %vm254_vm2, %v740_v37 }
  0x5f   : > { %1011 = vmatmul.msk.bf16.gmra.mxu1 %vm254_vm2, %v533_v24 }
  0x61   : > { %1089 = vmatmul.msk.bf16.gmra.mxu0 %vm254_vm2, %v739_v36 }
  0x9c   : > { %v275_v38 = vpop.f32.mrf.mxu1 }
  0x9e   : > { %v270_v39 = vpop.f32.mrf.mxu0 }
  0xa0   : > { %v443_v41 = vpop.f32.mrf.mxu3 }
  0xa1   : > { %v379_v40 = vpop.f32.mrf.mxu2 }
  0xa4   : > { %v277_v42 = vpop.f32.mrf.mxu1 }
  0xa6   : > { %v272_v43 = vpop.f32.mrf.mxu0 }
  0xa8   : > { %v445_v45 = vpop.f32.mrf.mxu3 }
  0xa9   : > { %v381_v44 = vpop.f32.mrf.mxu2 }
  0xac   : > { %v318_v46 = vpop.f32.mrf.mxu1 }
  0xad   : > { %v319_v55 = vadd.f32 %v318_v46, %v270_v39 }
  0xae   : > { %v511_v47 = vpop.f32.mrf.mxu0 }
  0xaf   : > { %v388_v58 = vadd.f32 %v379_v40, %v319_v55 }
  0xb0   : > { %v448_v49 = vpop.f32.mrf.mxu3 }
  0xb1   : > { %v384_v48 = vpop.f32.mrf.mxu2  ;;  %v452_v61 = vadd.f32 %v443_v41, %v388_v58 }
  0xb3   : > { %v520_v1 = vadd.f32 %v511_v47, %v452_v61 }
  0xb4   : > { %v320_v50 = vpop.f32.mrf.mxu1 }
  0xb5   : > { %v321_v62 = vadd.f32 %v320_v50, %v272_v43 }
  0xb6   : > { %v513_v51 = vpop.f32.mrf.mxu0 }
  0xb7   : > { %v389_v2 = vadd.f32 %v381_v44, %v321_v62 }
  0xb8   : > { %v450_v25 = vpop.f32.mrf.mxu3 }
  0xb9   : > { %v386_v52 = vpop.f32.mrf.mxu2  ;;  %v453_v6 = vadd.f32 %v445_v45, %v389_v2 }
  0xbb   : > { %v521_v13 = vadd.f32 %v513_v51, %v453_v6 }
  0xbc   : > { %v323_v53 = vpop.f32.mrf.mxu1 }
  0xbd   : > { %v324_v7 = vadd.f32 %v323_v53, %v275_v38 }
  0xbe   : > { %v516_v54 = vpop.f32.mrf.mxu0 }
  0xbf   : > { %v390_v14 = vadd.f32 %v384_v48, %v324_v7 }
  0xc0   : > { %v717_v57 = vpop.f32.mrf.mxu3 }
  0xc1   : > { %v640_v56 = vpop.f32.mrf.mxu2  ;;  %v454_v20 = vadd.f32 %v448_v49, %v390_v14 }
  0xc3   : > { %v522_v27 = vadd.f32 %v516_v54, %v454_v20 }
  0xc4   : > { %v325_v59 = vpop.f32.mrf.mxu1 }
  0xc6   : > { %v518_v60 = vpop.f32.mrf.mxu0 }
  0xc8   : > { %v719_v0 = vpop.f32.mrf.mxu3 }
  0xc9   : > { %v642_v63 = vpop.f32.mrf.mxu2 }
  0xcc   : > { %v573_v3 = vpop.f32.mrf.mxu1 }
  0xcd   : > { %v582_v4 = vadd.f32 %v573_v3, %v520_v1 }
  0xce   : > { %v780_v5 = vpop.f32.mrf.mxu0 }
  0xcf   : > { %v649_v8 = vadd.f32 %v640_v56, %v582_v4 }
  0xd0   : > { %v722_v10 = vpop.f32.mrf.mxu3 }
  0xd1   : > { %v645_v9 = vpop.f32.mrf.mxu2  ;;  %v726_v11 = vadd.f32 %v717_v57, %v649_v8 }
  0xd3   : > { %v789_v15 = vadd.f32 %v780_v5, %v726_v11 }
  0xd4   : > { %v575_v16 = vpop.f32.mrf.mxu1 }
  0xd5   : > { %v796_v17 = vadd.f32 %v1142_v12, %v789_v15  ;;  %v583_v18 = vadd.f32 %v575_v16, %v521_v13 }
  0xd6   : > { %v782_v19 = vpop.f32.mrf.mxu0 }
  0xd7   : > { %799 = vst.msk [vmem:[%s170_s20] sm:$0xff] %vm254_vm2, %v796_v17  ;;  %v650_v21 = vadd.f32 %v642_v63, %v583_v18 }
  0xd8   : > { %v724_v23 = vpop.f32.mrf.mxu3 }
  0xd9   : > { %v647_v22 = vpop.f32.mrf.mxu2  ;;  %v727_v26 = vadd.f32 %v719_v0, %v650_v21 }
  0xdb   : > { %v790_v28 = vadd.f32 %v782_v19, %v727_v26 }
  0xdc   : > { %v578_v29 = vpop.f32.mrf.mxu1 }
  0xdd   : > { %v797_v30 = vadd.f32 %v1142_v12, %v790_v28  ;;  %v584_v31 = vadd.f32 %v578_v29, %v522_v27 }
  0xde   : > { %v785_v32 = vpop.f32.mrf.mxu0 }
  0xdf   : > { %800 = vst.msk [vmem:[%s170_s20 + $0x8] sm:$0xff] %vm254_vm2, %v797_v30  ;;  %v651_v33 = vadd.f32 %v645_v9, %v584_v31 }
  0xe1   : > { %v728_v34 = vadd.f32 %v722_v10, %v651_v33 }
  0xe3   : > { %v791_v35 = vadd.f32 %v785_v32, %v728_v34 }
  0xe4   : > { %v580_v36 = vpop.f32.mrf.mxu1 }
  0xe5   : > { %v798_v37 = vadd.f32 %v1142_v12, %v791_v35 }
  0xe6   : > { %v787_v24 = vpop.f32.mrf.mxu0 }
  0xe7   : > { %801 = vst.msk [vmem:[%s170_s20 + $0x10] sm:$0xff] %vm254_vm2, %v798_v37 }
  0xe8 PF: > { %s13_s12 = sadd.s32 1, %s1149_s12  }
  0xe9   : > { %p10_p4 = scmp.ge.s32.totalorder %s13_s12, 4  }
  0xeb   :  { %12 = sbr.rel (!%p10_p4) target bundleno = 1 (0x1), region = 70 }

// kernel: decoder_forward.8
= control target key start
LH: loop header
LB: loop body
LE: loop exit
PB: predicated region body
PF: predicated region fallthrough
CT: control target
= control target key end

     0   :  { %vm78_vm0 = vcmask 261120   ;;  %vm184_vm1 = vcmask 523264   ;;  %s450_s2 = inlined_call_operand.vmem [shape: bf16[32,64], index: 2, kind: input, shape index: {}]   ;;  %s451_s0 = inlined_call_operand.vmem [shape: f32[128,32], index: 0, kind: input, shape index: {}]   ;;  %s452_s3 = inlined_call_operand.vmem [shape: f32[1,64], index: 3, kind: input, shape index: {}]   ;;  %s453_s1 = inlined_call_operand.vmem [shape: f32[128,64], index: 1, kind: input, shape index: {}]   ;;  %s454_s4 = inlined_call_operand.vmem [shape: f32[128,64], index: 4, kind: output, shape index: {}]  }
   0x1   :  { %v222_v0 = vld [vmem:[%s450_s2 + $0x8] sm:$0xff]  ;;  %v221_v1 = vld [vmem:[%s450_s2] sm:$0xff]  ;;  %v20_v22 = vld [vmem:[%s451_s0 + $0x10] sm:$0xff] }
   0x2   :  { %v18_v2 = vld [vmem:[%s451_s0] sm:$0xff]  ;;  %v19_v3 = vld [vmem:[%s451_s0 + $0x8] sm:$0xff]  ;;  %109 = vmatpush.bf16.msra.mxu0 %v222_v0  ;;  %223 = vmatpush.bf16.msra.mxu1 %v222_v0  ;;  %v21_v23 = vld [vmem:[%s451_s0 + $0x18] sm:$0xff]  ;;  %v36_v30 = vmax.f32 %v20_v22, 0.0 }
   0x3   :  { %v34_v4 = vmax.f32 %v18_v2, 0.0  ;;  %v22_v5 = vld [vmem:[%s451_s0 + $0x20] sm:$0xff]  ;;  %v23_v6 = vld [vmem:[%s451_s0 + $0x28] sm:$0xff]  ;;  %v35_v7 = vmax.f32 %v19_v3, 0.0  ;;  %224 = vmatpush.bf16.msra.mxu2 %v222_v0  ;;  %225 = vmatpush.bf16.msra.mxu3 %v222_v0  ;;  %v24_v24 = vld [vmem:[%s451_s0 + $0x30] sm:$0xff]  ;;  %v37_v31 = vmax.f32 %v21_v23, 0.0 }
   0x4   :  { %v38_v8 = vmax.f32 %v22_v5, 0.0  ;;  %v39_v9 = vmax.f32 %v23_v6, 0.0  ;;  %v26_v10 = vld [vmem:[%s451_s0 + $0x40] sm:$0xff]  ;;  %v27_v11 = vld [vmem:[%s451_s0 + $0x48] sm:$0xff]  ;;  %v25_v25 = vld [vmem:[%s451_s0 + $0x38] sm:$0xff]  ;;  %v40_v32 = vmax.f32 %v24_v24, 0.0 }
   0x5   :  { %v30_v12 = vld [vmem:[%s451_s0 + $0x60] sm:$0xff]  ;;  %v42_v13 = vmax.f32 %v26_v10, 0.0  ;;  %v43_v14 = vmax.f32 %v27_v11, 0.0  ;;  %v31_v15 = vld [vmem:[%s451_s0 + $0x68] sm:$0xff]  ;;  %v50_v18 = vpack.c.bf16 %v35_v7, %v34_v4  ;;  %v28_v26 = vld [vmem:[%s451_s0 + $0x50] sm:$0xff]  ;;  %v41_v33 = vmax.f32 %v25_v25, 0.0 }
   0x6   :  { %v46_v16 = vmax.f32 %v30_v12, 0.0  ;;  %v47_v17 = vmax.f32 %v31_v15, 0.0  ;;  %v52_v19 = vpack.c.bf16 %v39_v9, %v38_v8  ;;  %110 = vmatpush.bf16.msra.mxu0 %v221_v1  ;;  %226 = vmatpush.bf16.msra.mxu1 %v221_v1  ;;  %v29_v27 = vld [vmem:[%s451_s0 + $0x58] sm:$0xff]  ;;  %v32_v28 = vld [vmem:[%s451_s0 + $0x70] sm:$0xff]  ;;  %v44_v34 = vmax.f32 %v28_v26, 0.0  ;;  %v152_v44 = vld [vmem:[%s453_s1] sm:$0xff] }
   0x7   :  { %v54_v20 = vpack.c.bf16 %v43_v14, %v42_v13  ;;  %227 = vmatpush.bf16.msra.mxu2 %v221_v1  ;;  %228 = vmatpush.bf16.msra.mxu3 %v221_v1  ;;  %v33_v29 = vld [vmem:[%s451_s0 + $0x78] sm:$0xff]  ;;  %v45_v35 = vmax.f32 %v29_v27, 0.0  ;;  %v48_v36 = vmax.f32 %v32_v28, 0.0  ;;  %v51_v38 = vpack.c.bf16 %v37_v31, %v36_v30  ;;  %v320_v42 = vld [vmem:[%s452_s3] ss:$0 sm:$0xff]  ;;  %v153_v58 = vld [vmem:[%s453_s1 + $0x8] sm:$0xff] }
   0x8   :  { %v56_v21 = vpack.c.bf16 %v47_v17, %v46_v16  ;;  %v49_v37 = vmax.f32 %v33_v29, 0.0  ;;  %v53_v39 = vpack.c.bf16 %v41_v33, %v40_v32  ;;  %v156_v46 = vld [vmem:[%s453_s1 + $0x20] sm:$0xff]  ;;  %v157_v60 = vld [vmem:[%s453_s1 + $0x28] sm:$0xff]  ;;  %v154_v10 = vld [vmem:[%s453_s1 + $0x10] sm:$0xff] }
   0x9   :  { %213 = vmatmul.msk.bf16.vlgmr.msra.gmra.mxu0 %vm78_vm0, %v50_v18  ;;  %215 = vmatmul.msk.bf16.vlgmr.msra.gmra.mxu1 %vm78_vm0, %v52_v19  ;;  %v55_v40 = vpack.c.bf16 %v45_v35, %v44_v34  ;;  %v160_v52 = vld [vmem:[%s453_s1 + $0x40] sm:$0xff]  ;;  %v161_v4 = vld [vmem:[%s453_s1 + $0x48] sm:$0xff]  ;;  %v158_v12 = vld [vmem:[%s453_s1 + $0x30] sm:$0xff] }
   0xa   :  { %217 = vmatmul.msk.bf16.vlgmr.msra.gmra.mxu2 %vm78_vm0, %v54_v20  ;;  %219 = vmatmul.msk.bf16.vlgmr.msra.gmra.mxu3 %vm78_vm0, %v56_v21  ;;  %v57_v41 = vpack.c.bf16 %v49_v37, %v48_v36  ;;  %v164_v54 = vld [vmem:[%s453_s1 + $0x60] sm:$0xff]  ;;  %v165_v6 = vld [vmem:[%s453_s1 + $0x68] sm:$0xff]  ;;  %v162_v20 = vld [vmem:[%s453_s1 + $0x50] sm:$0xff] }
   0xb   :  { %v166_v22 = vld [vmem:[%s453_s1 + $0x70] sm:$0xff]  ;;  %v155_v26 = vld [vmem:[%s453_s1 + $0x18] sm:$0xff] }
   0xc   :  { %v159_v28 = vld [vmem:[%s453_s1 + $0x38] sm:$0xff] }
   0xd   :  { %v163_v36 = vld [vmem:[%s453_s1 + $0x58] sm:$0xff] }
  0x19   :  { %214 = vmatmul.msk.bf16.gmra.mxu0 %vm78_vm0, %v51_v38  ;;  %216 = vmatmul.msk.bf16.gmra.mxu1 %vm78_vm0, %v53_v39  ;;  %v167_v38 = vld [vmem:[%s453_s1 + $0x78] sm:$0xff] }
  0x1a   :  { %218 = vmatmul.msk.bf16.gmra.mxu2 %vm78_vm0, %v55_v40  ;;  %220 = vmatmul.msk.bf16.gmra.mxu3 %vm78_vm0, %v57_v41 }
  0x86   :  { %v112_v43 = vpop.f32.mrf.mxu0  ;;  %v122_v45 = vpop.f32.mrf.mxu1 }
  0x87   :  { %v113_v47 = vadd.f32 %v320_v42, %v112_v43  ;;  %v123_v48 = vadd.f32 %v320_v42, %v122_v45 }
  0x89   :  { %v168_v49 = vadd.f32 %v152_v44, %v113_v47  ;;  %v172_v50 = vadd.f32 %v156_v46, %v123_v48 }
  0x8b   :  { %185 = vst.msk [vmem:[%s454_s4] sm:$0xff] %vm184_vm1, %v168_v49 }
  0x8c   :  { %189 = vst.msk [vmem:[%s454_s4 + $0x20] sm:$0xff] %vm184_vm1, %v172_v50 }
  0x8d   :  { %v132_v51 = vpop.f32.mrf.mxu2  ;;  %v142_v53 = vpop.f32.mrf.mxu3 }
  0x8e   :  { %v133_v55 = vadd.f32 %v320_v42, %v132_v51  ;;  %v143_v56 = vadd.f32 %v320_v42, %v142_v53  ;;  %v114_v57 = vpop.f32.mrf.mxu0  ;;  %v124_v59 = vpop.f32.mrf.mxu1 }
  0x8f   :  { %v115_v61 = vadd.f32 %v320_v42, %v114_v57  ;;  %v125_v62 = vadd.f32 %v320_v42, %v124_v59 }
  0x90   :  { %v176_v63 = vadd.f32 %v160_v52, %v133_v55  ;;  %v180_v0 = vadd.f32 %v164_v54, %v143_v56 }
  0x91   :  { %v169_v1 = vadd.f32 %v153_v58, %v115_v61  ;;  %v173_v2 = vadd.f32 %v157_v60, %v125_v62 }
  0x92   :  { %193 = vst.msk [vmem:[%s454_s4 + $0x40] sm:$0xff] %vm184_vm1, %v176_v63 }
  0x93   :  { %197 = vst.msk [vmem:[%s454_s4 + $0x60] sm:$0xff] %vm184_vm1, %v180_v0 }
  0x94   :  { %186 = vst.msk [vmem:[%s454_s4 + $0x8] sm:$0xff] %vm184_vm1, %v169_v1 }
  0x95   :  { %190 = vst.msk [vmem:[%s454_s4 + $0x28] sm:$0xff] %vm184_vm1, %v173_v2  ;;  %v134_v3 = vpop.f32.mrf.mxu2  ;;  %v144_v5 = vpop.f32.mrf.mxu3 }
  0x96   :  { %v135_v7 = vadd.f32 %v320_v42, %v134_v3  ;;  %v145_v8 = vadd.f32 %v320_v42, %v144_v5  ;;  %v117_v9 = vpop.f32.mrf.mxu0  ;;  %v127_v11 = vpop.f32.mrf.mxu1 }
  0x97   :  { %v118_v13 = vadd.f32 %v320_v42, %v117_v9  ;;  %v128_v14 = vadd.f32 %v320_v42, %v127_v11 }
  0x98   :  { %v177_v15 = vadd.f32 %v161_v4, %v135_v7  ;;  %v181_v16 = vadd.f32 %v165_v6, %v145_v8 }
  0x99   :  { %v170_v17 = vadd.f32 %v154_v10, %v118_v13  ;;  %v174_v18 = vadd.f32 %v158_v12, %v128_v14 }
  0x9a   :  { %194 = vst.msk [vmem:[%s454_s4 + $0x48] sm:$0xff] %vm184_vm1, %v177_v15 }
  0x9b   :  { %198 = vst.msk [vmem:[%s454_s4 + $0x68] sm:$0xff] %vm184_vm1, %v181_v16 }
  0x9c   :  { %187 = vst.msk [vmem:[%s454_s4 + $0x10] sm:$0xff] %vm184_vm1, %v170_v17 }
  0x9d   :  { %191 = vst.msk [vmem:[%s454_s4 + $0x30] sm:$0xff] %vm184_vm1, %v174_v18  ;;  %v137_v19 = vpop.f32.mrf.mxu2  ;;  %v147_v21 = vpop.f32.mrf.mxu3 }
  0x9e   :  { %v138_v23 = vadd.f32 %v320_v42, %v137_v19  ;;  %v148_v24 = vadd.f32 %v320_v42, %v147_v21  ;;  %v119_v25 = vpop.f32.mrf.mxu0  ;;  %v129_v27 = vpop.f32.mrf.mxu1 }
  0x9f   :  { %v120_v29 = vadd.f32 %v320_v42, %v119_v25  ;;  %v130_v30 = vadd.f32 %v320_v42, %v129_v27 }
  0xa0   :  { %v178_v31 = vadd.f32 %v162_v20, %v138_v23  ;;  %v182_v32 = vadd.f32 %v166_v22, %v148_v24 }
  0xa1   :  { %v171_v33 = vadd.f32 %v155_v26, %v120_v29  ;;  %v175_v34 = vadd.f32 %v159_v28, %v130_v30 }
  0xa2   :  { %195 = vst.msk [vmem:[%s454_s4 + $0x50] sm:$0xff] %vm184_vm1, %v178_v31 }
  0xa3   :  { %199 = vst.msk [vmem:[%s454_s4 + $0x70] sm:$0xff] %vm184_vm1, %v182_v32 }
  0xa4   :  { %188 = vst.msk [vmem:[%s454_s4 + $0x18] sm:$0xff] %vm184_vm1, %v171_v33 }
  0xa5   :  { %192 = vst.msk [vmem:[%s454_s4 + $0x38] sm:$0xff] %vm184_vm1, %v175_v34  ;;  %v139_v35 = vpop.f32.mrf.mxu2  ;;  %v149_v37 = vpop.f32.mrf.mxu3 }
  0xa6   :  { %v140_v39 = vadd.f32 %v320_v42, %v139_v35  ;;  %v150_v40 = vadd.f32 %v320_v42, %v149_v37 }
  0xa8   :  { %v179_v41 = vadd.f32 %v163_v36, %v140_v39  ;;  %v183_v43 = vadd.f32 %v167_v38, %v150_v40 }
  0xaa   :  { %196 = vst.msk [vmem:[%s454_s4 + $0x58] sm:$0xff] %vm184_vm1, %v179_v41 }
  0xab   :  { %200 = vst.msk [vmem:[%s454_s4 + $0x78] sm:$0xff] %vm184_vm1, %v183_v43 }

// kernel: decoder_forward.9
= control target key start
LH: loop header
LB: loop body
LE: loop exit
PB: predicated region body
PF: predicated region fallthrough
CT: control target
= control target key end

     0   :  { %s1674_s12 = smov 0   ;;  %s2164_s0 = inlined_call_operand.vmem [shape: f32[2,110,64], index: 0, kind: input, shape index: {}]   ;;  %s2165_s1 = inlined_call_operand.vmem [shape: bf16[9,64,32], index: 1, kind: input, shape index: {}]   ;;  %s2166_s2 = inlined_call_operand.vmem [shape: f32[1,32], index: 2, kind: input, shape index: {}]   ;;  %s2167_s3 = inlined_call_operand.vmem [shape: f32[2,80,32], index: 3, kind: output, shape index: {}]  }
   0x1 LB: > { %s1325_s13 = sadd.s32 4294967295, %s1652_s12   ;;  %p1329_p0 = scmp.ge.s32.totalorder %s1652_s12, 1  ;;  %s1652_s12 = sphi %s1674_s12, %s13_s12  }
   0x2   : > { %p137_p1 = scmp.lt.s32.totalorder %s1652_s12, 3 }
   0x4   : > { %p138_p2 = pnand %p1329_p0, %p137_p1 }
   0x5   : > { %p161_p3 = scmp.lt.s32.totalorder (!%p138_p2), %s1325_s13, 1 }
   0x6   : > { %141 = sbr.rel (%p138_p2) target bundleno = 359 (0x167), region = 32 }
   0xb   : > { %v1594_v0 = vld [vmem:[%s2165_s1 + $0x38] sm:$0xff]  ;;  %v1593_v1 = vld [vmem:[%s2165_s1 + $0x30] sm:$0xff]  ;;  %s2169_s13 = smov (!%p161_p3, %s1325_s13), 1  ;;  %v1592_v2 = vld [vmem:[%s2165_s1 + $0x28] sm:$0xff]  ;;  %vm256_vm0 = vsmask.f32 7424 }
   0xc   : > { %1623 = vmatpush.bf16.msra.mxu1 %v1594_v0  ;;  %1624 = vmatpush.bf16.msra.mxu2 %v1594_v0  ;;  %s1635_s18 = smul.u32 112, %s2169_s13  ;;  %v1591_v18 = vld [vmem:[%s2165_s1 + $0x20] sm:$0xff]  ;;  %v1598_v26 = vld [vmem:[%s2165_s1 + $0x58] sm:$0xff]  ;;  %v1589_v46 = vld [vmem:[%s2165_s1 + $0x10] sm:$0xff]  ;;  %vm325_vm1 = vcmask 523264   ;;  %vm452_vm2 = vcmask 1046528  }
   0xd   : > { %1625 = vmatpush.bf16.msra.mxu3 %v1594_v0  ;;  %345 = vmatpush.bf16.msra.mxu0 %v1594_v0  ;;  %v1590_v27 = vld [vmem:[%s2165_s1 + $0x18] sm:$0xff]  ;;  %v1597_v47 = vld [vmem:[%s2165_s1 + $0x50] sm:$0xff]  ;;  %vm667_vm3 = vsmask.f32 6400  ;;  %vm813_vm4 = vcmask 1045504   ;;  %vm1150_vm6 = vcmask 1044480  }
   0xe   : > { %s1697_s23 = scalar_lea.vmem %s2164_s0, %s1635_s18  ;;  %v1602_v38 = vld [vmem:[%s2165_s1 + $0x78] sm:$0xff]  ;;  %v1601_v57 = vld [vmem:[%s2165_s1 + $0x70] sm:$0xff]  ;;  %vm1024_vm5 = vsmask.f32 5376  ;;  %vm1259_vm7 = vcmask 261120  }
   0xf   : > { %v174_v3 = vld [vmem:[%s1697_s23 + $0x10] sm:$0xff]  ;;  %v175_v4 = vld [vmem:[%s1697_s23 + $0x18] sm:$0xff]  ;;  %v176_v5 = vld [vmem:[%s1697_s23 + $0x20] sm:$0xff] }
  0x10   : > { %1626 = vmatpush.bf16.msra.mxu1 %v1593_v1  ;;  %1627 = vmatpush.bf16.msra.mxu2 %v1593_v1  ;;  %v177_v6 = vld [vmem:[%s1697_s23 + $0x28] sm:$0xff]  ;;  %v187_v7 = vmax.f32 %v174_v3, 0.0  ;;  %v188_v8 = vmax.f32 %v175_v4, 0.0  ;;  %v189_v9 = vmax.f32 %v176_v5, 0.0  ;;  %v178_v10 = vld [vmem:[%s1697_s23 + $0x30] sm:$0xff]  ;;  %v179_v11 = vld [vmem:[%s1697_s23 + $0x38] sm:$0xff] }
  0x11   : > { %1628 = vmatpush.bf16.msra.mxu3 %v1593_v1  ;;  %346 = vmatpush.bf16.msra.mxu0 %v1593_v1  ;;  %v190_v12 = vmax.f32 %v177_v6, 0.0  ;;  %v191_v13 = vmax.f32 %v178_v10, 0.0  ;;  %v192_v14 = vmax.f32 %v179_v11, 0.0  ;;  %v180_v15 = vld [vmem:[%s1697_s23 + $0x40] sm:$0xff]  ;;  %v181_v16 = vld [vmem:[%s1697_s23 + $0x48] sm:$0xff]  ;;  %v182_v17 = vld [vmem:[%s1697_s23 + $0x50] sm:$0xff] }
  0x12   : > { %v1711_v19 = vpack.c.bf16 %v187_v7, %v187_v7  ;;  %v1713_v20 = vpack.c.bf16 %v188_v8, %v188_v8  ;;  %v1715_v21 = vpack.c.bf16 %v189_v9, %v189_v9  ;;  %v193_v22 = vmax.f32 %v180_v15, 0.0  ;;  %v172_v33 = vld [vmem:[%s1697_s23] sm:$0xff]  ;;  %v1606_v39 = vld [vmem:[%s2165_s1 + $0x98] sm:$0xff]  ;;  %v173_v43 = vld [vmem:[%s1697_s23 + $0x8] sm:$0xff] }
  0x13   : > { %v1717_v23 = vpack.c.bf16 %v190_v12, %v190_v12  ;;  %v1719_v24 = vpack.c.bf16 %v191_v13, %v191_v13  ;;  %v1721_v25 = vpack.c.bf16 %v192_v14, %v192_v14  ;;  %v194_v28 = vmax.f32 %v181_v16, 0.0  ;;  %v1605_v62 = vld [vmem:[%s2165_s1 + $0x90] sm:$0xff]  ;;  %v1596_v1 = vld [vmem:[%s2165_s1 + $0x48] sm:$0xff] }
  0x14   : > { %1629 = vmatpush.bf16.msra.mxu1 %v1592_v2  ;;  %1630 = vmatpush.bf16.msra.mxu2 %v1592_v2  ;;  %v241_v29 = vunpack.c.l.b16 %v1711_v19  ;;  %v242_v30 = vunpack.c.l.b16 %v1713_v20  ;;  %v243_v31 = vunpack.c.l.b16 %v1715_v21  ;;  %v195_v32 = vmax.f32 %v182_v17, 0.0  ;;  %v1588_v3 = vld [vmem:[%s2165_s1 + $0x8] sm:$0xff] }
  0x15   : > { %1631 = vmatpush.bf16.msra.mxu3 %v1592_v2  ;;  %347 = vmatpush.bf16.msra.mxu0 %v1592_v2  ;;  %v244_v34 = vunpack.c.l.b16 %v1717_v23  ;;  %v245_v35 = vunpack.c.l.b16 %v1719_v24  ;;  %v246_v36 = vunpack.c.l.b16 %v1721_v25  ;;  %v1736_v37 = vpack.c.bf16 %v193_v22, %v193_v22  ;;  %v1600_v10 = vld [vmem:[%s2165_s1 + $0x68] sm:$0xff] }
  0x16   : > { %v1748_v40 = vpack.c.b16 %v242_v30, %v241_v29  ;;  %v1750_v41 = vpack.c.bf16 %v194_v28, %v194_v28  ;;  %v208_v42 = vpack.c.bf16 %v195_v32, %v195_v32  ;;  %v185_v49 = vmax.f32 %v172_v33, 0.0  ;;  %v1604_v14 = vld [vmem:[%s2165_s1 + $0x88] sm:$0xff]  ;;  %v1599_v32 = vld [vmem:[%s2165_s1 + $0x60] sm:$0xff]  ;;  %v1610_v33 = vld [vmem:[%s2165_s1 + $0xb8] sm:$0xff] }
  0x17   : > { %v1757_v44 = vpack.c.b16 %v244_v34, %v243_v31  ;;  %v1763_v45 = vpack.c.b16 %v246_v36, %v245_v35  ;;  %v247_v48 = vunpack.c.l.b16 %v1736_v37  ;;  %v186_v58 = vmax.f32 %v173_v43, 0.0  ;;  %v1620_v37 = vld [vmem:[%s2165_s1 + $0x108] sm:$0xff] }
  0x18   : > { %1632 = vmatpush.bf16.msra.mxu1 %v1591_v18  ;;  %1633 = vmatpush.bf16.msra.mxu2 %v1591_v18  ;;  %v265_v50 = vshll.u32 %v1748_v40, 16  ;;  %v269_v51 = vshrl.u32 %v1748_v40, 16  ;;  %v248_v52 = vunpack.c.l.b16 %v1750_v41  ;;  %v1775_v53 = vunpack.c.l.b16 %v208_v42  ;;  %v1618_v42 = vld [vmem:[%s2165_s1 + $0xf8] sm:$0xff] }
  0x19   : > { %1634 = vmatpush.bf16.msra.mxu3 %v1591_v18  ;;  %348 = vmatpush.bf16.msra.mxu0 %v1591_v18  ;;  %v273_v54 = vshll.u32 %v1757_v44, 16  ;;  %v277_v55 = vshrl.u32 %v1757_v44, 16  ;;  %v281_v56 = vshll.u32 %v1763_v45, 16  ;;  %v198_v8 = vpack.c.bf16 %v185_v49, %v185_v49  ;;  %v1595_v18 = vld [vmem:[%s2165_s1 + $0x40] sm:$0xff] }
  0x1a   : > { %v1785_v59 = vrot.slane %v265_v50, 1  ;;  %v1791_v60 = vpack.c.b16 %v248_v52, %v247_v48  ;;  %v1795_v61 = vpack.c.b16 %v1775_v53, %v1775_v53  ;;  %v199_v9 = vpack.c.bf16 %v186_v58, %v186_v58  ;;  %v1622_v58 = vld [vmem:[%s2165_s1 + $0x118] sm:$0xff] }
  0x1b   : > { %v275_v63 = vrot.slane %v273_v54, 1  ;;  %v283_v0 = vrot.slane %v281_v56, 1  ;;  %v239_v16 = vunpack.c.l.b16 %v198_v8 }
  0x1c   : > { %507 = vmatpush.bf16.msrb.mxu2 %v1598_v26  ;;  %413 = vmatpush.bf16.msrb.mxu1 %v1590_v27  ;;  %v271_v2 = vor.u32 %v269_v51, %v1785_v59  ;;  %v289_v4 = vshll.u32 %v1791_v60, 16  ;;  %v293_v5 = vshrl.u32 %v1791_v60, 16  ;;  %v297_v6 = vshll.u32 %v1795_v61, 16  ;;  %v1587_v26 = vld [vmem:[%s2165_s1] sm:$0xff]  ;;  %v1614_v27 = vld [vmem:[%s2165_s1 + $0xd8] sm:$0xff] }
  0x1d   : > { %618 = vmatpush.bf16.msrb.mxu3 %v1602_v38  ;;  %764 = vmatpush.bf16.msrb.mxu0 %v1606_v39  ;;  %v279_v7 = vor.u32 %v277_v55, %v275_v63  ;;  %v240_v17 = vunpack.c.l.b16 %v199_v9  ;;  %v1603_v39 = vld [vmem:[%s2165_s1 + $0x80] sm:$0xff]  ;;  %v1613_v9 = vld [vmem:[%s2165_s1 + $0xd0] sm:$0xff] }
  0x1e   : > { %v276_v11 = vsel %vm256_vm0, %v271_v2, %v275_v63  ;;  %v291_v12 = vrot.slane %v289_v4, 1  ;;  %v299_v13 = vrot.slane %v297_v6, 1  ;;  %v1871_v63 = vpack.c.b16 %v243_v31, %v242_v30 }
  0x1f   : > { %1357 = vmatmul.msk.bf16.vlgmr.msra.gmra.mxu1 %vm325_vm1, %v276_v11  ;;  %v284_v15 = vsel %vm256_vm0, %v279_v7, %v283_v0  ;;  %v1841_v28 = vpack.c.b16 %v240_v17, %v239_v16  ;;  %v1609_v11 = vld [vmem:[%s2165_s1 + $0xb0] sm:$0xff]  ;;  %v1907_v16 = vpack.c.b16 %v245_v35, %v244_v34  ;;  %v1612_v35 = vld [vmem:[%s2165_s1 + $0xc8] sm:$0xff] }
  0x20   : > { %414 = vmatpush.bf16.msrb.mxu1 %v1589_v46  ;;  %508 = vmatpush.bf16.msrb.mxu2 %v1597_v47  ;;  %v295_v22 = vor.u32 %v293_v5, %v291_v12  ;;  %v285_v47 = vshrl.u32 %v1763_v45, 16  ;;  %v680_v20 = vshll.u32 %v1871_v63, 16  ;;  %v565_v30 = vrot.slane %v1871_v63, 1 }
  0x21   : > { %619 = vmatpush.bf16.msrb.mxu3 %v1601_v57  ;;  %765 = vmatpush.bf16.msrb.mxu0 %v1605_v62  ;;  %v258_v43 = vshrl.u32 %v1841_v28, 16  ;;  %v260_v46 = vshll.u32 %v1841_v28, 16  ;;  %v1865_v62 = vpack.c.b16 %v241_v29, %v240_v17  ;;  %v677_v29 = vshrl.u32 %v1871_v63, 16 }
  0x22   : > { %1358 = vmatmul.msk.bf16.vlgmr.msra.gmra.mxu2 %vm325_vm1, %v284_v15  ;;  %v300_v38 = vsel %vm256_vm0, %v295_v22, %v299_v13  ;;  %v682_v7 = vrot.slane %v680_v20, 2  ;;  %v453_v17 = vrot.slane %v1841_v28, 1  ;;  %v686_v22 = vshrl.u32 %v1907_v16, 16 }
  0x23   : > { %1360 = vmatmul.msk.bf16.vlgmr.msra.gmra.mxu3 %vm325_vm1, %v300_v38  ;;  %v262_v49 = vrot.slane %v260_v46, 1  ;;  %v672_v19 = vshll.u32 %v1865_v62, 16  ;;  %v564_v21 = vrot.slane %v1865_v62, 1  ;;  %v679_v6 = vrot.slane %v677_v29, 1  ;;  %v1608_v38 = vld [vmem:[%s2165_s1 + $0xa8] sm:$0xff]  ;;  %v1615_v29 = vld [vmem:[%s2165_s1 + $0xe0] sm:$0xff] }
  0x24   : > { %509 = vmatpush.bf16.msrb.mxu2 %v1596_v1  ;;  %415 = vmatpush.bf16.msrb.mxu1 %v1588_v3  ;;  %v287_v1 = vor.u32 %v285_v47, %v283_v0  ;;  %v669_v3 = vshrl.u32 %v1865_v62, 16  ;;  %v688_v23 = vrot.slane %v686_v22, 1  ;;  %v462_v20 = vrot.slane %v1795_v61, 1 }
  0x25   : > { %620 = vmatpush.bf16.msrb.mxu3 %v1600_v10  ;;  %766 = vmatpush.bf16.msrb.mxu0 %v1604_v14  ;;  %v263_v57 = vor.u32 %v262_v49, %v258_v43  ;;  %v674_v0 = vrot.slane %v672_v19, 2  ;;  %v566_v8 = vsel %vm452_vm2, %v564_v21, %v565_v30  ;;  %v1617_v10 = vld [vmem:[%s2165_s1 + $0xf0] sm:$0xff]  ;;  %v683_v13 = vor.u32 %v682_v7, %v679_v6  ;;  %v1607_v19 = vld [vmem:[%s2165_s1 + $0xa0] sm:$0xff] }
  0x26   : > { %v292_v31 = vsel %vm256_vm0, %v287_v1, %v291_v12  ;;  %v1621_v14 = vld [vmem:[%s2165_s1 + $0x110] sm:$0xff]  ;;  %v456_v43 = vrot.slane %v1757_v44, 1  ;;  %v1029_v7 = vrot.slane %v273_v54, 3  ;;  %v817_v22 = vrot.slane %v1907_v16, 2 }
  0x27   : > { %v268_v2 = vsel %vm256_vm0, %v263_v57, %v1785_v59  ;;  %v671_v59 = vrot.slane %v669_v3, 1  ;;  %v1611_v3 = vld [vmem:[%s2165_s1 + $0xc0] sm:$0xff] }
  0x28   : > { %510 = vmatpush.bf16.msrb.mxu2 %v1595_v18  ;;  %416 = vmatpush.bf16.msrb.mxu1 %v1587_v26  ;;  %v454_v18 = vrot.slane %v1748_v40, 1  ;;  %v689_v26 = vshll.u32 %v1907_v16, 16 }
  0x29   : > { %621 = vmatpush.bf16.msrb.mxu3 %v1599_v32  ;;  %767 = vmatpush.bf16.msrb.mxu0 %v1603_v39  ;;  %v675_v12 = vor.u32 %v674_v0, %v671_v59  ;;  %v458_v59 = vrot.slane %v1763_v45, 1  ;;  %v183_v0 = vld [vmem:[%s1697_s23 + $0x58] sm:$0xff] }
  0x2a   : > { %1356 = vmatmul.msk.bf16.vlgmr.msra.gmra.mxu0 %vm325_vm1, %v268_v2  ;;  %v455_v32 = vsel %vm452_vm2, %v453_v17, %v454_v18  ;;  %v691_v24 = vrot.slane %v689_v26, 2  ;;  %v460_v2 = vrot.slane %v1791_v60, 1 }
  0x2b   : > { %v684_v15 = vsel %vm667_vm3, %v675_v12, %v683_v13  ;;  %v1025_v12 = vrot.slane %v269_v51, 2  ;;  %v1026_v51 = vrot.slane %v265_v50, 3 }
  0x2c   : > { %975 = vmatpush.bf16.msra.mxu2 %v1614_v27  ;;  %868 = vmatpush.bf16.msra.mxu1 %v1610_v33  ;;  %v567_v27 = vrot.slane %v1907_v16, 1  ;;  %v1616_v33 = vld [vmem:[%s2165_s1 + $0xe8] sm:$0xff]  ;;  %v463_v21 = vsel %vm452_vm2, %v460_v2, %v462_v20 }
  0x2d   : > { %1101 = vmatpush.bf16.msra.mxu3 %v1618_v42  ;;  %1205 = vmatpush.bf16.msra.mxu0 %v1622_v58  ;;  %v1935_v42 = vpack.c.b16 %v247_v48, %v246_v36  ;;  %v457_v58 = vsel %vm452_vm2, %v454_v18, %v456_v43  ;;  %v1027_v17 = vor.u32 %v1026_v51, %v1025_v12  ;;  %v926_v12 = vrot.slane %v1791_v60, 2 }
  0x2e   : > { %v568_v34 = vsel %vm452_vm2, %v565_v30, %v567_v27 }
  0x2f   : > { %1377 = vmatmul.msk.bf16.vlgmr.msrb.gmra.mxu1 %vm325_vm1, %v1841_v28  ;;  %v692_v28 = vor.u32 %v691_v24, %v688_v23  ;;  %v695_v46 = vshrl.u32 %v1935_v42, 16  ;;  %v698_v49 = vshll.u32 %v1935_v42, 16  ;;  %v569_v57 = vrot.slane %v1935_v42, 1 }
  0x30   : > { %976 = vmatpush.bf16.msra.mxu2 %v1613_v9  ;;  %869 = vmatpush.bf16.msra.mxu1 %v1609_v11  ;;  %v196_v9 = vmax.f32 %v183_v0, 0.0  ;;  %v815_v11 = vrot.slane %v1871_v63, 2 }
  0x31   : > { %1102 = vmatpush.bf16.msra.mxu3 %v1617_v10  ;;  %1206 = vmatpush.bf16.msra.mxu0 %v1621_v14  ;;  %v693_v39 = vsel %vm667_vm3, %v683_v13, %v692_v28  ;;  %v697_v25 = vrot.slane %v695_v46, 1  ;;  %v700_v1 = vrot.slane %v698_v49, 2  ;;  %v570_v36 = vsel %vm452_vm2, %v567_v27, %v569_v57 }
  0x32   : > { %1359 = vmatmul.msk.bf16.gmra.mxu2 %vm325_vm1, %v292_v31  ;;  %v1967_v31 = vpack.c.b16 %v1775_v53, %v248_v52  ;;  %v459_v52 = vsel %vm452_vm2, %v456_v43, %v458_v59  ;;  %v814_v10 = vrot.slane %v1865_v62, 2  ;;  %v1619_v62 = vld [vmem:[%s2165_s1 + $0x100] sm:$0xff]  ;;  %v1151_v46 = vrot.slane %v1748_v40, 3 }
  0x33   : > { %1435 = vmatmul.msk.bf16.vlgmr.msrb.gmra.mxu3 %vm325_vm1, %v566_v8  ;;  %v701_v48 = vor.u32 %v700_v1, %v697_v25  ;;  %v1028_v8 = vrot.slane %v277_v55, 2  ;;  %v1152_v49 = vrot.slane %v1757_v44, 3  ;;  %v1033_v25 = vrot.slane %v281_v56, 3 }
  0x34   : > { %977 = vmatpush.bf16.msra.mxu2 %v1612_v35  ;;  %870 = vmatpush.bf16.msra.mxu1 %v1608_v38  ;;  %v704_v6 = vshrl.u32 %v1967_v31, 16  ;;  %v707_v61 = vshll.u32 %v1967_v31, 16  ;;  %v571_v41 = vrot.slane %v1967_v31, 1  ;;  %v816_v55 = vsel %vm813_vm4, %v814_v10, %v815_v11 }
  0x35   : > { %1103 = vmatpush.bf16.msra.mxu3 %v1616_v33  ;;  %1207 = vmatpush.bf16.msra.mxu0 %v1620_v37  ;;  %v702_v30 = vsel %vm667_vm3, %v692_v28, %v701_v48  ;;  %v1030_v63 = vor.u32 %v1029_v7, %v1028_v8  ;;  %v461_v28 = vsel %vm452_vm2, %v458_v59, %v460_v2  ;;  %v921_v1 = vrot.slane %v1748_v40, 2 }
  0x36   : > { %v706_v54 = vrot.slane %v704_v6, 1  ;;  %v709_v13 = vrot.slane %v707_v61, 2  ;;  %v572_v14 = vsel %vm452_vm2, %v569_v57, %v571_v41  ;;  %v1153_v57 = vsel %vm1150_vm6, %v1151_v46, %v1152_v49 }
  0x37   : > { %v1031_v27 = vsel %vm1024_vm5, %v1027_v17, %v1030_v63  ;;  %v1154_v56 = vrot.slane %v1763_v45, 3 }
  0x38   : > { %978 = vmatpush.bf16.msra.mxu2 %v1611_v3  ;;  %871 = vmatpush.bf16.msra.mxu1 %v1607_v19  ;;  %v710_v18 = vor.u32 %v709_v13, %v706_v54  ;;  %v1037_v3 = vrot.slane %v289_v4, 3  ;;  %v924_v19 = vrot.slane %v1763_v45, 2  ;;  %v184_v4 = vld [vmem:[%s1697_s23 + $0x60] sm:$0xff]  ;;  %s1636_s23 = smul.u32 80, %s2169_s13 }
  0x39   : > { %1104 = vmatpush.bf16.msra.mxu3 %v1615_v29  ;;  %1208 = vmatpush.bf16.msra.mxu0 %v1619_v62  ;;  %v197_v7 = vmax.f32 %v184_v4, 0.0 }
  0x3a   : > { %1464 = vmatmul.msk.bf16.vlgmr.msrb.gmra.mxu0 %vm325_vm1, %v684_v15  ;;  %v209_v15 = vpack.c.bf16 %v196_v9, %v196_v9  ;;  %v711_v23 = vsel %vm667_vm3, %v701_v48, %v710_v18  ;;  %v927_v51 = vsel %vm813_vm4, %v924_v19, %v926_v12  ;;  %s2120_s21 = scalar_lea.vmem %s2167_s3, %s1636_s23 }
  0x3c   : > { %v557_v26 = vunpack.c.l.b16 %v209_v15 }
  0x3e   : > { %v1999_v24 = vpack.c.b16 %v557_v26, %v557_v26 }
  0x3f   : > { %1378 = vmatmul.msk.bf16.gmra.mxu1 %vm325_vm1, %v1748_v40  ;;  %v1155_v40 = vsel %vm1150_vm6, %v1152_v49, %v1154_v56 }
  0x40   : > { %v713_v50 = vshrl.u32 %v1999_v24, 16  ;;  %v573_v35 = vrot.slane %v1999_v24, 1 }
  0x42   : > { %1406 = vmatmul.msk.bf16.vlgmr.msrb.gmra.mxu2 %vm325_vm1, %v455_v32  ;;  %v818_v32 = vsel %vm813_vm4, %v815_v11, %v817_v22  ;;  %v715_v16 = vrot.slane %v713_v50, 1  ;;  %v574_v38 = vsel %vm452_vm2, %v571_v41, %v573_v35  ;;  %v210_v11 = vpack.c.bf16 %v197_v7, %v197_v7 }
  0x43   : > { %1436 = vmatmul.msk.bf16.gmra.mxu3 %vm325_vm1, %v568_v34  ;;  %v716_v34 = vshll.u32 %v1999_v24, 16 }
  0x44   : > { %v918_v15 = vunpack.c.l.b16 %v210_v11 }
  0x45   : > { %v718_v33 = vrot.slane %v716_v34, 2 }
  0x46   : > { %v920_v17 = vpack.c.b16 %v918_v15, %v918_v15 }
  0x4a   : > { %1465 = vmatmul.msk.bf16.gmra.mxu0 %vm325_vm1, %v693_v39  ;;  %v719_v39 = vor.u32 %v718_v33, %v715_v16 }
  0x4c   : > { %v720_v43 = vsel %vm667_vm3, %v710_v18, %v719_v39 }
  0x4f   : > { %1379 = vmatmul.msk.bf16.gmra.mxu1 %vm325_vm1, %v1757_v44 }
  0x52   : > { %1407 = vmatmul.msk.bf16.gmra.mxu2 %vm325_vm1, %v457_v58  ;;  %v1032_v58 = vrot.slane %v285_v47, 2  ;;  %v1036_v47 = vrot.slane %v293_v5, 2  ;;  %v2046_v5 = vpack.c.b16 %v557_v26, %v1775_v53  ;;  %v821_v53 = vrot.slane %v1967_v31, 2 }
  0x53   : > { %1437 = vmatmul.msk.bf16.gmra.mxu3 %vm325_vm1, %v570_v36  ;;  %v922_v36 = vrot.slane %v1757_v44, 2  ;;  %v819_v44 = vrot.slane %v1935_v42, 2 }
  0x54   : > { %v1034_v37 = vor.u32 %v1033_v25, %v1032_v58  ;;  %v1041_v6 = vshrl.u32 %v2046_v5, 16  ;;  %v1044_v61 = vshll.u32 %v2046_v5, 16 }
  0x55   : > { %v923_v48 = vsel %vm813_vm4, %v921_v1, %v922_v36  ;;  %v820_v20 = vsel %vm813_vm4, %v817_v22, %v819_v44  ;;  %v1158_v22 = vrot.slane %v2046_v5, 3 }
  0x56   : > { %v1035_v2 = vsel %vm1024_vm5, %v1030_v63, %v1034_v37  ;;  %v1046_v10 = vrot.slane %v1044_v61, 3 }
  0x5a   : > { %1466 = vmatmul.msk.bf16.gmra.mxu0 %vm325_vm1, %v702_v30  ;;  %v925_v30 = vsel %vm813_vm4, %v922_v36, %v924_v19 }
  0x5f   : > { %1380 = vmatmul.msk.bf16.gmra.mxu1 %vm325_vm1, %v1763_v45  ;;  %v1156_v45 = vrot.slane %v1791_v60, 3 }
  0x61   : > { %v1157_v9 = vsel %vm1150_vm6, %v1154_v56, %v1156_v45  ;;  %v1159_v35 = vsel %vm1150_vm6, %v1156_v45, %v1158_v22 }
  0x62   : > { %1408 = vmatmul.msk.bf16.gmra.mxu2 %vm325_vm1, %v459_v52  ;;  %v1043_v52 = vrot.slane %v1041_v6, 2 }
  0x63   : > { %1438 = vmatmul.msk.bf16.gmra.mxu3 %vm325_vm1, %v572_v14 }
  0x64   : > { %v1047_v14 = vor.u32 %v1046_v10, %v1043_v52 }
  0x6a   : > { %1467 = vmatmul.msk.bf16.gmra.mxu0 %vm325_vm1, %v711_v23 }
  0x6f   : > { %1381 = vmatmul.msk.bf16.gmra.mxu1 %vm325_vm1, %v1791_v60 }
  0x72   : > { %1409 = vmatmul.msk.bf16.gmra.mxu2 %vm325_vm1, %v461_v28  ;;  %v823_v28 = vrot.slane %v1999_v24, 2 }
  0x73   : > { %1439 = vmatmul.msk.bf16.gmra.mxu3 %vm325_vm1, %v574_v38  ;;  %v928_v38 = vrot.slane %v2046_v5, 2 }
  0x74   : > { %v824_v46 = vsel %vm813_vm4, %v821_v53, %v823_v28 }
  0x75   : > { %v929_v58 = vsel %vm813_vm4, %v926_v12, %v928_v38 }
  0x7a   : > { %1468 = vmatmul.msk.bf16.gmra.mxu0 %vm325_vm1, %v720_v43 }
  0x7f   : > { %1493 = vmatmul.msk.bf16.vlgmr.msra.gmra.mxu1 %vm325_vm1, %v816_v55  ;;  %v822_v55 = vsel %vm813_vm4, %v819_v44, %v821_v53 }
  0x82   : > { %1410 = vmatmul.msk.bf16.gmra.mxu2 %vm325_vm1, %v463_v21  ;;  %v1038_v21 = vor.u32 %v1037_v3, %v1036_v47 }
  0x83   : > { %1551 = vmatmul.msk.bf16.vlgmr.msra.gmra.mxu3 %vm325_vm1, %v1031_v27  ;;  %v1050_v27 = vshrl.u32 %v920_v17, 16 }
  0x84   : > { %v1039_v42 = vsel %vm1024_vm5, %v1034_v37, %v1038_v21  ;;  %v1048_v60 = vsel %vm1024_vm5, %v1038_v21, %v1047_v14  ;;  %v1160_v37 = vrot.slane %v920_v17, 3 }
  0x85   : > { %v1052_v16 = vrot.slane %v1050_v27, 2 }
  0x86   : > { %v1161_v3 = vsel %vm1150_vm6, %v1158_v22, %v1160_v37 }
  0x8a   : > { %1580 = vmatmul.msk.bf16.vlgmr.msra.gmra.mxu0 %vm325_vm1, %v1153_v57 }
  0x8f   : > { %1494 = vmatmul.msk.bf16.gmra.mxu1 %vm325_vm1, %v818_v32  ;;  %v1053_v32 = vshll.u32 %v920_v17, 16 }
  0x91   : > { %v1055_v33 = vrot.slane %v1053_v32, 3 }
  0x92   : > { %1522 = vmatmul.msk.bf16.vlgmr.msra.gmra.mxu2 %vm325_vm1, %v923_v48 }
  0x93   : > { %1552 = vmatmul.msk.bf16.gmra.mxu3 %vm325_vm1, %v1035_v2  ;;  %v1056_v49 = vor.u32 %v1055_v33, %v1052_v16 }
  0x95   : > { %v1057_v24 = vsel %vm1024_vm5, %v1047_v14, %v1056_v49 }
  0x9a   : > { %1581 = vmatmul.msk.bf16.gmra.mxu0 %vm325_vm1, %v1155_v40 }
  0x9c   : > { %v355_v29 = vpop.f32.mrf.mxu1 }
  0x9f   : > { %1495 = vmatmul.msk.bf16.gmra.mxu1 %vm325_vm1, %v820_v20 }
  0xa2   : > { %1523 = vmatmul.msk.bf16.gmra.mxu2 %vm325_vm1, %v925_v30 }
  0xa3   : > { %1553 = vmatmul.msk.bf16.gmra.mxu3 %vm325_vm1, %v1039_v42 }
  0xa4   : > { %v357_v0 = vpop.f32.mrf.mxu1 }
  0xa5   : > { %v2049_v59 = vpop.f32.mrf.mxu2 }
  0xa6   : > { %v2055_v8 = vpop.f32.mrf.mxu3 }
  0xa7   : > { %v350_v41 = vpop.f32.mrf.mxu0 }
  0xaa   : > { %1582 = vmatmul.msk.bf16.gmra.mxu0 %vm325_vm1, %v1157_v9 }
  0xac   : > { %v418_v13 = vpop.f32.mrf.mxu1 }
  0xad   : > { %v2061_v54 = vpop.f32.mrf.mxu2  ;;  %v419_v62 = vadd.f32 %v418_v13, %v350_v41 }
  0xae   : > { %v2065_v63 = vpop.f32.mrf.mxu3 }
  0xaf   : > { %1496 = vmatmul.msk.bf16.gmra.mxu1 %vm325_vm1, %v822_v55  ;;  %v352_v31 = vpop.f32.mrf.mxu0 }
  0xb2   : > { %1524 = vmatmul.msk.bf16.gmra.mxu2 %vm325_vm1, %v927_v51 }
  0xb3   : > { %1554 = vmatmul.msk.bf16.gmra.mxu3 %vm325_vm1, %v1048_v60 }
  0xb4   : > { %v420_v26 = vpop.f32.mrf.mxu1 }
  0xb5   : > { %v365_v18 = vpop.f32.mrf.mxu2  ;;  %v421_v23 = vadd.f32 %v420_v26, %v352_v31 }
  0xb6   : > { %v623_v50 = vpop.f32.mrf.mxu3 }
  0xb7   : > { %v769_v34 = vpop.f32.mrf.mxu0 }
  0xba   : > { %1583 = vmatmul.msk.bf16.gmra.mxu0 %vm325_vm1, %v1159_v35 }
  0xbc   : > { %v423_v43 = vpop.f32.mrf.mxu1 }
  0xbd   : > { %v367_v39 = vpop.f32.mrf.mxu2  ;;  %v424_v57 = vadd.f32 %v423_v43, %v355_v29  ;;  %v930_v29 = vrot.slane %v920_v17, 2 }
  0xbe   : > { %v625_v25 = vpop.f32.mrf.mxu3 }
  0xbf   : > { %1497 = vmatmul.msk.bf16.gmra.mxu1 %vm325_vm1, %v824_v46  ;;  %v771_v1 = vpop.f32.mrf.mxu0  ;;  %v931_v5 = vsel %vm813_vm4, %v928_v38, %v930_v29 }
  0xc2   : > { %1525 = vmatmul.msk.bf16.gmra.mxu2 %vm325_vm1, %v929_v58 }
  0xc3   : > { %1555 = vmatmul.msk.bf16.gmra.mxu3 %vm325_vm1, %v1057_v24 }
  0xc4   : > { %v425_v2 = vpop.f32.mrf.mxu1 }
  0xc5   : > { %v512_v36 = vpop.f32.mrf.mxu2  ;;  %v426_v56 = vadd.f32 %v425_v2, %v357_v0 }
  0xc6   : > { %v537_v48 = vadd.f32 %v512_v36, %v419_v62  ;;  %v628_v44 = vpop.f32.mrf.mxu3 }
  0xc7   : > { %v774_v47 = vpop.f32.mrf.mxu0 }
  0xc8   : > { %v648_v40 = vadd.f32 %v623_v50, %v537_v48 }
  0xca   : > { %v2083_v19 = vadd.f32 %v769_v34, %v648_v40  ;;  %1584 = vmatmul.msk.bf16.gmra.mxu0 %vm325_vm1, %v1161_v3 }
  0xcc   : > { %v428_v30 = vpop.f32.mrf.mxu1 }
  0xcd   : > { %v514_v20 = vpop.f32.mrf.mxu2  ;;  %v429_v42 = vadd.f32 %v428_v30, %v2049_v59 }
  0xce   : > { %v538_v21 = vadd.f32 %v514_v20, %v421_v23  ;;  %v630_v45 = vpop.f32.mrf.mxu3 }
  0xcf   : > { %v776_v0 = vpop.f32.mrf.mxu0 }
  0xd0   : > { %v649_v4 = vadd.f32 %v625_v25, %v538_v21 }
  0xd2   : > { %1526 = vmatmul.msk.bf16.gmra.mxu2 %vm325_vm1, %v931_v5  ;;  %v2089_v6 = vadd.f32 %v771_v1, %v649_v4 }
  0xd4   : > { %v430_v41 = vpop.f32.mrf.mxu1 }
  0xd5   : > { %v517_v61 = vpop.f32.mrf.mxu2  ;;  %v431_v9 = vadd.f32 %v430_v41, %v2061_v54 }
  0xd6   : > { %v539_v7 = vadd.f32 %v517_v61, %v424_v57  ;;  %v633_v52 = vpop.f32.mrf.mxu3 }
  0xd7   : > { %v779_v10 = vpop.f32.mrf.mxu0 }
  0xd8   : > { %v650_v53 = vadd.f32 %v628_v44, %v539_v7 }
  0xda   : > { %v2092_v11 = vadd.f32 %v774_v47, %v650_v53 }
  0xdc   : > { %v433_v13 = vpop.f32.mrf.mxu1 }
  0xdd   : > { %v519_v59 = vpop.f32.mrf.mxu2  ;;  %v434_v55 = vadd.f32 %v433_v13, %v365_v18 }
  0xde   : > { %v540_v12 = vadd.f32 %v519_v59, %v426_v56  ;;  %v635_v15 = vpop.f32.mrf.mxu3 }
  0xdf   : > { %v781_v62 = vpop.f32.mrf.mxu0 }
  0xe0   : > { %v651_v14 = vadd.f32 %v630_v45, %v540_v12 }
  0xe2   : > { %v2094_v51 = vadd.f32 %v776_v0, %v651_v14 }
  0xe4   : > { %v435_v17 = vpop.f32.mrf.mxu1 }
  0xe5   : > { %v522_v31 = vpop.f32.mrf.mxu2  ;;  %v436_v22 = vadd.f32 %v435_v17, %v367_v39 }
  0xe6   : > { %v541_v60 = vadd.f32 %v522_v31, %v429_v42  ;;  %v638_v54 = vpop.f32.mrf.mxu3 }
  0xe7   : > { %v784_v27 = vpop.f32.mrf.mxu0 }
  0xe8   : > { %v652_v26 = vadd.f32 %v633_v52, %v541_v60 }
  0xea   : > { %v2096_v32 = vadd.f32 %v779_v10, %v652_v26 }
  0xec   : > { %v438_v34 = vpop.f32.mrf.mxu1 }
  0xed   : > { %v524_v23 = vpop.f32.mrf.mxu2  ;;  %v439_v35 = vadd.f32 %v438_v34, %v2055_v8 }
  0xee   : > { %v542_v50 = vadd.f32 %v524_v23, %v431_v9  ;;  %v640_v28 = vpop.f32.mrf.mxu3  ;;  %v2115_v9 = vld [vmem:[%s2166_s2] ss:$0 sm:$0xff] }
  0xef   : > { %v786_v16 = vpop.f32.mrf.mxu0 }
  0xf0   : > { %v653_v18 = vadd.f32 %v635_v15, %v542_v50 }
  0xf2   : > { %v2099_v33 = vadd.f32 %v781_v62, %v653_v18 }
  0xf4   : > { %v440_v46 = vpop.f32.mrf.mxu1 }
  0xf5   : > { %v527_v38 = vpop.f32.mrf.mxu2  ;;  %v441_v39 = vadd.f32 %v440_v46, %v2065_v63 }
  0xf6   : > { %v543_v43 = vadd.f32 %v527_v38, %v434_v55  ;;  %v643_v57 = vpop.f32.mrf.mxu3 }
  0xf7   : > { %v789_v58 = vpop.f32.mrf.mxu0 }
  0xf8   : > { %v654_v49 = vadd.f32 %v638_v54, %v543_v43 }
  0xfa   : > { %v2102_v25 = vadd.f32 %v784_v27, %v654_v49 }
  0xfc   : > { %v873_v36 = vpop.f32.mrf.mxu1 }
  0xfd   : > { %v529_v1 = vpop.f32.mrf.mxu2  ;;  %v898_v0 = vadd.f32 %v873_v36, %v2083_v19 }
  0xfe   : > { %v544_v24 = vadd.f32 %v529_v1, %v436_v22  ;;  %v645_v8 = vpop.f32.mrf.mxu3 }
  0xff   : > { %v791_v48 = vpop.f32.mrf.mxu0 }
 0x100   : > { %v655_v37 = vadd.f32 %v640_v28, %v544_v24 }
 0x102   : > { %v2104_v2 = vadd.f32 %v786_v16, %v655_v37 }
 0x104   : > { %v875_v3 = vpop.f32.mrf.mxu1 }
 0x105   : > { %v532_v56 = vpop.f32.mrf.mxu2  ;;  %v899_v10 = vadd.f32 %v875_v3, %v2089_v6 }
 0x106   : > { %v545_v40 = vadd.f32 %v532_v56, %v439_v35  ;;  %v1106_v47 = vpop.f32.mrf.mxu3 }
 0x107   : > { %v1210_v63 = vpop.f32.mrf.mxu0 }
 0x108   : > { %v656_v44 = vadd.f32 %v643_v57, %v545_v40 }
 0x10a   : > { %v2106_v29 = vadd.f32 %v789_v58, %v656_v44 }
 0x10c   : > { %v878_v45 = vpop.f32.mrf.mxu1 }
 0x10d   : > { %v534_v20 = vpop.f32.mrf.mxu2  ;;  %v900_v31 = vadd.f32 %v878_v45, %v2092_v11 }
 0x10e   : > { %v546_v21 = vadd.f32 %v534_v20, %v441_v39  ;;  %v1108_v42 = vpop.f32.mrf.mxu3 }
 0x10f   : > { %v1212_v5 = vpop.f32.mrf.mxu0 }
 0x110   : > { %v657_v30 = vadd.f32 %v645_v8, %v546_v21 }
 0x112   : > { %v2108_v4 = vadd.f32 %v791_v48, %v657_v30 }
 0x114   : > { %v880_v12 = vpop.f32.mrf.mxu1 }
 0x115   : > { %v980_v61 = vpop.f32.mrf.mxu2  ;;  %v901_v23 = vadd.f32 %v880_v12, %v2094_v51 }
 0x116   : > { %v1005_v7 = vadd.f32 %v980_v61, %v898_v0  ;;  %v1111_v53 = vpop.f32.mrf.mxu3 }
 0x117   : > { %v1215_v19 = vpop.f32.mrf.mxu0 }
 0x118   : > { %v1131_v41 = vadd.f32 %v1106_v47, %v1005_v7 }
 0x11a   : > { %v1235_v52 = vadd.f32 %v1210_v63, %v1131_v41 }
 0x11c   : > { %v1249_v59 = vadd.f32 %v2115_v9, %v1235_v52  ;;  %v883_v26 = vpop.f32.mrf.mxu1 }
 0x11d   : > { %v982_v13 = vpop.f32.mrf.mxu2  ;;  %v902_v43 = vadd.f32 %v883_v26, %v2096_v32 }
 0x11e   : > { %1260 = vst.msk [vmem:[%s2120_s21] sm:$0xff] %vm1259_vm7, %v1249_v59  ;;  %v1006_v55 = vadd.f32 %v982_v13, %v899_v10  ;;  %v1113_v62 = vpop.f32.mrf.mxu3 }
 0x11f   : > { %v1217_v22 = vpop.f32.mrf.mxu0 }
 0x120   : > { %v1132_v14 = vadd.f32 %v1108_v42, %v1006_v55 }
 0x122   : > { %v1236_v15 = vadd.f32 %v1212_v5, %v1132_v14 }
 0x124   : > { %v1250_v60 = vadd.f32 %v2115_v9, %v1236_v15  ;;  %v885_v16 = vpop.f32.mrf.mxu1 }
 0x125   : > { %v985_v17 = vpop.f32.mrf.mxu2  ;;  %v903_v36 = vadd.f32 %v885_v16, %v2099_v33 }
 0x126   : > { %1261 = vst.msk [vmem:[%s2120_s21 + $0x8] sm:$0xff] %vm1259_vm7, %v1250_v60  ;;  %v1007_v6 = vadd.f32 %v985_v17, %v900_v31  ;;  %v1116_v35 = vpop.f32.mrf.mxu3 }
 0x127   : > { %v1220_v18 = vpop.f32.mrf.mxu0 }
 0x128   : > { %v1133_v54 = vadd.f32 %v1111_v53, %v1007_v6 }
 0x12a   : > { %v1237_v27 = vadd.f32 %v1215_v19, %v1133_v54 }
 0x12c   : > { %v1251_v50 = vadd.f32 %v2115_v9, %v1237_v27  ;;  %v888_v24 = vpop.f32.mrf.mxu1 }
 0x12d   : > { %v987_v34 = vpop.f32.mrf.mxu2  ;;  %v904_v47 = vadd.f32 %v888_v24, %v2102_v25 }
 0x12e   : > { %1262 = vst.msk [vmem:[%s2120_s21 + $0x10] sm:$0xff] %vm1259_vm7, %v1251_v50  ;;  %v1008_v11 = vadd.f32 %v987_v34, %v901_v23  ;;  %v1118_v49 = vpop.f32.mrf.mxu3 }
 0x12f   : > { %v1222_v58 = vpop.f32.mrf.mxu0 }
 0x130   : > { %v1134_v28 = vadd.f32 %v1113_v62, %v1008_v11 }
 0x132   : > { %v1238_v38 = vadd.f32 %v1217_v22, %v1134_v28 }
 0x134   : > { %v1252_v46 = vadd.f32 %v2115_v9, %v1238_v38  ;;  %v890_v63 = vpop.f32.mrf.mxu1 }
 0x135   : > { %v990_v39 = vpop.f32.mrf.mxu2  ;;  %v905_v5 = vadd.f32 %v890_v63, %v2104_v2 }
 0x136   : > { %1263 = vst.msk [vmem:[%s2120_s21 + $0x18] sm:$0xff] %vm1259_vm7, %v1252_v46  ;;  %v1009_v51 = vadd.f32 %v990_v39, %v902_v43  ;;  %v1121_v56 = vpop.f32.mrf.mxu3 }
 0x137   : > { %v1225_v44 = vpop.f32.mrf.mxu0 }
 0x138   : > { %v1135_v57 = vadd.f32 %v1116_v35, %v1009_v51 }
 0x13a   : > { %v1239_v1 = vadd.f32 %v1220_v18, %v1135_v57 }
 0x13c   : > { %v1253_v37 = vadd.f32 %v2115_v9, %v1239_v1  ;;  %v893_v7 = vpop.f32.mrf.mxu1 }
 0x13d   : > { %v992_v8 = vpop.f32.mrf.mxu2  ;;  %v906_v52 = vadd.f32 %v893_v7, %v2106_v29 }
 0x13e   : > { %1264 = vst.msk [vmem:[%s2120_s21 + $0x20] sm:$0xff] %vm1259_vm7, %v1253_v37  ;;  %v1010_v32 = vadd.f32 %v992_v8, %v903_v36  ;;  %v1123_v42 = vpop.f32.mrf.mxu3 }
 0x13f   : > { %v1227_v0 = vpop.f32.mrf.mxu0 }
 0x140   : > { %v1136_v48 = vadd.f32 %v1118_v49, %v1010_v32 }
 0x142   : > { %v1240_v40 = vadd.f32 %v1222_v58, %v1136_v48 }
 0x144   : > { %v1254_v3 = vadd.f32 %v2115_v9, %v1240_v40  ;;  %v895_v55 = vpop.f32.mrf.mxu1 }
 0x145   : > { %v995_v20 = vpop.f32.mrf.mxu2  ;;  %v907_v15 = vadd.f32 %v895_v55, %v2108_v4 }
 0x146   : > { %1265 = vst.msk [vmem:[%s2120_s21 + $0x28] sm:$0xff] %vm1259_vm7, %v1254_v3  ;;  %v1011_v33 = vadd.f32 %v995_v20, %v904_v47  ;;  %v1126_v10 = vpop.f32.mrf.mxu3 }
 0x147   : > { %v1230_v12 = vpop.f32.mrf.mxu0 }
 0x148   : > { %v1137_v21 = vadd.f32 %v1121_v56, %v1011_v33 }
 0x14a   : > { %v1241_v30 = vadd.f32 %v1225_v44, %v1137_v21 }
 0x14c   : > { %v1255_v45 = vadd.f32 %v2115_v9, %v1241_v30 }
 0x14d   : > { %v997_v61 = vpop.f32.mrf.mxu2 }
 0x14e   : > { %1266 = vst.msk [vmem:[%s2120_s21 + $0x30] sm:$0xff] %vm1259_vm7, %v1255_v45  ;;  %v1012_v25 = vadd.f32 %v997_v61, %v905_v5  ;;  %v1128_v60 = vpop.f32.mrf.mxu3 }
 0x14f   : > { %v1232_v22 = vpop.f32.mrf.mxu0 }
 0x150   : > { %v1138_v41 = vadd.f32 %v1123_v42, %v1012_v25 }
 0x152   : > { %v1242_v53 = vadd.f32 %v1227_v0, %v1138_v41 }
 0x154   : > { %v1256_v19 = vadd.f32 %v2115_v9, %v1242_v53 }
 0x155   : > { %v1000_v59 = vpop.f32.mrf.mxu2 }
 0x156   : > { %1267 = vst.msk [vmem:[%s2120_s21 + $0x38] sm:$0xff] %vm1259_vm7, %v1256_v19  ;;  %v1013_v2 = vadd.f32 %v1000_v59, %v906_v52 }
 0x158   : > { %v1139_v13 = vadd.f32 %v1126_v10, %v1013_v2 }
 0x15a   : > { %v1243_v14 = vadd.f32 %v1230_v12, %v1139_v13 }
 0x15c   : > { %v1257_v62 = vadd.f32 %v2115_v9, %v1243_v14 }
 0x15d   : > { %v1002_v31 = vpop.f32.mrf.mxu2 }
 0x15e   : > { %1268 = vst.msk [vmem:[%s2120_s21 + $0x40] sm:$0xff] %vm1259_vm7, %v1257_v62  ;;  %v1014_v29 = vadd.f32 %v1002_v31, %v907_v15 }
 0x160   : > { %v1140_v17 = vadd.f32 %v1128_v60, %v1014_v29 }
 0x162   : > { %v1244_v6 = vadd.f32 %v1232_v22, %v1140_v17 }
 0x164   : > { %v1258_v26 = vadd.f32 %v2115_v9, %v1244_v6 }
 0x166   : > { %1269 = vst.msk [vmem:[%s2120_s21 + $0x48] sm:$0xff] %vm1259_vm7, %v1258_v26 }
 0x167 PF: > { %s13_s12 = sadd.s32 1, %s1652_s12  }
 0x168   : > { %p10_p4 = scmp.ge.s32.totalorder %s13_s12, 4  }
 0x16a   :  { %12 = sbr.rel (!%p10_p4) target bundleno = 1 (0x1), region = 70 }

// kernel: decoder_forward.10
= control target key start
LH: loop header
LB: loop body
LE: loop exit
PB: predicated region body
PF: predicated region fallthrough
CT: control target
= control target key end

     0   :  { %vm190_vm0 = vcmask 130048   ;;  %vm584_vm1 = vcmask 261120   ;;  %s1463_s2 = inlined_call_operand.vmem [shape: bf16[16,32], index: 2, kind: input, shape index: {}]   ;;  %s1464_s0 = inlined_call_operand.vmem [shape: f32[512,16], index: 0, kind: input, shape index: {}]   ;;  %s1465_s3 = inlined_call_operand.vmem [shape: f32[1,32], index: 3, kind: input, shape index: {}]   ;;  %s1466_s1 = inlined_call_operand.vmem [shape: f32[512,32], index: 1, kind: input, shape index: {}]   ;;  %s1467_s4 = inlined_call_operand.vmem [shape: f32[512,32], index: 4, kind: output, shape index: {}]  }
   0x1   :  { %v689_v0 = vld [vmem:[%s1463_s2] sm:$0xff]  ;;  %v19_v2 = vld [vmem:[%s1464_s0 + $0x8] sm:$0xff]  ;;  %v20_v21 = vld [vmem:[%s1464_s0 + $0x10] sm:$0xff] }
   0x2   :  { %v18_v1 = vld [vmem:[%s1464_s0] sm:$0xff]  ;;  %v83_v4 = vmax.f32 %v19_v2, 0.0  ;;  %v35_v6 = vld [vmem:[%s1464_s0 + $0x88] sm:$0xff]  ;;  %294 = vmatpush.bf16.msra.mxu0 %v689_v0  ;;  %690 = vmatpush.bf16.msra.mxu1 %v689_v0  ;;  %v21_v22 = vld [vmem:[%s1464_s0 + $0x18] sm:$0xff]  ;;  %v84_v29 = vmax.f32 %v20_v21, 0.0 }
   0x3   :  { %v82_v3 = vmax.f32 %v18_v1, 0.0  ;;  %v34_v5 = vld [vmem:[%s1464_s0 + $0x80] sm:$0xff]  ;;  %v99_v9 = vmax.f32 %v35_v6, 0.0  ;;  %v51_v10 = vld [vmem:[%s1464_s0 + $0x108] sm:$0xff]  ;;  %691 = vmatpush.bf16.msra.mxu2 %v689_v0  ;;  %692 = vmatpush.bf16.msra.mxu3 %v689_v0  ;;  %v36_v23 = vld [vmem:[%s1464_s0 + $0x90] sm:$0xff]  ;;  %v85_v30 = vmax.f32 %v21_v22, 0.0 }
   0x4   :  { %v50_v7 = vld [vmem:[%s1464_s0 + $0x100] sm:$0xff]  ;;  %v98_v8 = vmax.f32 %v34_v5, 0.0  ;;  %v67_v13 = vld [vmem:[%s1464_s0 + $0x188] sm:$0xff]  ;;  %v115_v15 = vmax.f32 %v51_v10, 0.0  ;;  %v37_v24 = vld [vmem:[%s1464_s0 + $0x98] sm:$0xff]  ;;  %v100_v31 = vmax.f32 %v36_v23, 0.0 }
   0x5   :  { %v114_v11 = vmax.f32 %v50_v7, 0.0  ;;  %v66_v12 = vld [vmem:[%s1464_s0 + $0x180] sm:$0xff]  ;;  %v146_v14 = vpack.c.bf16 %v83_v4, %v82_v3  ;;  %v131_v17 = vmax.f32 %v67_v13, 0.0  ;;  %v52_v25 = vld [vmem:[%s1464_s0 + $0x110] sm:$0xff]  ;;  %v53_v26 = vld [vmem:[%s1464_s0 + $0x118] sm:$0xff]  ;;  %v101_v32 = vmax.f32 %v37_v24, 0.0 }
   0x6   :  { %v130_v16 = vmax.f32 %v66_v12, 0.0  ;;  %v154_v18 = vpack.c.bf16 %v99_v9, %v98_v8  ;;  %v68_v27 = vld [vmem:[%s1464_s0 + $0x190] sm:$0xff]  ;;  %v69_v28 = vld [vmem:[%s1464_s0 + $0x198] sm:$0xff]  ;;  %v116_v33 = vmax.f32 %v52_v25, 0.0  ;;  %v117_v34 = vmax.f32 %v53_v26, 0.0  ;;  %v22_v41 = vld [vmem:[%s1464_s0 + $0x20] sm:$0xff] }
   0x7   :  { %657 = vmatmul.msk.bf16.vlgmr.msra.gmra.mxu0 %vm190_vm0, %v146_v14  ;;  %v162_v19 = vpack.c.bf16 %v115_v15, %v114_v11  ;;  %v132_v35 = vmax.f32 %v68_v27, 0.0  ;;  %v133_v36 = vmax.f32 %v69_v28, 0.0  ;;  %v147_v37 = vpack.c.bf16 %v85_v30, %v84_v29  ;;  %v23_v42 = vld [vmem:[%s1464_s0 + $0x28] sm:$0xff]  ;;  %v38_v43 = vld [vmem:[%s1464_s0 + $0xa0] sm:$0xff]  ;;  %v24_v61 = vld [vmem:[%s1464_s0 + $0x30] sm:$0xff] }
   0x8   :  { %v170_v20 = vpack.c.bf16 %v131_v17, %v130_v16  ;;  %665 = vmatmul.msk.bf16.vlgmr.msra.gmra.mxu1 %vm190_vm0, %v154_v18  ;;  %v155_v38 = vpack.c.bf16 %v101_v32, %v100_v31  ;;  %v163_v39 = vpack.c.bf16 %v117_v34, %v116_v33  ;;  %v39_v44 = vld [vmem:[%s1464_s0 + $0xa8] sm:$0xff]  ;;  %v54_v45 = vld [vmem:[%s1464_s0 + $0x120] sm:$0xff]  ;;  %v86_v49 = vmax.f32 %v22_v41, 0.0  ;;  %v25_v62 = vld [vmem:[%s1464_s0 + $0x38] sm:$0xff] }
   0x9   :  { %673 = vmatmul.msk.bf16.vlgmr.msra.gmra.mxu2 %vm190_vm0, %v162_v19  ;;  %v171_v40 = vpack.c.bf16 %v133_v36, %v132_v35  ;;  %v55_v46 = vld [vmem:[%s1464_s0 + $0x128] sm:$0xff]  ;;  %v70_v47 = vld [vmem:[%s1464_s0 + $0x1a0] sm:$0xff]  ;;  %v87_v50 = vmax.f32 %v23_v42, 0.0  ;;  %v102_v51 = vmax.f32 %v38_v43, 0.0  ;;  %v103_v52 = vmax.f32 %v39_v44, 0.0  ;;  %v40_v63 = vld [vmem:[%s1464_s0 + $0xb0] sm:$0xff] }
   0xa   :  { %681 = vmatmul.msk.bf16.vlgmr.msra.gmra.mxu3 %vm190_vm0, %v170_v20  ;;  %v71_v48 = vld [vmem:[%s1464_s0 + $0x1a8] sm:$0xff]  ;;  %v118_v53 = vmax.f32 %v54_v45, 0.0  ;;  %v119_v54 = vmax.f32 %v55_v46, 0.0  ;;  %v134_v55 = vmax.f32 %v70_v47, 0.0  ;;  %v41_v0 = vld [vmem:[%s1464_s0 + $0xb8] sm:$0xff]  ;;  %v56_v1 = vld [vmem:[%s1464_s0 + $0x130] sm:$0xff] }
   0xb   :  { %v135_v56 = vmax.f32 %v71_v48, 0.0  ;;  %v148_v57 = vpack.c.bf16 %v87_v50, %v86_v49  ;;  %v156_v58 = vpack.c.bf16 %v103_v52, %v102_v51  ;;  %v57_v2 = vld [vmem:[%s1464_s0 + $0x138] sm:$0xff]  ;;  %v72_v3 = vld [vmem:[%s1464_s0 + $0x1b0] sm:$0xff]  ;;  %v88_v5 = vmax.f32 %v24_v61, 0.0  ;;  %v26_v17 = vld [vmem:[%s1464_s0 + $0x40] sm:$0xff] }
   0xc   :  { %v164_v59 = vpack.c.bf16 %v119_v54, %v118_v53  ;;  %v73_v4 = vld [vmem:[%s1464_s0 + $0x1b8] sm:$0xff]  ;;  %v89_v6 = vmax.f32 %v25_v62, 0.0  ;;  %v104_v7 = vmax.f32 %v40_v63, 0.0  ;;  %v105_v8 = vmax.f32 %v41_v0, 0.0  ;;  %v27_v18 = vld [vmem:[%s1464_s0 + $0x48] sm:$0xff]  ;;  %v42_v19 = vld [vmem:[%s1464_s0 + $0xc0] sm:$0xff] }
   0xd   :  { %v172_v60 = vpack.c.bf16 %v135_v56, %v134_v55  ;;  %v120_v9 = vmax.f32 %v56_v1, 0.0  ;;  %v121_v10 = vmax.f32 %v57_v2, 0.0  ;;  %v136_v11 = vmax.f32 %v72_v3, 0.0  ;;  %v43_v20 = vld [vmem:[%s1464_s0 + $0xc8] sm:$0xff]  ;;  %v58_v21 = vld [vmem:[%s1464_s0 + $0x140] sm:$0xff]  ;;  %v60_v41 = vld [vmem:[%s1464_s0 + $0x150] sm:$0xff] }
   0xe   :  { %v137_v12 = vmax.f32 %v73_v4, 0.0  ;;  %v149_v13 = vpack.c.bf16 %v89_v6, %v88_v5  ;;  %v157_v14 = vpack.c.bf16 %v105_v8, %v104_v7  ;;  %v59_v22 = vld [vmem:[%s1464_s0 + $0x148] sm:$0xff]  ;;  %v74_v23 = vld [vmem:[%s1464_s0 + $0x1c0] sm:$0xff]  ;;  %v90_v25 = vmax.f32 %v26_v17, 0.0  ;;  %v61_v42 = vld [vmem:[%s1464_s0 + $0x158] sm:$0xff] }
   0xf   :  { %v165_v15 = vpack.c.bf16 %v121_v10, %v120_v9  ;;  %v75_v24 = vld [vmem:[%s1464_s0 + $0x1c8] sm:$0xff]  ;;  %v91_v26 = vmax.f32 %v27_v18, 0.0  ;;  %v106_v27 = vmax.f32 %v42_v19, 0.0  ;;  %v107_v28 = vmax.f32 %v43_v20, 0.0  ;;  %v76_v43 = vld [vmem:[%s1464_s0 + $0x1d0] sm:$0xff]  ;;  %v77_v44 = vld [vmem:[%s1464_s0 + $0x1d8] sm:$0xff] }
  0x10   :  { %v173_v16 = vpack.c.bf16 %v137_v12, %v136_v11  ;;  %v122_v29 = vmax.f32 %v58_v21, 0.0  ;;  %v123_v30 = vmax.f32 %v59_v22, 0.0  ;;  %v138_v31 = vmax.f32 %v74_v23, 0.0  ;;  %v62_v61 = vld [vmem:[%s1464_s0 + $0x160] sm:$0xff]  ;;  %v63_v62 = vld [vmem:[%s1464_s0 + $0x168] sm:$0xff]  ;;  %v64_v17 = vld [vmem:[%s1464_s0 + $0x170] sm:$0xff] }
  0x11   :  { %v139_v32 = vmax.f32 %v75_v24, 0.0  ;;  %v150_v33 = vpack.c.bf16 %v91_v26, %v90_v25  ;;  %v158_v34 = vpack.c.bf16 %v107_v28, %v106_v27  ;;  %v124_v49 = vmax.f32 %v60_v41, 0.0  ;;  %v78_v63 = vld [vmem:[%s1464_s0 + $0x1e0] sm:$0xff]  ;;  %v79_v0 = vld [vmem:[%s1464_s0 + $0x1e8] sm:$0xff]  ;;  %v65_v18 = vld [vmem:[%s1464_s0 + $0x178] sm:$0xff] }
  0x12   :  { %v166_v35 = vpack.c.bf16 %v123_v30, %v122_v29  ;;  %v125_v50 = vmax.f32 %v61_v42, 0.0  ;;  %v140_v51 = vmax.f32 %v76_v43, 0.0  ;;  %v141_v52 = vmax.f32 %v77_v44, 0.0  ;;  %v80_v19 = vld [vmem:[%s1464_s0 + $0x1f0] sm:$0xff]  ;;  %v81_v20 = vld [vmem:[%s1464_s0 + $0x1f8] sm:$0xff]  ;;  %v488_v43 = vld [vmem:[%s1466_s1 + $0x100] sm:$0xff] }
  0x13   :  { %v174_v36 = vpack.c.bf16 %v139_v32, %v138_v31  ;;  %v126_v5 = vmax.f32 %v62_v61, 0.0  ;;  %v127_v6 = vmax.f32 %v63_v62, 0.0  ;;  %v142_v7 = vmax.f32 %v78_v63, 0.0  ;;  %v505_v61 = vld [vmem:[%s1466_s1 + $0x188] sm:$0xff] }
  0x14   :  { %v167_v55 = vpack.c.bf16 %v125_v50, %v124_v49  ;;  %v175_v56 = vpack.c.bf16 %v141_v52, %v140_v51  ;;  %v143_v8 = vmax.f32 %v79_v0, 0.0  ;;  %v128_v25 = vmax.f32 %v64_v17, 0.0  ;;  %v457_v49 = vld [vmem:[%s1466_s1 + $0x8] sm:$0xff]  ;;  %v459_v17 = vld [vmem:[%s1466_s1 + $0x18] sm:$0xff] }
  0x15   :  { %v168_v11 = vpack.c.bf16 %v127_v6, %v126_v5  ;;  %v129_v26 = vmax.f32 %v65_v18, 0.0  ;;  %v144_v27 = vmax.f32 %v80_v19, 0.0  ;;  %v145_v28 = vmax.f32 %v81_v20, 0.0  ;;  %v473_v51 = vld [vmem:[%s1466_s1 + $0x88] sm:$0xff]  ;;  %v475_v19 = vld [vmem:[%s1466_s1 + $0x98] sm:$0xff] }
  0x16   :  { %v176_v12 = vpack.c.bf16 %v143_v8, %v142_v7 }
  0x17   :  { %658 = vmatmul.msk.bf16.gmra.mxu0 %vm190_vm0, %v147_v37  ;;  %v28_v37 = vld [vmem:[%s1464_s0 + $0x50] sm:$0xff]  ;;  %v169_v31 = vpack.c.bf16 %v129_v26, %v128_v25  ;;  %v177_v32 = vpack.c.bf16 %v145_v28, %v144_v27  ;;  %v491_v27 = vld [vmem:[%s1466_s1 + $0x118] sm:$0xff] }
  0x18   :  { %666 = vmatmul.msk.bf16.gmra.mxu1 %vm190_vm0, %v155_v38  ;;  %v29_v38 = vld [vmem:[%s1464_s0 + $0x58] sm:$0xff]  ;;  %v92_v45 = vmax.f32 %v28_v37, 0.0 }
  0x19   :  { %674 = vmatmul.msk.bf16.gmra.mxu2 %vm190_vm0, %v163_v39  ;;  %v44_v39 = vld [vmem:[%s1464_s0 + $0xd0] sm:$0xff]  ;;  %v93_v46 = vmax.f32 %v29_v38, 0.0  ;;  %v472_v38 = vld [vmem:[%s1466_s1 + $0x80] sm:$0xff] }
  0x1a   :  { %682 = vmatmul.msk.bf16.gmra.mxu3 %vm190_vm0, %v171_v40  ;;  %v45_v40 = vld [vmem:[%s1464_s0 + $0xd8] sm:$0xff]  ;;  %v108_v47 = vmax.f32 %v44_v39, 0.0 }
  0x1b   :  { %v109_v48 = vmax.f32 %v45_v40, 0.0  ;;  %v151_v53 = vpack.c.bf16 %v93_v46, %v92_v45  ;;  %v504_v45 = vld [vmem:[%s1466_s1 + $0x180] sm:$0xff] }
  0x1d   :  { %v159_v54 = vpack.c.bf16 %v109_v48, %v108_v47 }
  0x27   :  { %659 = vmatmul.msk.bf16.gmra.mxu0 %vm190_vm0, %v148_v57  ;;  %v30_v57 = vld [vmem:[%s1464_s0 + $0x60] sm:$0xff] }
  0x28   :  { %667 = vmatmul.msk.bf16.gmra.mxu1 %vm190_vm0, %v156_v58  ;;  %v31_v58 = vld [vmem:[%s1464_s0 + $0x68] sm:$0xff]  ;;  %v94_v1 = vmax.f32 %v30_v57, 0.0 }
  0x29   :  { %675 = vmatmul.msk.bf16.gmra.mxu2 %vm190_vm0, %v164_v59  ;;  %v46_v59 = vld [vmem:[%s1464_s0 + $0xe0] sm:$0xff]  ;;  %v95_v2 = vmax.f32 %v31_v58, 0.0 }
  0x2a   :  { %683 = vmatmul.msk.bf16.gmra.mxu3 %vm190_vm0, %v172_v60  ;;  %v47_v60 = vld [vmem:[%s1464_s0 + $0xe8] sm:$0xff]  ;;  %v110_v3 = vmax.f32 %v46_v59, 0.0 }
  0x2b   :  { %v111_v4 = vmax.f32 %v47_v60, 0.0  ;;  %v152_v9 = vpack.c.bf16 %v95_v2, %v94_v1  ;;  %v489_v59 = vld [vmem:[%s1466_s1 + $0x108] sm:$0xff]  ;;  %v458_v1 = vld [vmem:[%s1466_s1 + $0x10] sm:$0xff] }
  0x2d   :  { %v160_v10 = vpack.c.bf16 %v111_v4, %v110_v3  ;;  %v474_v3 = vld [vmem:[%s1466_s1 + $0x90] sm:$0xff] }
  0x37   :  { %660 = vmatmul.msk.bf16.gmra.mxu0 %vm190_vm0, %v149_v13  ;;  %v32_v13 = vld [vmem:[%s1464_s0 + $0x70] sm:$0xff] }
  0x38   :  { %668 = vmatmul.msk.bf16.gmra.mxu1 %vm190_vm0, %v157_v14  ;;  %v33_v14 = vld [vmem:[%s1464_s0 + $0x78] sm:$0xff]  ;;  %v96_v21 = vmax.f32 %v32_v13, 0.0  ;;  %v506_v13 = vld [vmem:[%s1466_s1 + $0x190] sm:$0xff] }
  0x39   :  { %676 = vmatmul.msk.bf16.gmra.mxu2 %vm190_vm0, %v165_v15  ;;  %v48_v15 = vld [vmem:[%s1464_s0 + $0xf0] sm:$0xff]  ;;  %v97_v22 = vmax.f32 %v33_v14, 0.0 }
  0x3a   :  { %684 = vmatmul.msk.bf16.gmra.mxu3 %vm190_vm0, %v173_v16  ;;  %v49_v16 = vld [vmem:[%s1464_s0 + $0xf8] sm:$0xff]  ;;  %v112_v23 = vmax.f32 %v48_v15, 0.0 }
  0x3b   :  { %v113_v24 = vmax.f32 %v49_v16, 0.0  ;;  %v153_v29 = vpack.c.bf16 %v97_v22, %v96_v21 }
  0x3d   :  { %v161_v30 = vpack.c.bf16 %v113_v24, %v112_v23 }
  0x47   :  { %661 = vmatmul.msk.bf16.gmra.mxu0 %vm190_vm0, %v150_v33  ;;  %v949_v33 = vld [vmem:[%s1465_s3] ss:$0 sm:$0xff] }
  0x48   :  { %669 = vmatmul.msk.bf16.gmra.mxu1 %vm190_vm0, %v158_v34 }
  0x49   :  { %677 = vmatmul.msk.bf16.gmra.mxu2 %vm190_vm0, %v166_v35  ;;  %v456_v35 = vld [vmem:[%s1466_s1] sm:$0xff] }
  0x4a   :  { %685 = vmatmul.msk.bf16.gmra.mxu3 %vm190_vm0, %v174_v36 }
  0x57   :  { %662 = vmatmul.msk.bf16.gmra.mxu0 %vm190_vm0, %v151_v53 }
  0x58   :  { %670 = vmatmul.msk.bf16.gmra.mxu1 %vm190_vm0, %v159_v54 }
  0x59   :  { %678 = vmatmul.msk.bf16.gmra.mxu2 %vm190_vm0, %v167_v55 }
  0x5a   :  { %686 = vmatmul.msk.bf16.gmra.mxu3 %vm190_vm0, %v175_v56 }
  0x67   :  { %663 = vmatmul.msk.bf16.gmra.mxu0 %vm190_vm0, %v152_v9 }
  0x68   :  { %671 = vmatmul.msk.bf16.gmra.mxu1 %vm190_vm0, %v160_v10 }
  0x69   :  { %679 = vmatmul.msk.bf16.gmra.mxu2 %vm190_vm0, %v168_v11  ;;  %v490_v11 = vld [vmem:[%s1466_s1 + $0x110] sm:$0xff] }
  0x6a   :  { %687 = vmatmul.msk.bf16.gmra.mxu3 %vm190_vm0, %v176_v12 }
  0x77   :  { %664 = vmatmul.msk.bf16.gmra.mxu0 %vm190_vm0, %v153_v29  ;;  %v507_v29 = vld [vmem:[%s1466_s1 + $0x198] sm:$0xff] }
  0x78   :  { %672 = vmatmul.msk.bf16.gmra.mxu1 %vm190_vm0, %v161_v30 }
  0x79   :  { %680 = vmatmul.msk.bf16.gmra.mxu2 %vm190_vm0, %v169_v31 }
  0x7a   :  { %688 = vmatmul.msk.bf16.gmra.mxu3 %vm190_vm0, %v177_v32 }
  0x84   :  { %v296_v34 = vpop.f32.mrf.mxu0 }
  0x85   :  { %v297_v36 = vadd.f32 %v949_v33, %v296_v34  ;;  %v336_v37 = vpop.f32.mrf.mxu1  ;;  %v460_v34 = vld [vmem:[%s1466_s1 + $0x20] sm:$0xff] }
  0x86   :  { %v337_v39 = vadd.f32 %v949_v33, %v336_v37 }
  0x87   :  { %v520_v40 = vadd.f32 %v456_v35, %v297_v36  ;;  %v476_v36 = vld [vmem:[%s1466_s1 + $0xa0] sm:$0xff] }
  0x88   :  { %v536_v41 = vadd.f32 %v472_v38, %v337_v39 }
  0x89   :  { %585 = vst.msk [vmem:[%s1467_s4] sm:$0xff] %vm584_vm1, %v520_v40 }
  0x8a   :  { %601 = vst.msk [vmem:[%s1467_s4 + $0x80] sm:$0xff] %vm584_vm1, %v536_v41 }
  0x8c   :  { %v376_v42 = vpop.f32.mrf.mxu2  ;;  %v298_v48 = vpop.f32.mrf.mxu0 }
  0x8d   :  { %v416_v44 = vpop.f32.mrf.mxu3  ;;  %v377_v46 = vadd.f32 %v949_v33, %v376_v42  ;;  %v338_v50 = vpop.f32.mrf.mxu1  ;;  %v299_v52 = vadd.f32 %v949_v33, %v298_v48 }
  0x8e   :  { %v417_v47 = vadd.f32 %v949_v33, %v416_v44  ;;  %v339_v53 = vadd.f32 %v949_v33, %v338_v50  ;;  %v492_v44 = vld [vmem:[%s1466_s1 + $0x120] sm:$0xff]  ;;  %v461_v50 = vld [vmem:[%s1466_s1 + $0x28] sm:$0xff] }
  0x8f   :  { %v552_v54 = vadd.f32 %v488_v43, %v377_v46  ;;  %v521_v56 = vadd.f32 %v457_v49, %v299_v52  ;;  %v508_v46 = vld [vmem:[%s1466_s1 + $0x1a0] sm:$0xff]  ;;  %v477_v52 = vld [vmem:[%s1466_s1 + $0xa8] sm:$0xff] }
  0x90   :  { %v568_v55 = vadd.f32 %v504_v45, %v417_v47  ;;  %v537_v57 = vadd.f32 %v473_v51, %v339_v53 }
  0x91   :  { %617 = vst.msk [vmem:[%s1467_s4 + $0x100] sm:$0xff] %vm584_vm1, %v552_v54 }
  0x92   :  { %633 = vst.msk [vmem:[%s1467_s4 + $0x180] sm:$0xff] %vm584_vm1, %v568_v55 }
  0x93   :  { %586 = vst.msk [vmem:[%s1467_s4 + $0x8] sm:$0xff] %vm584_vm1, %v521_v56 }
  0x94   :  { %602 = vst.msk [vmem:[%s1467_s4 + $0x88] sm:$0xff] %vm584_vm1, %v537_v57  ;;  %v378_v58 = vpop.f32.mrf.mxu2  ;;  %v301_v0 = vpop.f32.mrf.mxu0 }
  0x95   :  { %v418_v60 = vpop.f32.mrf.mxu3  ;;  %v379_v62 = vadd.f32 %v949_v33, %v378_v58  ;;  %v341_v2 = vpop.f32.mrf.mxu1  ;;  %v302_v4 = vadd.f32 %v949_v33, %v301_v0 }
  0x96   :  { %v419_v63 = vadd.f32 %v949_v33, %v418_v60  ;;  %v342_v5 = vadd.f32 %v949_v33, %v341_v2  ;;  %v493_v60 = vld [vmem:[%s1466_s1 + $0x128] sm:$0xff]  ;;  %v462_v2 = vld [vmem:[%s1466_s1 + $0x30] sm:$0xff] }
  0x97   :  { %v553_v6 = vadd.f32 %v489_v59, %v379_v62  ;;  %v522_v8 = vadd.f32 %v458_v1, %v302_v4  ;;  %v509_v62 = vld [vmem:[%s1466_s1 + $0x1a8] sm:$0xff]  ;;  %v478_v4 = vld [vmem:[%s1466_s1 + $0xb0] sm:$0xff] }
  0x98   :  { %v569_v7 = vadd.f32 %v505_v61, %v419_v63  ;;  %v538_v9 = vadd.f32 %v474_v3, %v342_v5 }
  0x99   :  { %618 = vst.msk [vmem:[%s1467_s4 + $0x108] sm:$0xff] %vm584_vm1, %v553_v6 }
  0x9a   :  { %634 = vst.msk [vmem:[%s1467_s4 + $0x188] sm:$0xff] %vm584_vm1, %v569_v7 }
  0x9b   :  { %587 = vst.msk [vmem:[%s1467_s4 + $0x10] sm:$0xff] %vm584_vm1, %v522_v8 }
  0x9c   :  { %603 = vst.msk [vmem:[%s1467_s4 + $0x90] sm:$0xff] %vm584_vm1, %v538_v9  ;;  %v381_v10 = vpop.f32.mrf.mxu2  ;;  %v303_v16 = vpop.f32.mrf.mxu0 }
  0x9d   :  { %v421_v12 = vpop.f32.mrf.mxu3  ;;  %v382_v14 = vadd.f32 %v949_v33, %v381_v10  ;;  %v343_v18 = vpop.f32.mrf.mxu1  ;;  %v304_v20 = vadd.f32 %v949_v33, %v303_v16 }
  0x9e   :  { %v422_v15 = vadd.f32 %v949_v33, %v421_v12  ;;  %v344_v21 = vadd.f32 %v949_v33, %v343_v18  ;;  %v494_v12 = vld [vmem:[%s1466_s1 + $0x130] sm:$0xff]  ;;  %v463_v18 = vld [vmem:[%s1466_s1 + $0x38] sm:$0xff] }
  0x9f   :  { %v554_v22 = vadd.f32 %v490_v11, %v382_v14  ;;  %v523_v24 = vadd.f32 %v459_v17, %v304_v20  ;;  %v510_v14 = vld [vmem:[%s1466_s1 + $0x1b0] sm:$0xff]  ;;  %v479_v20 = vld [vmem:[%s1466_s1 + $0xb8] sm:$0xff] }
  0xa0   :  { %v570_v23 = vadd.f32 %v506_v13, %v422_v15  ;;  %v539_v25 = vadd.f32 %v475_v19, %v344_v21 }
  0xa1   :  { %619 = vst.msk [vmem:[%s1467_s4 + $0x110] sm:$0xff] %vm584_vm1, %v554_v22 }
  0xa2   :  { %635 = vst.msk [vmem:[%s1467_s4 + $0x190] sm:$0xff] %vm584_vm1, %v570_v23 }
  0xa3   :  { %588 = vst.msk [vmem:[%s1467_s4 + $0x18] sm:$0xff] %vm584_vm1, %v523_v24 }
  0xa4   :  { %604 = vst.msk [vmem:[%s1467_s4 + $0x98] sm:$0xff] %vm584_vm1, %v539_v25  ;;  %v383_v26 = vpop.f32.mrf.mxu2  ;;  %v306_v32 = vpop.f32.mrf.mxu0 }
  0xa5   :  { %v423_v28 = vpop.f32.mrf.mxu3  ;;  %v384_v30 = vadd.f32 %v949_v33, %v383_v26  ;;  %v346_v35 = vpop.f32.mrf.mxu1  ;;  %v307_v37 = vadd.f32 %v949_v33, %v306_v32 }
  0xa6   :  { %v424_v31 = vadd.f32 %v949_v33, %v423_v28  ;;  %v347_v38 = vadd.f32 %v949_v33, %v346_v35  ;;  %v495_v28 = vld [vmem:[%s1466_s1 + $0x138] sm:$0xff]  ;;  %v464_v35 = vld [vmem:[%s1466_s1 + $0x40] sm:$0xff] }
  0xa7   :  { %v555_v39 = vadd.f32 %v491_v27, %v384_v30  ;;  %v524_v41 = vadd.f32 %v460_v34, %v307_v37  ;;  %v511_v30 = vld [vmem:[%s1466_s1 + $0x1b8] sm:$0xff]  ;;  %v480_v37 = vld [vmem:[%s1466_s1 + $0xc0] sm:$0xff] }
  0xa8   :  { %v571_v40 = vadd.f32 %v507_v29, %v424_v31  ;;  %v540_v42 = vadd.f32 %v476_v36, %v347_v38 }
  0xa9   :  { %620 = vst.msk [vmem:[%s1467_s4 + $0x118] sm:$0xff] %vm584_vm1, %v555_v39 }
  0xaa   :  { %636 = vst.msk [vmem:[%s1467_s4 + $0x198] sm:$0xff] %vm584_vm1, %v571_v40 }
  0xab   :  { %589 = vst.msk [vmem:[%s1467_s4 + $0x20] sm:$0xff] %vm584_vm1, %v524_v41 }
  0xac   :  { %605 = vst.msk [vmem:[%s1467_s4 + $0xa0] sm:$0xff] %vm584_vm1, %v540_v42  ;;  %v386_v43 = vpop.f32.mrf.mxu2  ;;  %v308_v49 = vpop.f32.mrf.mxu0 }
  0xad   :  { %v426_v45 = vpop.f32.mrf.mxu3  ;;  %v387_v47 = vadd.f32 %v949_v33, %v386_v43  ;;  %v348_v51 = vpop.f32.mrf.mxu1  ;;  %v309_v53 = vadd.f32 %v949_v33, %v308_v49 }
  0xae   :  { %v427_v48 = vadd.f32 %v949_v33, %v426_v45  ;;  %v349_v54 = vadd.f32 %v949_v33, %v348_v51  ;;  %v496_v45 = vld [vmem:[%s1466_s1 + $0x140] sm:$0xff]  ;;  %v465_v51 = vld [vmem:[%s1466_s1 + $0x48] sm:$0xff] }
  0xaf   :  { %v556_v55 = vadd.f32 %v492_v44, %v387_v47  ;;  %v525_v57 = vadd.f32 %v461_v50, %v309_v53  ;;  %v512_v47 = vld [vmem:[%s1466_s1 + $0x1c0] sm:$0xff]  ;;  %v481_v53 = vld [vmem:[%s1466_s1 + $0xc8] sm:$0xff] }
  0xb0   :  { %v572_v56 = vadd.f32 %v508_v46, %v427_v48  ;;  %v541_v58 = vadd.f32 %v477_v52, %v349_v54 }
  0xb1   :  { %621 = vst.msk [vmem:[%s1467_s4 + $0x120] sm:$0xff] %vm584_vm1, %v556_v55 }
  0xb2   :  { %637 = vst.msk [vmem:[%s1467_s4 + $0x1a0] sm:$0xff] %vm584_vm1, %v572_v56 }
  0xb3   :  { %590 = vst.msk [vmem:[%s1467_s4 + $0x28] sm:$0xff] %vm584_vm1, %v525_v57 }
  0xb4   :  { %606 = vst.msk [vmem:[%s1467_s4 + $0xa8] sm:$0xff] %vm584_vm1, %v541_v58  ;;  %v388_v59 = vpop.f32.mrf.mxu2  ;;  %v311_v1 = vpop.f32.mrf.mxu0 }
  0xb5   :  { %v428_v61 = vpop.f32.mrf.mxu3  ;;  %v389_v63 = vadd.f32 %v949_v33, %v388_v59  ;;  %v351_v3 = vpop.f32.mrf.mxu1  ;;  %v312_v5 = vadd.f32 %v949_v33, %v311_v1 }
  0xb6   :  { %v429_v0 = vadd.f32 %v949_v33, %v428_v61  ;;  %v352_v6 = vadd.f32 %v949_v33, %v351_v3  ;;  %v497_v61 = vld [vmem:[%s1466_s1 + $0x148] sm:$0xff]  ;;  %v466_v3 = vld [vmem:[%s1466_s1 + $0x50] sm:$0xff] }
  0xb7   :  { %v557_v7 = vadd.f32 %v493_v60, %v389_v63  ;;  %v526_v9 = vadd.f32 %v462_v2, %v312_v5  ;;  %v513_v63 = vld [vmem:[%s1466_s1 + $0x1c8] sm:$0xff]  ;;  %v482_v5 = vld [vmem:[%s1466_s1 + $0xd0] sm:$0xff] }
  0xb8   :  { %v573_v8 = vadd.f32 %v509_v62, %v429_v0  ;;  %v542_v10 = vadd.f32 %v478_v4, %v352_v6 }
  0xb9   :  { %622 = vst.msk [vmem:[%s1467_s4 + $0x128] sm:$0xff] %vm584_vm1, %v557_v7 }
  0xba   :  { %638 = vst.msk [vmem:[%s1467_s4 + $0x1a8] sm:$0xff] %vm584_vm1, %v573_v8 }
  0xbb   :  { %591 = vst.msk [vmem:[%s1467_s4 + $0x30] sm:$0xff] %vm584_vm1, %v526_v9 }
  0xbc   :  { %607 = vst.msk [vmem:[%s1467_s4 + $0xb0] sm:$0xff] %vm584_vm1, %v542_v10  ;;  %v391_v11 = vpop.f32.mrf.mxu2  ;;  %v313_v17 = vpop.f32.mrf.mxu0 }
  0xbd   :  { %v431_v13 = vpop.f32.mrf.mxu3  ;;  %v392_v15 = vadd.f32 %v949_v33, %v391_v11  ;;  %v353_v19 = vpop.f32.mrf.mxu1  ;;  %v314_v21 = vadd.f32 %v949_v33, %v313_v17 }
  0xbe   :  { %v432_v16 = vadd.f32 %v949_v33, %v431_v13  ;;  %v354_v22 = vadd.f32 %v949_v33, %v353_v19  ;;  %v498_v13 = vld [vmem:[%s1466_s1 + $0x150] sm:$0xff]  ;;  %v467_v19 = vld [vmem:[%s1466_s1 + $0x58] sm:$0xff] }
  0xbf   :  { %v558_v23 = vadd.f32 %v494_v12, %v392_v15  ;;  %v527_v25 = vadd.f32 %v463_v18, %v314_v21  ;;  %v514_v15 = vld [vmem:[%s1466_s1 + $0x1d0] sm:$0xff]  ;;  %v483_v21 = vld [vmem:[%s1466_s1 + $0xd8] sm:$0xff] }
  0xc0   :  { %v574_v24 = vadd.f32 %v510_v14, %v432_v16  ;;  %v543_v26 = vadd.f32 %v479_v20, %v354_v22 }
  0xc1   :  { %623 = vst.msk [vmem:[%s1467_s4 + $0x130] sm:$0xff] %vm584_vm1, %v558_v23 }
  0xc2   :  { %639 = vst.msk [vmem:[%s1467_s4 + $0x1b0] sm:$0xff] %vm584_vm1, %v574_v24 }
  0xc3   :  { %592 = vst.msk [vmem:[%s1467_s4 + $0x38] sm:$0xff] %vm584_vm1, %v527_v25 }
  0xc4   :  { %608 = vst.msk [vmem:[%s1467_s4 + $0xb8] sm:$0xff] %vm584_vm1, %v543_v26  ;;  %v393_v27 = vpop.f32.mrf.mxu2  ;;  %v316_v34 = vpop.f32.mrf.mxu0 }
  0xc5   :  { %v433_v29 = vpop.f32.mrf.mxu3  ;;  %v394_v31 = vadd.f32 %v949_v33, %v393_v27  ;;  %v356_v36 = vpop.f32.mrf.mxu1  ;;  %v317_v38 = vadd.f32 %v949_v33, %v316_v34 }
  0xc6   :  { %v434_v32 = vadd.f32 %v949_v33, %v433_v29  ;;  %v357_v39 = vadd.f32 %v949_v33, %v356_v36  ;;  %v499_v29 = vld [vmem:[%s1466_s1 + $0x158] sm:$0xff]  ;;  %v468_v36 = vld [vmem:[%s1466_s1 + $0x60] sm:$0xff] }
  0xc7   :  { %v559_v40 = vadd.f32 %v495_v28, %v394_v31  ;;  %v528_v42 = vadd.f32 %v464_v35, %v317_v38  ;;  %v515_v31 = vld [vmem:[%s1466_s1 + $0x1d8] sm:$0xff]  ;;  %v484_v38 = vld [vmem:[%s1466_s1 + $0xe0] sm:$0xff] }
  0xc8   :  { %v575_v41 = vadd.f32 %v511_v30, %v434_v32  ;;  %v544_v43 = vadd.f32 %v480_v37, %v357_v39 }
  0xc9   :  { %624 = vst.msk [vmem:[%s1467_s4 + $0x138] sm:$0xff] %vm584_vm1, %v559_v40 }
  0xca   :  { %640 = vst.msk [vmem:[%s1467_s4 + $0x1b8] sm:$0xff] %vm584_vm1, %v575_v41 }
  0xcb   :  { %593 = vst.msk [vmem:[%s1467_s4 + $0x40] sm:$0xff] %vm584_vm1, %v528_v42 }
  0xcc   :  { %609 = vst.msk [vmem:[%s1467_s4 + $0xc0] sm:$0xff] %vm584_vm1, %v544_v43  ;;  %v396_v44 = vpop.f32.mrf.mxu2  ;;  %v318_v50 = vpop.f32.mrf.mxu0 }
  0xcd   :  { %v436_v46 = vpop.f32.mrf.mxu3  ;;  %v397_v48 = vadd.f32 %v949_v33, %v396_v44  ;;  %v358_v52 = vpop.f32.mrf.mxu1  ;;  %v319_v54 = vadd.f32 %v949_v33, %v318_v50 }
  0xce   :  { %v437_v49 = vadd.f32 %v949_v33, %v436_v46  ;;  %v359_v55 = vadd.f32 %v949_v33, %v358_v52  ;;  %v500_v46 = vld [vmem:[%s1466_s1 + $0x160] sm:$0xff]  ;;  %v469_v52 = vld [vmem:[%s1466_s1 + $0x68] sm:$0xff] }
  0xcf   :  { %v560_v56 = vadd.f32 %v496_v45, %v397_v48  ;;  %v529_v58 = vadd.f32 %v465_v51, %v319_v54  ;;  %v516_v48 = vld [vmem:[%s1466_s1 + $0x1e0] sm:$0xff]  ;;  %v485_v54 = vld [vmem:[%s1466_s1 + $0xe8] sm:$0xff] }
  0xd0   :  { %v576_v57 = vadd.f32 %v512_v47, %v437_v49  ;;  %v545_v59 = vadd.f32 %v481_v53, %v359_v55 }
  0xd1   :  { %625 = vst.msk [vmem:[%s1467_s4 + $0x140] sm:$0xff] %vm584_vm1, %v560_v56 }
  0xd2   :  { %641 = vst.msk [vmem:[%s1467_s4 + $0x1c0] sm:$0xff] %vm584_vm1, %v576_v57 }
  0xd3   :  { %594 = vst.msk [vmem:[%s1467_s4 + $0x48] sm:$0xff] %vm584_vm1, %v529_v58 }
  0xd4   :  { %610 = vst.msk [vmem:[%s1467_s4 + $0xc8] sm:$0xff] %vm584_vm1, %v545_v59  ;;  %v398_v60 = vpop.f32.mrf.mxu2  ;;  %v321_v2 = vpop.f32.mrf.mxu0 }
  0xd5   :  { %v438_v62 = vpop.f32.mrf.mxu3  ;;  %v399_v0 = vadd.f32 %v949_v33, %v398_v60  ;;  %v361_v4 = vpop.f32.mrf.mxu1  ;;  %v322_v6 = vadd.f32 %v949_v33, %v321_v2 }
  0xd6   :  { %v439_v1 = vadd.f32 %v949_v33, %v438_v62  ;;  %v362_v7 = vadd.f32 %v949_v33, %v361_v4  ;;  %v501_v62 = vld [vmem:[%s1466_s1 + $0x168] sm:$0xff]  ;;  %v470_v4 = vld [vmem:[%s1466_s1 + $0x70] sm:$0xff] }
  0xd7   :  { %v561_v8 = vadd.f32 %v497_v61, %v399_v0  ;;  %v530_v10 = vadd.f32 %v466_v3, %v322_v6  ;;  %v517_v0 = vld [vmem:[%s1466_s1 + $0x1e8] sm:$0xff]  ;;  %v486_v6 = vld [vmem:[%s1466_s1 + $0xf0] sm:$0xff] }
  0xd8   :  { %v577_v9 = vadd.f32 %v513_v63, %v439_v1  ;;  %v546_v11 = vadd.f32 %v482_v5, %v362_v7 }
  0xd9   :  { %626 = vst.msk [vmem:[%s1467_s4 + $0x148] sm:$0xff] %vm584_vm1, %v561_v8 }
  0xda   :  { %642 = vst.msk [vmem:[%s1467_s4 + $0x1c8] sm:$0xff] %vm584_vm1, %v577_v9 }
  0xdb   :  { %595 = vst.msk [vmem:[%s1467_s4 + $0x50] sm:$0xff] %vm584_vm1, %v530_v10 }
  0xdc   :  { %611 = vst.msk [vmem:[%s1467_s4 + $0xd0] sm:$0xff] %vm584_vm1, %v546_v11  ;;  %v401_v12 = vpop.f32.mrf.mxu2  ;;  %v323_v18 = vpop.f32.mrf.mxu0 }
  0xdd   :  { %v441_v14 = vpop.f32.mrf.mxu3  ;;  %v402_v16 = vadd.f32 %v949_v33, %v401_v12  ;;  %v363_v20 = vpop.f32.mrf.mxu1  ;;  %v324_v22 = vadd.f32 %v949_v33, %v323_v18 }
  0xde   :  { %v442_v17 = vadd.f32 %v949_v33, %v441_v14  ;;  %v364_v23 = vadd.f32 %v949_v33, %v363_v20  ;;  %v502_v14 = vld [vmem:[%s1466_s1 + $0x170] sm:$0xff]  ;;  %v471_v20 = vld [vmem:[%s1466_s1 + $0x78] sm:$0xff] }
  0xdf   :  { %v562_v24 = vadd.f32 %v498_v13, %v402_v16  ;;  %v531_v26 = vadd.f32 %v467_v19, %v324_v22  ;;  %v518_v16 = vld [vmem:[%s1466_s1 + $0x1f0] sm:$0xff]  ;;  %v487_v22 = vld [vmem:[%s1466_s1 + $0xf8] sm:$0xff] }
  0xe0   :  { %v578_v25 = vadd.f32 %v514_v15, %v442_v17  ;;  %v547_v27 = vadd.f32 %v483_v21, %v364_v23 }
  0xe1   :  { %627 = vst.msk [vmem:[%s1467_s4 + $0x150] sm:$0xff] %vm584_vm1, %v562_v24 }
  0xe2   :  { %643 = vst.msk [vmem:[%s1467_s4 + $0x1d0] sm:$0xff] %vm584_vm1, %v578_v25 }
  0xe3   :  { %596 = vst.msk [vmem:[%s1467_s4 + $0x58] sm:$0xff] %vm584_vm1, %v531_v26 }
  0xe4   :  { %612 = vst.msk [vmem:[%s1467_s4 + $0xd8] sm:$0xff] %vm584_vm1, %v547_v27  ;;  %v403_v28 = vpop.f32.mrf.mxu2  ;;  %v326_v35 = vpop.f32.mrf.mxu0 }
  0xe5   :  { %v443_v30 = vpop.f32.mrf.mxu3  ;;  %v404_v32 = vadd.f32 %v949_v33, %v403_v28  ;;  %v366_v37 = vpop.f32.mrf.mxu1  ;;  %v327_v39 = vadd.f32 %v949_v33, %v326_v35 }
  0xe6   :  { %v444_v34 = vadd.f32 %v949_v33, %v443_v30  ;;  %v367_v40 = vadd.f32 %v949_v33, %v366_v37  ;;  %v503_v30 = vld [vmem:[%s1466_s1 + $0x178] sm:$0xff] }
  0xe7   :  { %v563_v41 = vadd.f32 %v499_v29, %v404_v32  ;;  %v532_v43 = vadd.f32 %v468_v36, %v327_v39  ;;  %v519_v32 = vld [vmem:[%s1466_s1 + $0x1f8] sm:$0xff] }
  0xe8   :  { %v579_v42 = vadd.f32 %v515_v31, %v444_v34  ;;  %v548_v44 = vadd.f32 %v484_v38, %v367_v40 }
  0xe9   :  { %628 = vst.msk [vmem:[%s1467_s4 + $0x158] sm:$0xff] %vm584_vm1, %v563_v41 }
  0xea   :  { %644 = vst.msk [vmem:[%s1467_s4 + $0x1d8] sm:$0xff] %vm584_vm1, %v579_v42 }
  0xeb   :  { %597 = vst.msk [vmem:[%s1467_s4 + $0x60] sm:$0xff] %vm584_vm1, %v532_v43 }
  0xec   :  { %613 = vst.msk [vmem:[%s1467_s4 + $0xe0] sm:$0xff] %vm584_vm1, %v548_v44  ;;  %v406_v45 = vpop.f32.mrf.mxu2  ;;  %v328_v51 = vpop.f32.mrf.mxu0 }
  0xed   :  { %v446_v47 = vpop.f32.mrf.mxu3  ;;  %v407_v49 = vadd.f32 %v949_v33, %v406_v45  ;;  %v368_v53 = vpop.f32.mrf.mxu1  ;;  %v329_v55 = vadd.f32 %v949_v33, %v328_v51 }
  0xee   :  { %v447_v50 = vadd.f32 %v949_v33, %v446_v47  ;;  %v369_v56 = vadd.f32 %v949_v33, %v368_v53 }
  0xef   :  { %v564_v57 = vadd.f32 %v500_v46, %v407_v49  ;;  %v533_v59 = vadd.f32 %v469_v52, %v329_v55 }
  0xf0   :  { %v580_v58 = vadd.f32 %v516_v48, %v447_v50  ;;  %v549_v60 = vadd.f32 %v485_v54, %v369_v56 }
  0xf1   :  { %629 = vst.msk [vmem:[%s1467_s4 + $0x160] sm:$0xff] %vm584_vm1, %v564_v57 }
  0xf2   :  { %645 = vst.msk [vmem:[%s1467_s4 + $0x1e0] sm:$0xff] %vm584_vm1, %v580_v58 }
  0xf3   :  { %598 = vst.msk [vmem:[%s1467_s4 + $0x68] sm:$0xff] %vm584_vm1, %v533_v59 }
  0xf4   :  { %614 = vst.msk [vmem:[%s1467_s4 + $0xe8] sm:$0xff] %vm584_vm1, %v549_v60  ;;  %v408_v61 = vpop.f32.mrf.mxu2  ;;  %v331_v3 = vpop.f32.mrf.mxu0 }
  0xf5   :  { %v448_v63 = vpop.f32.mrf.mxu3  ;;  %v409_v1 = vadd.f32 %v949_v33, %v408_v61  ;;  %v371_v5 = vpop.f32.mrf.mxu1  ;;  %v332_v7 = vadd.f32 %v949_v33, %v331_v3 }
  0xf6   :  { %v449_v2 = vadd.f32 %v949_v33, %v448_v63  ;;  %v372_v8 = vadd.f32 %v949_v33, %v371_v5 }
  0xf7   :  { %v565_v9 = vadd.f32 %v501_v62, %v409_v1  ;;  %v534_v11 = vadd.f32 %v470_v4, %v332_v7 }
  0xf8   :  { %v581_v10 = vadd.f32 %v517_v0, %v449_v2  ;;  %v550_v12 = vadd.f32 %v486_v6, %v372_v8 }
  0xf9   :  { %630 = vst.msk [vmem:[%s1467_s4 + $0x168] sm:$0xff] %vm584_vm1, %v565_v9 }
  0xfa   :  { %646 = vst.msk [vmem:[%s1467_s4 + $0x1e8] sm:$0xff] %vm584_vm1, %v581_v10 }
  0xfb   :  { %599 = vst.msk [vmem:[%s1467_s4 + $0x70] sm:$0xff] %vm584_vm1, %v534_v11 }
  0xfc   :  { %615 = vst.msk [vmem:[%s1467_s4 + $0xf0] sm:$0xff] %vm584_vm1, %v550_v12  ;;  %v411_v13 = vpop.f32.mrf.mxu2  ;;  %v333_v19 = vpop.f32.mrf.mxu0 }
  0xfd   :  { %v451_v15 = vpop.f32.mrf.mxu3  ;;  %v412_v17 = vadd.f32 %v949_v33, %v411_v13  ;;  %v373_v21 = vpop.f32.mrf.mxu1  ;;  %v334_v23 = vadd.f32 %v949_v33, %v333_v19 }
  0xfe   :  { %v452_v18 = vadd.f32 %v949_v33, %v451_v15  ;;  %v374_v24 = vadd.f32 %v949_v33, %v373_v21 }
  0xff   :  { %v566_v25 = vadd.f32 %v502_v14, %v412_v17  ;;  %v535_v27 = vadd.f32 %v471_v20, %v334_v23 }
 0x100   :  { %v582_v26 = vadd.f32 %v518_v16, %v452_v18  ;;  %v551_v28 = vadd.f32 %v487_v22, %v374_v24 }
 0x101   :  { %631 = vst.msk [vmem:[%s1467_s4 + $0x170] sm:$0xff] %vm584_vm1, %v566_v25 }
 0x102   :  { %647 = vst.msk [vmem:[%s1467_s4 + $0x1f0] sm:$0xff] %vm584_vm1, %v582_v26 }
 0x103   :  { %600 = vst.msk [vmem:[%s1467_s4 + $0x78] sm:$0xff] %vm584_vm1, %v535_v27 }
 0x104   :  { %616 = vst.msk [vmem:[%s1467_s4 + $0xf8] sm:$0xff] %vm584_vm1, %v551_v28  ;;  %v413_v29 = vpop.f32.mrf.mxu2 }
 0x105   :  { %v453_v31 = vpop.f32.mrf.mxu3  ;;  %v414_v34 = vadd.f32 %v949_v33, %v413_v29 }
 0x106   :  { %v454_v35 = vadd.f32 %v949_v33, %v453_v31 }
 0x107   :  { %v567_v36 = vadd.f32 %v503_v30, %v414_v34 }
 0x108   :  { %v583_v37 = vadd.f32 %v519_v32, %v454_v35 }
 0x109   :  { %632 = vst.msk [vmem:[%s1467_s4 + $0x178] sm:$0xff] %vm584_vm1, %v567_v36 }
 0x10a   :  { %648 = vst.msk [vmem:[%s1467_s4 + $0x1f8] sm:$0xff] %vm584_vm1, %v583_v37 }

// kernel: decoder_forward.11
= control target key start
LH: loop header
LB: loop body
LE: loop exit
PB: predicated region body
PF: predicated region fallthrough
CT: control target
= control target key end

     0   :  { %s2981_s12 = smov 0   ;;  %s4102_s0 = inlined_call_operand.vmem [shape: f32[2,342,32], index: 0, kind: input, shape index: {}]   ;;  %s4103_s1 = inlined_call_operand.vmem [shape: bf16[9,32,16], index: 1, kind: input, shape index: {}]   ;;  %s4104_s2 = inlined_call_operand.vmem [shape: f32[1,16], index: 2, kind: input, shape index: {}]   ;;  %s4105_s3 = inlined_call_operand.vmem [shape: f32[2,288,16], index: 3, kind: output, shape index: {}]  }
   0x1 LB: > { %s2643_s13 = sadd.s32 4294967295, %s2959_s12   ;;  %p2647_p0 = scmp.ge.s32.totalorder %s2959_s12, 1  ;;  %s2959_s12 = sphi %s2981_s12, %s13_s12  }
   0x2   : > { %p137_p1 = scmp.lt.s32.totalorder %s2959_s12, 3 }
   0x4   : > { %p138_p2 = pnand %p2647_p0, %p137_p1 }
   0x6   : > { %141 = sbr.rel (%p138_p2) target bundleno = 824 (0x338), region = 32 }
   0xb   : > { %v2921_v0 = vld [vmem:[%s4103_s1 + $0x18] sm:$0xff]  ;;  %p161_p3 = scmp.lt.s32.totalorder %s2643_s13, 1  ;;  %v2920_v1 = vld [vmem:[%s4103_s1 + $0x10] sm:$0xff]  ;;  %v2923_v2 = vld [vmem:[%s4103_s1 + $0x28] sm:$0xff]  ;;  %vm397_vm0 = vsmask.f32 7424 }
   0xc   : > { %2936 = vmatpush.bf16.msra.mxu1 %v2921_v0  ;;  %2937 = vmatpush.bf16.msra.mxu2 %v2921_v0  ;;  %v2919_v3 = vld [vmem:[%s4103_s1 + $0x8] sm:$0xff]  ;;  %vm558_vm1 = vcmask 261120   ;;  %vm864_vm2 = vcmask 1046528   ;;  %vm1276_vm3 = vsmask.f32 6400  ;;  %vm1568_vm5 = vcmask 1045504  }
   0xd   : > { %s4277_s13 = smov (!%p161_p3, %s2643_s13), 1  ;;  %619 = vmatpush.bf16.msra.mxu0 %v2921_v0  ;;  %2938 = vmatpush.bf16.msra.mxu3 %v2921_v0  ;;  %v2927_v4 = vld [vmem:[%s4103_s1 + $0x48] sm:$0xff]  ;;  %vm1980_vm4 = vsmask.f32 5376  ;;  %vm2272_vm6 = vcmask 1044480   ;;  %vm2551_vm7 = vcmask 130048  }
   0xe   : > { %s2942_s20 = smul.u32 344, %s4277_s13 }
   0xf   : > { %s2943_s30 = smul.u32 288, %s4277_s13 }
  0x10   : > { %2939 = vmatpush.bf16.msra.mxu1 %v2920_v1  ;;  %2940 = vmatpush.bf16.msra.mxu2 %v2920_v1  ;;  %s3010_s27 = scalar_lea.vmem %s4102_s0, %s2942_s20 }
  0x11   : > { %620 = vmatpush.bf16.msra.mxu0 %v2920_v1  ;;  %v182_v5 = vld [vmem:[%s3010_s27 + $0x50] sm:$0xff]  ;;  %v183_v6 = vld [vmem:[%s3010_s27 + $0x58] sm:$0xff]  ;;  %v184_v7 = vld [vmem:[%s3010_s27 + $0x60] sm:$0xff]  ;;  %2941 = vmatpush.bf16.msra.mxu3 %v2920_v1  ;;  %s3843_s8 = scalar_lea.vmem %s4105_s3, %s2943_s30 }
  0x12   : > { %v185_v8 = vld [vmem:[%s3010_s27 + $0x68] sm:$0xff]  ;;  %v223_v9 = vmax.f32 %v182_v5, 0.0  ;;  %v224_v10 = vmax.f32 %v183_v6, 0.0  ;;  %v225_v11 = vmax.f32 %v184_v7, 0.0  ;;  %v192_v12 = vld [vmem:[%s3010_s27 + $0xa0] sm:$0xff]  ;;  %v194_v15 = vld [vmem:[%s3010_s27 + $0xb0] sm:$0xff] }
  0x13   : > { %v193_v13 = vld [vmem:[%s3010_s27 + $0xa8] sm:$0xff]  ;;  %v226_v14 = vmax.f32 %v185_v8, 0.0  ;;  %v195_v16 = vld [vmem:[%s3010_s27 + $0xb8] sm:$0xff]  ;;  %v233_v17 = vmax.f32 %v192_v12, 0.0  ;;  %v235_v22 = vmax.f32 %v194_v15, 0.0  ;;  %v172_v27 = vld [vmem:[%s3010_s27] sm:$0xff] }
  0x14   : > { %974 = vmatpush.bf16.msrb.mxu2 %v2923_v2  ;;  %766 = vmatpush.bf16.msrb.mxu1 %v2919_v3  ;;  %v234_v18 = vmax.f32 %v193_v13, 0.0  ;;  %v264_v19 = vpack.c.bf16 %v223_v9, %v223_v9  ;;  %v265_v20 = vpack.c.bf16 %v224_v10, %v224_v10  ;;  %v266_v21 = vpack.c.bf16 %v225_v11, %v225_v11  ;;  %v173_v28 = vld [vmem:[%s3010_s27 + $0x8] sm:$0xff]  ;;  %v174_v33 = vld [vmem:[%s3010_s27 + $0x10] sm:$0xff]  ;;  %v175_v38 = vld [vmem:[%s3010_s27 + $0x18] sm:$0xff] }
  0x15   : > { %1434 = vmatpush.bf16.msrb.mxu0 %v2927_v4  ;;  %v267_v23 = vpack.c.bf16 %v226_v14, %v226_v14  ;;  %v236_v24 = vmax.f32 %v195_v16, 0.0  ;;  %v274_v25 = vpack.c.bf16 %v233_v17, %v233_v17  ;;  %v276_v32 = vpack.c.bf16 %v235_v22, %v235_v22  ;;  %v186_v59 = vld [vmem:[%s3010_s27 + $0x70] sm:$0xff]  ;;  %v187_v60 = vld [vmem:[%s3010_s27 + $0x78] sm:$0xff]  ;;  %v196_v5 = vld [vmem:[%s3010_s27 + $0xc0] sm:$0xff] }
  0x16   : > { %v275_v26 = vpack.c.bf16 %v234_v18, %v234_v18  ;;  %v351_v29 = vunpack.c.l.b16 %v264_v19  ;;  %v352_v30 = vunpack.c.l.b16 %v265_v20  ;;  %v353_v31 = vunpack.c.l.b16 %v266_v21  ;;  %v197_v13 = vld [vmem:[%s3010_s27 + $0xc8] sm:$0xff]  ;;  %v176_v18 = vld [vmem:[%s3010_s27 + $0x20] sm:$0xff] }
  0x17   : > { %v354_v34 = vunpack.c.l.b16 %v267_v23  ;;  %v277_v35 = vpack.c.bf16 %v236_v24, %v236_v24  ;;  %v361_v36 = vunpack.c.l.b16 %v274_v25  ;;  %v363_v40 = vunpack.c.l.b16 %v276_v32  ;;  %v177_v23 = vld [vmem:[%s3010_s27 + $0x28] sm:$0xff]  ;;  %v202_v32 = vld [vmem:[%s3010_s27 + $0xf0] sm:$0xff] }
  0x18   : > { %v362_v37 = vunpack.c.l.b16 %v275_v26  ;;  %v3024_v39 = vpack.c.b16 %v352_v30, %v351_v29  ;;  %v213_v41 = vmax.f32 %v172_v27, 0.0  ;;  %v214_v42 = vmax.f32 %v173_v28, 0.0 }
  0x19   : > { %v3026_v43 = vpack.c.b16 %v354_v34, %v353_v31  ;;  %v364_v44 = vunpack.c.l.b16 %v277_v35  ;;  %v215_v46 = vmax.f32 %v174_v33, 0.0  ;;  %v216_v49 = vmax.f32 %v175_v38, 0.0 }
  0x1a   : > { %4148 = vst [vmem:[#allocation2_spill] sm:$0xff] %v3024_v39  ;;  %v3028_v45 = vpack.c.b16 %v362_v37, %v361_v36  ;;  %v3031_v47 = vshll.u32 %v3024_v39, 16  ;;  %v3034_v48 = vshrl.u32 %v3024_v39, 16  ;;  %v254_v50 = vpack.c.bf16 %v213_v41, %v213_v41  ;;  %v203_v37 = vld [vmem:[%s3010_s27 + $0xf8] sm:$0xff] }
  0x1b   : > { %4149 = vst [vmem:[#allocation3_spill] sm:$0xff] %v3026_v43  ;;  %v3037_v51 = vshll.u32 %v3026_v43, 16  ;;  %v3039_v52 = vpack.c.b16 %v364_v44, %v363_v40  ;;  %v255_v56 = vpack.c.bf16 %v214_v42, %v214_v42  ;;  %v256_v57 = vpack.c.bf16 %v215_v46, %v215_v46  ;;  %v204_v42 = vld [vmem:[%s3010_s27 + $0x100] sm:$0xff] }
  0x1c   : > { %4150 = vst [vmem:[#allocation4_spill] sm:$0xff] %v3031_v47  ;;  %v3042_v53 = vshll.u32 %v3028_v45, 16  ;;  %v3045_v54 = vshrl.u32 %v3028_v45, 16  ;;  %v4109_v55 = vrot.slane %v3031_v47, 1  ;;  %v257_v58 = vpack.c.bf16 %v216_v49, %v216_v49 }
  0x1d   : > { %4151 = vst [vmem:[#allocation5_spill] sm:$0xff] %v3034_v48  ;;  %v448_v61 = vrot.slane %v3037_v51, 1  ;;  %v3053_v63 = vshll.u32 %v3039_v52, 16  ;;  %v341_v0 = vunpack.c.l.b16 %v254_v50  ;;  %v342_v2 = vunpack.c.l.b16 %v255_v56  ;;  %v205_v50 = vld [vmem:[%s3010_s27 + $0x108] sm:$0xff] }
  0x1e   : > { %4152 = vst [vmem:[#allocation6_spill] sm:$0xff] %v3037_v51  ;;  %v480_v62 = vrot.slane %v3042_v53, 1  ;;  %v444_v1 = vor.u32 %v3034_v48, %v4109_v55  ;;  %v343_v3 = vunpack.c.l.b16 %v256_v57  ;;  %v344_v4 = vunpack.c.l.b16 %v257_v58  ;;  %v188_v57 = vld [vmem:[%s3010_s27 + $0x80] sm:$0xff] }
  0x1f   : > { %4153 = vst [vmem:[#allocation7_spill] sm:$0xff] %v3042_v53  ;;  %v488_v7 = vrot.slane %v3053_v63, 1  ;;  %v227_v8 = vmax.f32 %v186_v59, 0.0  ;;  %v228_v9 = vmax.f32 %v187_v60, 0.0  ;;  %v3064_v11 = vpack.c.b16 %v342_v2, %v341_v0 }
  0x20   : > { %4154 = vst [vmem:[#allocation8_spill] sm:$0xff] %v3045_v54  ;;  %v484_v6 = vor.u32 %v3045_v54, %v480_v62  ;;  %v449_v10 = vsel %vm397_vm0, %v444_v1, %v448_v61  ;;  %v3066_v12 = vpack.c.b16 %v344_v4, %v343_v3  ;;  %v237_v17 = vmax.f32 %v196_v5, 0.0  ;;  %v189_v1 = vld [vmem:[%s3010_s27 + $0x88] sm:$0xff]  ;;  %v2925_v5 = vld [vmem:[%s4103_s1 + $0x38] sm:$0xff] }
  0x21   : > { %2667 = vmatmul.msk.bf16.vlgmr.msra.gmra.mxu1 %vm558_vm1, %v449_v10  ;;  %v268_v15 = vpack.c.bf16 %v227_v8, %v227_v8  ;;  %v269_v16 = vpack.c.bf16 %v228_v9, %v228_v9  ;;  %v399_v19 = vshrl.u32 %v3064_v11, 16  ;;  %v401_v20 = vshll.u32 %v3064_v11, 16  ;;  %1142 = vmatpush.bf16.msrb.mxu3 %v2925_v5 }
  0x22   : > { %4155 = vst [vmem:[#allocation9_spill] sm:$0xff] %v3066_v12  ;;  %v489_v14 = vsel %vm397_vm0, %v484_v6, %v488_v7  ;;  %v4106_v21 = vshll.u32 %v3066_v12, 16  ;;  %v3077_v22 = vshrl.u32 %v3026_v43, 16  ;;  %v238_v26 = vmax.f32 %v197_v13, 0.0  ;;  %v2922_v6 = vld [vmem:[%s4103_s1 + $0x20] sm:$0xff] }
  0x23   : > { %2672 = vmatmul.msk.bf16.vlgmr.msra.gmra.mxu2 %vm558_vm1, %v489_v14  ;;  %v355_v24 = vunpack.c.l.b16 %v268_v15  ;;  %v356_v25 = vunpack.c.l.b16 %v269_v16  ;;  %v278_v27 = vpack.c.bf16 %v237_v17, %v237_v17  ;;  %v403_v28 = vrot.slane %v401_v20, 1 }
  0x24   : > { %4156 = vst [vmem:[#allocation10_spill] sm:$0xff] %v3077_v22  ;;  %v3082_v29 = vrot.slane %v4106_v21, 1  ;;  %v3085_v30 = vshrl.u32 %v3039_v52, 16  ;;  %v217_v31 = vmax.f32 %v176_v18, 0.0  ;;  %v279_v34 = vpack.c.bf16 %v238_v26, %v238_v26  ;;  %975 = vmatpush.bf16.msrb.mxu2 %v2922_v6 }
  0x25   : > { %v3088_v33 = vpack.c.b16 %v356_v25, %v355_v24  ;;  %v365_v35 = vunpack.c.l.b16 %v278_v27  ;;  %v218_v36 = vmax.f32 %v177_v23, 0.0  ;;  %v404_v38 = vor.u32 %v403_v28, %v399_v19  ;;  %v198_v24 = vld [vmem:[%s3010_s27 + $0xd0] sm:$0xff] }
  0x26   : > { %v452_v40 = vor.u32 %v3077_v22, %v448_v61  ;;  %v258_v41 = vpack.c.bf16 %v217_v31, %v217_v31  ;;  %v366_v46 = vunpack.c.l.b16 %v279_v34  ;;  %v243_v56 = vmax.f32 %v202_v32, 0.0 }
  0x27   : > { %4157 = vst [vmem:[#allocation11_spill] sm:$0xff] %v3088_v33  ;;  %v3094_v44 = vshll.u32 %v3088_v33, 16  ;;  %v259_v49 = vpack.c.bf16 %v218_v36, %v218_v36  ;;  %v409_v58 = vsel %vm397_vm0, %v404_v38, %v3082_v29  ;;  %v492_v59 = vor.u32 %v3085_v30, %v488_v7  ;;  %v2918_v7 = vld [vmem:[%s4103_s1] sm:$0xff]  ;;  %v199_v36 = vld [vmem:[%s3010_s27 + $0xd8] sm:$0xff] }
  0x28   : > { %v345_v60 = vunpack.c.l.b16 %v258_v41  ;;  %v244_v0 = vmax.f32 %v203_v37, 0.0  ;;  %2662 = vmatmul.msk.bf16.vlgmr.msra.gmra.mxu0 %vm558_vm1, %v409_v58  ;;  %v3104_v2 = vpack.c.b16 %v366_v46, %v365_v35  ;;  %v245_v4 = vmax.f32 %v204_v42, 0.0  ;;  %767 = vmatpush.bf16.msrb.mxu1 %v2918_v7 }
  0x29   : > { %4158 = vst [vmem:[#allocation12_spill] sm:$0xff] %v3094_v44  ;;  %v456_v61 = vrot.slane %v3094_v44, 1  ;;  %v346_v3 = vunpack.c.l.b16 %v259_v49  ;;  %v246_v8 = vmax.f32 %v205_v50, 0.0  ;;  %v284_v9 = vpack.c.bf16 %v243_v56, %v243_v56  ;;  %v178_v50 = vld [vmem:[%s3010_s27 + $0x30] sm:$0xff]  ;;  %v179_v56 = vld [vmem:[%s3010_s27 + $0x38] sm:$0xff] }
  0x2a   : > { %v285_v10 = vpack.c.bf16 %v244_v0, %v244_v0  ;;  %v229_v13 = vmax.f32 %v188_v57, 0.0  ;;  %v3116_v14 = vshll.u32 %v3104_v2, 16  ;;  %v4107_v16 = vshrl.u32 %v3066_v12, 16 }
  0x2b   : > { %v3118_v15 = vpack.c.b16 %v346_v3, %v345_v60  ;;  %v286_v17 = vpack.c.bf16 %v245_v4, %v245_v4  ;;  %v287_v18 = vpack.c.bf16 %v246_v8, %v246_v8  ;;  %v371_v19 = vunpack.c.l.b16 %v284_v9  ;;  %v207_v8 = vld [vmem:[%s3010_s27 + $0x118] sm:$0xff] }
  0x2c   : > { %v372_v20 = vunpack.c.l.b16 %v285_v10  ;;  %v230_v23 = vmax.f32 %v189_v1, 0.0  ;;  %v457_v25 = vsel %vm397_vm0, %v452_v40, %v456_v61  ;;  %v496_v26 = vrot.slane %v3116_v14, 1 }
  0x2d   : > { %4159 = vst [vmem:[#allocation13_spill] sm:$0xff] %v3118_v15  ;;  %v373_v27 = vunpack.c.l.b16 %v286_v17  ;;  %v270_v28 = vpack.c.bf16 %v229_v13, %v229_v13  ;;  %v3127_v31 = vshll.u32 %v3118_v15, 16  ;;  %v374_v32 = vunpack.c.l.b16 %v287_v18 }
  0x2e   : > { %v3129_v34 = vpack.c.b16 %v372_v20, %v371_v19  ;;  %v271_v35 = vpack.c.bf16 %v230_v23, %v230_v23  ;;  %v497_v37 = vsel %vm397_vm0, %v492_v59, %v496_v26  ;;  %v239_v40 = vmax.f32 %v198_v24, 0.0 }
  0x2f   : > { %v357_v38 = vunpack.c.l.b16 %v270_v28  ;;  %v3135_v41 = vpack.c.b16 %v374_v32, %v373_v27  ;;  %v412_v57 = vor.u32 %v4107_v16, %v3082_v29  ;;  %v240_v58 = vmax.f32 %v199_v36, 0.0  ;;  %v206_v29 = vld [vmem:[%s3010_s27 + $0x110] sm:$0xff]  ;;  %v191_v32 = vld [vmem:[%s3010_s27 + $0x98] sm:$0xff] }
  0x30   : > { %v3138_v42 = vshll.u32 %v3129_v34, 16  ;;  %v3141_v46 = vshrl.u32 %v3129_v34, 16  ;;  %v358_v49 = vunpack.c.l.b16 %v271_v35  ;;  %v280_v59 = vpack.c.bf16 %v239_v40, %v239_v40  ;;  %v190_v28 = vld [vmem:[%s3010_s27 + $0x90] sm:$0xff] }
  0x31   : > { %2668 = vmatmul.msk.bf16.gmra.mxu1 %vm558_vm1, %v457_v25  ;;  %v416_v60 = vrot.slane %v3127_v31, 1  ;;  %v3153_v1 = vshll.u32 %v3135_v41, 16  ;;  %v281_v4 = vpack.c.bf16 %v240_v58, %v240_v58  ;;  %v219_v6 = vmax.f32 %v178_v50, 0.0 }
  0x32   : > { %v4108_v0 = vrot.slane %v3138_v42, 1  ;;  %v3155_v3 = vpack.c.b16 %v358_v49, %v357_v38  ;;  %v367_v5 = vunpack.c.l.b16 %v280_v59  ;;  %v220_v7 = vmax.f32 %v179_v56, 0.0  ;;  %v200_v56 = vld [vmem:[%s3010_s27 + $0xe0] sm:$0xff] }
  0x33   : > { %2673 = vmatmul.msk.bf16.gmra.mxu2 %vm558_vm1, %v497_v37  ;;  %4160 = vst [vmem:[#allocation14_spill] sm:$0xff] %v3153_v1  ;;  %v528_v10 = vrot.slane %v3153_v1, 1  ;;  %v3164_v13 = vshrl.u32 %v3088_v33, 16  ;;  %v368_v18 = vunpack.c.l.b16 %v281_v4  ;;  %v260_v19 = vpack.c.bf16 %v219_v6, %v219_v6  ;;  %v2926_v6 = vld [vmem:[%s4103_s1 + $0x40] sm:$0xff] }
  0x34   : > { %4161 = vst [vmem:[#allocation15_spill] sm:$0xff] %v3155_v3  ;;  %v524_v9 = vor.u32 %v3141_v46, %v4108_v0  ;;  %v3167_v17 = vshll.u32 %v3155_v3, 16  ;;  %v261_v20 = vpack.c.bf16 %v220_v7, %v220_v7  ;;  %v417_v23 = vsel %vm397_vm0, %v412_v57, %v416_v60  ;;  %v201_v57 = vld [vmem:[%s3010_s27 + $0xe8] sm:$0xff]  ;;  %1435 = vmatpush.bf16.msrb.mxu0 %v2926_v6 }
  0x35   : > { %4162 = vst [vmem:[#allocation16_spill] sm:$0xff] %v3164_v13  ;;  %v247_v25 = vmax.f32 %v206_v29, 0.0  ;;  %v248_v27 = vmax.f32 %v207_v8, 0.0  ;;  %v3176_v35 = vpack.c.b16 %v368_v18, %v367_v5  ;;  %v3179_v36 = vshrl.u32 %v3104_v2, 16 }
  0x36   : > { %4163 = vst [vmem:[#allocation17_spill] sm:$0xff] %v3167_v17  ;;  %v529_v24 = vsel %vm397_vm0, %v524_v9, %v528_v10  ;;  %v347_v37 = vunpack.c.l.b16 %v260_v19  ;;  %v348_v38 = vunpack.c.l.b16 %v261_v20  ;;  %v460_v40 = vor.u32 %v3164_v13, %v456_v61  ;;  %v2924_v61 = vld [vmem:[%s4103_s1 + $0x30] sm:$0xff] }
  0x37   : > { %2677 = vmatmul.msk.bf16.vlgmr.msra.gmra.mxu3 %vm558_vm1, %v529_v24  ;;  %v288_v49 = vpack.c.bf16 %v247_v25, %v247_v25  ;;  %v289_v50 = vpack.c.bf16 %v248_v27, %v248_v27  ;;  %v464_v58 = vrot.slane %v3167_v17, 1  ;;  %v3189_v59 = vshll.u32 %v3176_v35, 16 }
  0x38   : > { %2663 = vmatmul.msk.bf16.gmra.mxu0 %vm558_vm1, %v417_v23  ;;  %v231_v4 = vmax.f32 %v190_v28, 0.0  ;;  %v232_v5 = vmax.f32 %v191_v32, 0.0  ;;  %v3197_v7 = vpack.c.b16 %v348_v38, %v347_v37  ;;  %v500_v9 = vor.u32 %v3179_v36, %v496_v26  ;;  %1143 = vmatpush.bf16.msrb.mxu3 %v2924_v61  ;;  %v180_v28 = vld [vmem:[%s3010_s27 + $0x40] sm:$0xff]  ;;  %v181_v32 = vld [vmem:[%s3010_s27 + $0x48] sm:$0xff] }
  0x39   : > { %v375_v29 = vunpack.c.l.b16 %v288_v49  ;;  %v376_v8 = vunpack.c.l.b16 %v289_v50  ;;  %v504_v18 = vrot.slane %v3189_v59, 1  ;;  %v3206_v24 = vshrl.u32 %v3135_v41, 16 }
  0x3a   : > { %4164 = vst [vmem:[#allocation18_spill] sm:$0xff] %v3197_v7  ;;  %v272_v19 = vpack.c.bf16 %v231_v4, %v231_v4  ;;  %v273_v20 = vpack.c.bf16 %v232_v5, %v232_v5  ;;  %v241_v25 = vmax.f32 %v200_v56, 0.0  ;;  %v242_v27 = vmax.f32 %v201_v57, 0.0 }
  0x3b   : > { %v3203_v23 = vpack.c.b16 %v376_v8, %v375_v29  ;;  %v465_v26 = vsel %vm397_vm0, %v460_v40, %v464_v58  ;;  %v3214_v37 = vshrl.u32 %v3118_v15, 16  ;;  %v3217_v50 = vshll.u32 %v3197_v7, 16  ;;  %v208_v40 = vld [vmem:[%s3010_s27 + $0x120] sm:$0xff] }
  0x3c   : > { %v359_v38 = vunpack.c.l.b16 %v272_v19  ;;  %v360_v49 = vunpack.c.l.b16 %v273_v20  ;;  %v282_v56 = vpack.c.bf16 %v241_v25, %v241_v25  ;;  %v283_v5 = vpack.c.bf16 %v242_v27, %v242_v27 }
  0x3d   : > { %v3220_v4 = vshll.u32 %v3203_v23, 16  ;;  %v505_v57 = vsel %vm397_vm0, %v500_v9, %v504_v18  ;;  %v221_v61 = vmax.f32 %v180_v28, 0.0  ;;  %v222_v29 = vmax.f32 %v181_v32, 0.0 }
  0x3e   : > { %v3223_v6 = vpack.c.b16 %v360_v49, %v359_v38  ;;  %v532_v8 = vor.u32 %v3206_v24, %v528_v10  ;;  %v369_v20 = vunpack.c.l.b16 %v282_v56  ;;  %v370_v21 = vunpack.c.l.b16 %v283_v5 }
  0x3f   : > { %4165 = vst [vmem:[#allocation19_spill] sm:$0xff] %v3220_v4  ;;  %v536_v19 = vrot.slane %v3220_v4, 1  ;;  %v262_v25 = vpack.c.bf16 %v221_v61, %v221_v61  ;;  %v263_v27 = vpack.c.bf16 %v222_v29, %v222_v29  ;;  %v420_v9 = vor.u32 %v3214_v37, %v416_v60 }
  0x40   : > { %v3230_v16 = vshll.u32 %v3223_v6, 16  ;;  %v424_v28 = vrot.slane %v3217_v50, 1  ;;  %v249_v10 = vmax.f32 %v208_v40, 0.0  ;;  %v3237_v32 = vpack.c.b16 %v370_v21, %v369_v20 }
  0x41   : > { %2669 = vmatmul.msk.bf16.gmra.mxu1 %vm558_vm1, %v465_v26  ;;  %v349_v38 = vunpack.c.l.b16 %v262_v25  ;;  %v350_v49 = vunpack.c.l.b16 %v263_v27  ;;  %v537_v26 = vsel %vm397_vm0, %v532_v8, %v536_v19  ;;  %v3248_v60 = vshrl.u32 %v3155_v3, 16 }
  0x42   : > { %4166 = vst [vmem:[#allocation20_spill] sm:$0xff] %v3230_v16  ;;  %v290_v56 = vpack.c.bf16 %v249_v10, %v249_v10  ;;  %v472_v5 = vrot.slane %v3230_v16, 1  ;;  %v425_v29 = vsel %vm397_vm0, %v420_v9, %v424_v28  ;;  %v3251_v21 = vshrl.u32 %v3176_v35, 16 }
  0x43   : > { %2674 = vmatmul.msk.bf16.gmra.mxu2 %vm558_vm1, %v505_v57  ;;  %v3241_v61 = vpack.c.b16 %v350_v49, %v349_v38  ;;  %v3244_v57 = vshrl.u32 %v3223_v6, 16  ;;  %4169 = vst [vmem:[#allocation23_spill] sm:$0xff] %v3248_v60  ;;  %v3257_v8 = vshll.u32 %v3237_v32, 16  ;;  %v468_v49 = vor.u32 %v3248_v60, %v464_v58 }
  0x44   : > { %v3253_v40 = vunpack.c.l.b16 %v290_v56  ;;  %v3282_v55 = vshrl.u32 %v3203_v23, 16  ;;  %v4174_v4 = vrot.slane %v3031_v47, 1 }
  0x45   : > { %4167 = vst [vmem:[#allocation21_spill] sm:$0xff] %v3241_v61  ;;  %v3260_v20 = vshll.u32 %v3241_v61, 16  ;;  %v476_v25 = vor.u32 %v3244_v57, %v472_v5  ;;  %v3264_v27 = vshrl.u32 %v3241_v61, 16  ;;  %v512_v56 = vrot.slane %v3257_v8, 1 }
  0x46   : > { %4168 = vst [vmem:[#allocation22_spill] sm:$0xff] %v3244_v57  ;;  %v3268_v9 = vpack.c.b16 %v3253_v40, %v3253_v40 }
  0x47   : > { %4170 = vst [vmem:[#allocation24_spill] sm:$0xff] %v3253_v40  ;;  %2678 = vmatmul.msk.bf16.gmra.mxu3 %vm558_vm1, %v537_v26  ;;  %v432_v10 = vrot.slane %v3260_v20, 1  ;;  %v481_v38 = vsel %vm397_vm0, %v476_v25, %v480_v62  ;;  %v508_v26 = vor.u32 %v3251_v21, %v504_v18  ;;  %v473_v62 = vsel %vm397_vm0, %v468_v49, %v472_v5  ;;  %v2929_v49 = vld [vmem:[%s4103_s1 + $0x58] sm:$0xff] }
  0x48   : > { %4171 = vst [vmem:[#allocation25_spill] sm:$0xff] %v3260_v20  ;;  %2664 = vmatmul.msk.bf16.gmra.mxu0 %vm558_vm1, %v425_v29  ;;  %v542_v29 = vshll.u32 %v3268_v9, 16  ;;  %v3290_v25 = vshrl.u32 %v3197_v7, 16  ;;  %v540_v18 = vor.u32 %v3282_v55, %v536_v19  ;;  %v3304_v19 = vshrl.u32 %v3237_v32, 16  ;;  %1678 = vmatpush.bf16.msra.mxu1 %v2929_v49 }
  0x49   : > { %4172 = vst [vmem:[#allocation26_spill] sm:$0xff] %v3264_v27  ;;  %v436_v0 = vor.u32 %v3264_v27, %v432_v10  ;;  %v513_v58 = vsel %vm397_vm0, %v508_v26, %v512_v56 }
  0x4a   : > { %4173 = vst [vmem:[#allocation27_spill] sm:$0xff] %v3268_v9  ;;  %v544_v1 = vrot.slane %v542_v29, 1  ;;  %v428_v9 = vor.u32 %v3290_v25, %v424_v28  ;;  %v2933_v28 = vld [vmem:[%s4103_s1 + $0x78] sm:$0xff]  ;;  %v866_v29 = vrot.slane %v3066_v12, 1 }
  0x4b   : > { %v441_v40 = vsel %vm397_vm0, %v436_v0, %v4174_v4  ;;  %v2931_v0 = vld [vmem:[%s4103_s1 + $0x68] sm:$0xff]  ;;  %2138 = vmatpush.bf16.msra.mxu3 %v2933_v28  ;;  %v1280_v28 = vrot.slane %v3214_v37, 1 }
  0x4c   : > { %v545_v4 = vsel %vm397_vm0, %v540_v18, %v544_v1  ;;  %1846 = vmatpush.bf16.msra.mxu2 %v2931_v0  ;;  %v433_v5 = vsel %vm397_vm0, %v428_v9, %v432_v10  ;;  %v2935_v1 = vld [vmem:[%s4103_s1 + $0x88] sm:$0xff]  ;;  %v516_v9 = vor.u32 %v3304_v19, %v512_v56  ;;  %v4175_v10 = vrot.slane %v3138_v42, 1 }
  0x4d   : > { %2382 = vmatpush.bf16.msra.mxu0 %v2935_v1  ;;  %v865_v56 = vrot.slane %v3064_v11, 1  ;;  %v4176_v18 = vshrl.u32 %v3066_v12, 16  ;;  %v870_v1 = vrot.slane %v3197_v7, 1 }
  0x4e   : > { %v521_v26 = vsel %vm397_vm0, %v516_v9, %v4175_v10 }
  0x4f   : > { %v1277_v0 = vrot.slane %v4176_v18, 1  ;;  %v867_v49 = vsel %vm864_vm2, %v865_v56, %v866_v29  ;;  %v1285_v56 = vrot.slane %v3217_v50, 2  ;;  %v872_v18 = vrot.slane %v3241_v61, 1 }
  0x51   : > { %2670 = vmatmul.msk.bf16.gmra.mxu1 %vm558_vm1, %v473_v62  ;;  %v868_v62 = vrot.slane %v3118_v15, 1 }
  0x53   : > { %2675 = vmatmul.msk.bf16.gmra.mxu2 %vm558_vm1, %v513_v58  ;;  %v869_v58 = vsel %vm864_vm2, %v866_v29, %v868_v62  ;;  %v871_v10 = vsel %vm864_vm2, %v868_v62, %v870_v1  ;;  %v1284_v29 = vrot.slane %v3290_v25, 1  ;;  %v873_v62 = vsel %vm864_vm2, %v870_v1, %v872_v18 }
  0x57   : > { %2679 = vmatmul.msk.bf16.gmra.mxu3 %vm558_vm1, %v545_v4  ;;  %v4177_v4 = vshll.u32 %v3066_v12, 16 }
  0x58   : > { %2665 = vmatmul.msk.bf16.gmra.mxu0 %vm558_vm1, %v433_v5 }
  0x59   : > { %v1278_v5 = vrot.slane %v4177_v4, 2  ;;  %v1288_v4 = vrot.slane %v3264_v27, 1 }
  0x61   : > { %2671 = vmatmul.msk.bf16.gmra.mxu1 %vm558_vm1, %v481_v38  ;;  %v1281_v38 = vrot.slane %v3127_v31, 2 }
  0x63   : > { %2676 = vmatmul.msk.bf16.gmra.mxu2 %vm558_vm1, %v521_v26  ;;  %v1282_v9 = vor.u32 %v1281_v38, %v1280_v28  ;;  %v874_v28 = vrot.slane %v3024_v39, 1 }
  0x65   : > { %v875_v38 = vsel %vm864_vm2, %v872_v18, %v874_v28 }
  0x67   : > { %2748 = vmatmul.msk.bf16.vlgmr.msrb.gmra.mxu3 %vm558_vm1, %v869_v58 }
  0x68   : > { %2666 = vmatmul.msk.bf16.gmra.mxu0 %vm558_vm1, %v441_v40  ;;  %v1279_v40 = vor.u32 %v1278_v5, %v1277_v0  ;;  %v1289_v5 = vrot.slane %v3260_v20, 2 }
  0x6a   : > { %v1283_v26 = vsel %vm1276_vm3, %v1279_v40, %v1282_v9  ;;  %v1292_v40 = vrot.slane %v3034_v48, 1 }
  0x71   : > { %2688 = vmatmul.msk.bf16.vlgmr.msrb.gmra.mxu1 %vm558_vm1, %v3064_v11  ;;  %v1286_v11 = vor.u32 %v1285_v56, %v1284_v29 }
  0x73   : > { %2718 = vmatmul.msk.bf16.vlgmr.msrb.gmra.mxu2 %vm558_vm1, %v867_v49  ;;  %v1287_v0 = vsel %vm1276_vm3, %v1282_v9, %v1286_v11  ;;  %v1293_v9 = vrot.slane %v3031_v47, 2 }
  0x77   : > { %2749 = vmatmul.msk.bf16.gmra.mxu3 %vm558_vm1, %v871_v10 }
  0x78   : > { %2778 = vmatmul.msk.bf16.vlgmr.msrb.gmra.mxu0 %vm558_vm1, %v1283_v26  ;;  %v876_v26 = vrot.slane %v3026_v43, 1 }
  0x7a   : > { %v877_v29 = vsel %vm864_vm2, %v874_v28, %v876_v26  ;;  %v1296_v28 = vrot.slane %v3077_v22, 1 }
  0x81   : > { %2689 = vmatmul.msk.bf16.gmra.mxu1 %vm558_vm1, %v3066_v12 }
  0x83   : > { %2719 = vmatmul.msk.bf16.gmra.mxu2 %vm558_vm1, %v869_v58  ;;  %v1290_v58 = vor.u32 %v1289_v5, %v1288_v4 }
  0x85   : > { %v1291_v49 = vsel %vm1276_vm3, %v1286_v11, %v1290_v58 }
  0x87   : > { %2750 = vmatmul.msk.bf16.gmra.mxu3 %vm558_vm1, %v873_v62 }
  0x88   : > { %2779 = vmatmul.msk.bf16.gmra.mxu0 %vm558_vm1, %v1287_v0 }
  0x91   : > { %2690 = vmatmul.msk.bf16.gmra.mxu1 %vm558_vm1, %v3118_v15 }
  0x93   : > { %2720 = vmatmul.msk.bf16.gmra.mxu2 %vm558_vm1, %v871_v10  ;;  %v1294_v10 = vor.u32 %v1293_v9, %v1292_v40  ;;  %v878_v40 = vrot.slane %v3088_v33, 1 }
  0x95   : > { %v1295_v11 = vsel %vm1276_vm3, %v1290_v58, %v1294_v10  ;;  %v879_v9 = vsel %vm864_vm2, %v876_v26, %v878_v40  ;;  %v1300_v26 = vrot.slane %v3164_v13, 1 }
  0x97   : > { %2751 = vmatmul.msk.bf16.gmra.mxu3 %vm558_vm1, %v875_v38 }
  0x98   : > { %2780 = vmatmul.msk.bf16.gmra.mxu0 %vm558_vm1, %v1291_v49  ;;  %v1297_v49 = vrot.slane %v3037_v51, 2 }
  0x9a   : > { %v1298_v58 = vor.u32 %v1297_v49, %v1296_v28  ;;  %v1301_v49 = vrot.slane %v3094_v44, 2 }
  0x9c   : > { %v1299_v48 = vsel %vm1276_vm3, %v1294_v10, %v1298_v58  ;;  %v880_v10 = vrot.slane %v3155_v3, 1 }
  0x9e   : > { %v3363_v1 = vpop.f32.mrf.mxu1 }
  0xa1   : > { %2691 = vmatmul.msk.bf16.gmra.mxu1 %vm558_vm1, %v3197_v7 }
  0xa3   : > { %2721 = vmatmul.msk.bf16.gmra.mxu2 %vm558_vm1, %v873_v62 }
  0xa5   : > { %v3374_v18 = vpop.f32.mrf.mxu0 }
  0xa6   : > { %v3372_v56 = vpop.f32.mrf.mxu2  ;;  %v3377_v0 = vpop.f32.mrf.mxu1 }
  0xa7   : > { %4178 = vst [vmem:[#allocation28_spill] sm:$0xff] %v3372_v56  ;;  %2752 = vmatmul.msk.bf16.gmra.mxu3 %vm558_vm1, %v877_v29 }
  0xa8   : > { %2781 = vmatmul.msk.bf16.gmra.mxu0 %vm558_vm1, %v1295_v11 }
  0xad   : > { %v3383_v5 = vpop.f32.mrf.mxu0 }
  0xae   : > { %v3381_v4 = vpop.f32.mrf.mxu2  ;;  %v3385_v62 = vpop.f32.mrf.mxu1 }
  0xaf   : > { %4179 = vst [vmem:[#allocation29_spill] sm:$0xff] %v3381_v4 }
  0xb1   : > { %2692 = vmatmul.msk.bf16.gmra.mxu1 %vm558_vm1, %v3241_v61 }
  0xb3   : > { %2722 = vmatmul.msk.bf16.gmra.mxu2 %vm558_vm1, %v875_v38 }
  0xb5   : > { %v3396_v47 = vpop.f32.mrf.mxu0 }
  0xb6   : > { %v3394_v11 = vpop.f32.mrf.mxu2  ;;  %v3399_v4 = vpop.f32.mrf.mxu1 }
  0xb7   : > { %4180 = vst [vmem:[#allocation30_spill] sm:$0xff] %v3394_v11  ;;  %2753 = vmatmul.msk.bf16.gmra.mxu3 %vm558_vm1, %v879_v9 }
  0xb8   : > { %2782 = vmatmul.msk.bf16.gmra.mxu0 %vm558_vm1, %v1299_v48  ;;  %v1302_v48 = vor.u32 %v1301_v49, %v1300_v26 }
  0xba   : > { %v3403_v51 = vpop.f32.mrf.mxu3  ;;  %v1303_v13 = vsel %vm1276_vm3, %v1298_v58, %v1302_v48  ;;  %v882_v58 = vrot.slane %v3223_v6, 1 }
  0xbb   : > { %4181 = vst [vmem:[#allocation31_spill] sm:$0xff] %v3403_v51  ;;  %v881_v51 = vsel %vm864_vm2, %v878_v40, %v880_v10  ;;  %v1304_v40 = vrot.slane %v3248_v60, 1 }
  0xbd   : > { %v3407_v38 = vpop.f32.mrf.mxu0 }
  0xbe   : > { %v3405_v22 = vpop.f32.mrf.mxu2  ;;  %v3409_v28 = vpop.f32.mrf.mxu1 }
  0xbf   : > { %4182 = vst [vmem:[#allocation32_spill] sm:$0xff] %v3405_v22 }
  0xc1   : > { %2693 = vmatmul.msk.bf16.gmra.mxu1 %vm558_vm1, %v3024_v39 }
  0xc2   : > { %v3417_v11 = vpop.f32.mrf.mxu3 }
  0xc3   : > { %2723 = vmatmul.msk.bf16.gmra.mxu2 %vm558_vm1, %v877_v29  ;;  %4183 = vst [vmem:[#allocation33_spill] sm:$0xff] %v3417_v11  ;;  %v1305_v11 = vrot.slane %v3167_v17, 2 }
  0xc5   : > { %v3422_v61 = vpop.f32.mrf.mxu0 }
  0xc6   : > { %v3420_v22 = vpop.f32.mrf.mxu2  ;;  %v3425_v56 = vpop.f32.mrf.mxu1 }
  0xc7   : > { %4184 = vst [vmem:[#allocation34_spill] sm:$0xff] %v3420_v22  ;;  %2754 = vmatmul.msk.bf16.gmra.mxu3 %vm558_vm1, %v881_v51 }
  0xc8   : > { %2783 = vmatmul.msk.bf16.gmra.mxu0 %vm558_vm1, %v1303_v13  ;;  %v1306_v13 = vor.u32 %v1305_v11, %v1304_v40 }
  0xca   : > { %v3429_v44 = vpop.f32.mrf.mxu3  ;;  %v1307_v60 = vsel %vm1276_vm3, %v1302_v48, %v1306_v13  ;;  %v884_v48 = vrot.slane %v3028_v45, 1 }
  0xcb   : > { %4185 = vst [vmem:[#allocation35_spill] sm:$0xff] %v3429_v44  ;;  %v883_v44 = vsel %vm864_vm2, %v880_v10, %v882_v58  ;;  %v1308_v10 = vrot.slane %v3244_v57, 1 }
  0xcd   : > { %v3433_v26 = vpop.f32.mrf.mxu0 }
  0xce   : > { %v3431_v29 = vpop.f32.mrf.mxu2  ;;  %v3435_v49 = vpop.f32.mrf.mxu1 }
  0xcf   : > { %4186 = vst [vmem:[#allocation36_spill] sm:$0xff] %v3431_v29 }
  0xd1   : > { %2694 = vmatmul.msk.bf16.gmra.mxu1 %vm558_vm1, %v3026_v43 }
  0xd2   : > { %v3443_v22 = vpop.f32.mrf.mxu3 }
  0xd3   : > { %2724 = vmatmul.msk.bf16.gmra.mxu2 %vm558_vm1, %v879_v9  ;;  %4187 = vst [vmem:[#allocation37_spill] sm:$0xff] %v3443_v22  ;;  %v1309_v22 = vrot.slane %v3230_v16, 2  ;;  %v2930_v16 = vld [vmem:[%s4103_s1 + $0x60] sm:$0xff] }
  0xd4   : > { %1847 = vmatpush.bf16.msra.mxu2 %v2930_v16  ;;  %v1312_v16 = vrot.slane %v3045_v54, 1 }
  0xd5   : > { %v3448_v39 = vpop.f32.mrf.mxu0 }
  0xd6   : > { %v3446_v29 = vpop.f32.mrf.mxu2  ;;  %v3451_v20 = vpop.f32.mrf.mxu1 }
  0xd7   : > { %4188 = vst [vmem:[#allocation38_spill] sm:$0xff] %v3446_v29  ;;  %2755 = vmatmul.msk.bf16.gmra.mxu3 %vm558_vm1, %v883_v44 }
  0xd8   : > { %2784 = vmatmul.msk.bf16.gmra.mxu0 %vm558_vm1, %v1307_v60  ;;  %v1310_v60 = vor.u32 %v1309_v22, %v1308_v10  ;;  %v2928_v22 = vld [vmem:[%s4103_s1 + $0x50] sm:$0xff] }
  0xd9   : > { %1679 = vmatpush.bf16.msra.mxu1 %v2928_v22 }
  0xda   : > { %v3455_v17 = vpop.f32.mrf.mxu3  ;;  %v1311_v57 = vsel %vm1276_vm3, %v1306_v13, %v1310_v60 }
  0xdb   : > { %4189 = vst [vmem:[#allocation39_spill] sm:$0xff] %v3455_v17  ;;  %v885_v17 = vsel %vm864_vm2, %v882_v58, %v884_v48 }
  0xdd   : > { %v3459_v11 = vpop.f32.mrf.mxu0 }
  0xde   : > { %v3457_v9 = vpop.f32.mrf.mxu2  ;;  %v3461_v40 = vpop.f32.mrf.mxu1 }
  0xdf   : > { %4190 = vst [vmem:[#allocation40_spill] sm:$0xff] %v3457_v9 }
  0xe0   : > { %4191 = vst [vmem:[#allocation41_spill] sm:$0xff] %v3461_v40 }
  0xe1   : > { %2695 = vmatmul.msk.bf16.gmra.mxu1 %vm558_vm1, %v3088_v33  ;;  %v886_v33 = vrot.slane %v3039_v52, 1 }
  0xe2   : > { %v3469_v29 = vpop.f32.mrf.mxu3 }
  0xe3   : > { %2725 = vmatmul.msk.bf16.gmra.mxu2 %vm558_vm1, %v881_v51  ;;  %4192 = vst [vmem:[#allocation42_spill] sm:$0xff] %v3469_v29  ;;  %v2932_v51 = vld [vmem:[%s4103_s1 + $0x70] sm:$0xff]  ;;  %v887_v54 = vsel %vm864_vm2, %v884_v48, %v886_v33 }
  0xe4   : > { %2139 = vmatpush.bf16.msra.mxu3 %v2932_v51 }
  0xe5   : > { %v3474_v43 = vpop.f32.mrf.mxu0 }
  0xe6   : > { %v3472_v9 = vpop.f32.mrf.mxu2  ;;  %v3477_v27 = vpop.f32.mrf.mxu1 }
  0xe7   : > { %4193 = vst [vmem:[#allocation43_spill] sm:$0xff] %v3472_v9  ;;  %2756 = vmatmul.msk.bf16.gmra.mxu3 %vm558_vm1, %v885_v17  ;;  %v2934_v9 = vld [vmem:[%s4103_s1 + $0x80] sm:$0xff] }
  0xe8   : > { %4194 = vst [vmem:[#allocation44_spill] sm:$0xff] %v3477_v27  ;;  %2785 = vmatmul.msk.bf16.gmra.mxu0 %vm558_vm1, %v1311_v57  ;;  %v1313_v57 = vrot.slane %v3042_v53, 2 }
  0xe9   : > { %2383 = vmatpush.bf16.msra.mxu0 %v2934_v9 }
  0xea   : > { %v1145_v58 = vpop.f32.mrf.mxu3  ;;  %v1314_v51 = vor.u32 %v1313_v57, %v1312_v16  ;;  %v1316_v57 = vrot.slane %v3085_v30, 1 }
  0xec   : > { %v1315_v7 = vsel %vm1276_vm3, %v1310_v60, %v1314_v51  ;;  %v1317_v60 = vrot.slane %v3053_v63, 2 }
  0xed   : > { %v3492_v10 = vpop.f32.mrf.mxu0 }
  0xee   : > { %v3490_v13 = vpop.f32.mrf.mxu2  ;;  %v769_v29 = vpop.f32.mrf.mxu1 }
  0xef   : > { %4195 = vst [vmem:[#allocation45_spill] sm:$0xff] %v3490_v13  ;;  %v770_v13 = vadd.f32 %v769_v29, %v3374_v18 }
  0xf1   : > { %2696 = vmatmul.msk.bf16.gmra.mxu1 %vm558_vm1, %v3155_v3 }
  0xf2   : > { %v1147_v22 = vpop.f32.mrf.mxu3 }
  0xf3   : > { %2726 = vmatmul.msk.bf16.gmra.mxu2 %vm558_vm1, %v883_v44 }
  0xf5   : > { %v1437_v53 = vpop.f32.mrf.mxu0 }
  0xf6   : > { %v977_v27 = vpop.f32.mrf.mxu2  ;;  %v771_v12 = vpop.f32.mrf.mxu1 }
  0xf7   : > { %v1067_v15 = vadd.f32 %v977_v27, %v770_v13  ;;  %2757 = vmatmul.msk.bf16.gmra.mxu3 %vm558_vm1, %v887_v54  ;;  %v772_v44 = vadd.f32 %v771_v12, %v3383_v5  ;;  %v888_v13 = vrot.slane %v3104_v2, 1 }
  0xf8   : > { %2786 = vmatmul.msk.bf16.gmra.mxu0 %vm558_vm1, %v1315_v7 }
  0xf9   : > { %v1235_v9 = vadd.f32 %v1145_v58, %v1067_v15  ;;  %v889_v5 = vsel %vm864_vm2, %v886_v33, %v888_v13 }
  0xfa   : > { %v1150_v3 = vpop.f32.mrf.mxu3 }
  0xfb   : > { %v3508_v40 = vadd.f32 %v1437_v53, %v1235_v9  ;;  %v1318_v53 = vor.u32 %v1317_v60, %v1316_v57 }
  0xfd   : > { %v1439_v18 = vpop.f32.mrf.mxu0 }
  0xfe   : > { %v979_v16 = vpop.f32.mrf.mxu2  ;;  %v774_v48 = vpop.f32.mrf.mxu1 }
  0xff   : > { %v1068_v29 = vadd.f32 %v979_v16, %v772_v44  ;;  %v775_v12 = vadd.f32 %v774_v48, %v3396_v47  ;;  %v1319_v44 = vsel %vm1276_vm3, %v1314_v51, %v1318_v53  ;;  %v1321_v51 = vrot.slane %v3116_v14, 2 }
 0x101   : > { %v1236_v27 = vadd.f32 %v1147_v22, %v1068_v29  ;;  %2697 = vmatmul.msk.bf16.gmra.mxu1 %vm558_vm1, %v3223_v6 }
 0x102   : > { %v1152_v15 = vpop.f32.mrf.mxu3 }
 0x103   : > { %2727 = vmatmul.msk.bf16.gmra.mxu2 %vm558_vm1, %v885_v17  ;;  %v3517_v7 = vadd.f32 %v1439_v18, %v1236_v27  ;;  %v1320_v27 = vrot.slane %v3179_v36, 1 }
 0x105   : > { %v1442_v9 = vpop.f32.mrf.mxu0 }
 0x106   : > { %v982_v58 = vpop.f32.mrf.mxu2  ;;  %v776_v16 = vpop.f32.mrf.mxu1 }
 0x107   : > { %v1069_v22 = vadd.f32 %v982_v58, %v775_v12  ;;  %2758 = vmatmul.msk.bf16.gmra.mxu3 %vm558_vm1, %v889_v5  ;;  %v777_v18 = vadd.f32 %v776_v16, %v3407_v38  ;;  %v890_v58 = vrot.slane %v3176_v35, 1 }
 0x108   : > { %2787 = vmatmul.msk.bf16.gmra.mxu0 %vm558_vm1, %v1319_v44 }
 0x109   : > { %v1237_v29 = vadd.f32 %v1150_v3, %v1069_v22  ;;  %v1322_v3 = vor.u32 %v1321_v51, %v1320_v27  ;;  %v891_v22 = vsel %vm864_vm2, %v888_v13, %v890_v58 }
 0x10a   : > { %v1155_v17 = vpop.f32.mrf.mxu3 }
 0x10b   : > { %v3524_v57 = vadd.f32 %v1442_v9, %v1237_v29 }
 0x10d   : > { %v1444_v47 = vpop.f32.mrf.mxu0 }
 0x10e   : > { %v984_v60 = vpop.f32.mrf.mxu2  ;;  %v779_v33 = vpop.f32.mrf.mxu1 }
 0x10f   : > { %v1070_v48 = vadd.f32 %v984_v60, %v777_v18  ;;  %v780_v38 = vadd.f32 %v779_v33, %v3422_v61  ;;  %v1323_v18 = vsel %vm1276_vm3, %v1318_v53, %v1322_v3  ;;  %v1325_v53 = vrot.slane %v3189_v59, 2 }
 0x111   : > { %v1238_v12 = vadd.f32 %v1152_v15, %v1070_v48  ;;  %2698 = vmatmul.msk.bf16.gmra.mxu1 %vm558_vm1, %v3028_v45 }
 0x112   : > { %v1157_v9 = vpop.f32.mrf.mxu3 }
 0x113   : > { %2728 = vmatmul.msk.bf16.gmra.mxu2 %vm558_vm1, %v887_v54  ;;  %v3533_v44 = vadd.f32 %v1444_v47, %v1238_v12  ;;  %v1324_v12 = vrot.slane %v3251_v21, 1 }
 0x115   : > { %v1447_v29 = vpop.f32.mrf.mxu0 }
 0x116   : > { %v987_v16 = vpop.f32.mrf.mxu2  ;;  %v781_v60 = vpop.f32.mrf.mxu1 }
 0x117   : > { %v1071_v15 = vadd.f32 %v987_v16, %v780_v38  ;;  %2759 = vmatmul.msk.bf16.gmra.mxu3 %vm558_vm1, %v891_v22  ;;  %v782_v47 = vadd.f32 %v781_v60, %v3433_v26  ;;  %v892_v16 = vrot.slane %v3237_v32, 1 }
 0x118   : > { %2788 = vmatmul.msk.bf16.gmra.mxu0 %vm558_vm1, %v1323_v18 }
 0x119   : > { %v1239_v48 = vadd.f32 %v1155_v17, %v1071_v15  ;;  %v1326_v17 = vor.u32 %v1325_v53, %v1324_v12  ;;  %v893_v15 = vsel %vm864_vm2, %v890_v58, %v892_v16 }
 0x11a   : > { %v1160_v54 = vpop.f32.mrf.mxu3 }
 0x11b   : > { %v3540_v27 = vadd.f32 %v1447_v29, %v1239_v48 }
 0x11d   : > { %v1449_v61 = vpop.f32.mrf.mxu0 }
 0x11e   : > { %v989_v51 = vpop.f32.mrf.mxu2  ;;  %v784_v13 = vpop.f32.mrf.mxu1 }
 0x11f   : > { %v1072_v33 = vadd.f32 %v989_v51, %v782_v47  ;;  %v785_v26 = vadd.f32 %v784_v13, %v3448_v39  ;;  %v1327_v47 = vsel %vm1276_vm3, %v1322_v3, %v1326_v17  ;;  %v1329_v3 = vrot.slane %v3257_v8, 2 }
 0x121   : > { %v1240_v38 = vadd.f32 %v1157_v9, %v1072_v33  ;;  %2699 = vmatmul.msk.bf16.gmra.mxu1 %vm558_vm1, %v3039_v52 }
 0x122   : > { %v1162_v29 = vpop.f32.mrf.mxu3 }
 0x123   : > { %2729 = vmatmul.msk.bf16.gmra.mxu2 %vm558_vm1, %v889_v5  ;;  %v3549_v18 = vadd.f32 %v1449_v61, %v1240_v38  ;;  %v1328_v38 = vrot.slane %v3304_v19, 1 }
 0x125   : > { %v1452_v48 = vpop.f32.mrf.mxu0 }
 0x126   : > { %v992_v60 = vpop.f32.mrf.mxu2  ;;  %v786_v51 = vpop.f32.mrf.mxu1 }
 0x127   : > { %v1073_v9 = vadd.f32 %v992_v60, %v785_v26  ;;  %2760 = vmatmul.msk.bf16.gmra.mxu3 %vm558_vm1, %v893_v15  ;;  %v787_v61 = vadd.f32 %v786_v51, %v3459_v11  ;;  %v894_v60 = vrot.slane %v3129_v34, 1 }
 0x128   : > { %2789 = vmatmul.msk.bf16.gmra.mxu0 %vm558_vm1, %v1327_v47 }
 0x129   : > { %v1241_v33 = vadd.f32 %v1160_v54, %v1073_v9  ;;  %v1330_v54 = vor.u32 %v1329_v3, %v1328_v38  ;;  %v895_v9 = vsel %vm864_vm2, %v892_v16, %v894_v60 }
 0x12a   : > { %v1165_v5 = vpop.f32.mrf.mxu3 }
 0x12b   : > { %v3556_v12 = vadd.f32 %v1452_v48, %v1241_v33 }
 0x12d   : > { %v1454_v39 = vpop.f32.mrf.mxu0 }
 0x12e   : > { %v994_v53 = vpop.f32.mrf.mxu2  ;;  %v789_v58 = vpop.f32.mrf.mxu1 }
 0x12f   : > { %v1074_v13 = vadd.f32 %v994_v53, %v787_v61  ;;  %v790_v11 = vadd.f32 %v789_v58, %v3474_v43  ;;  %v1331_v61 = vsel %vm1276_vm3, %v1326_v17, %v1330_v54  ;;  %v1333_v17 = vrot.slane %v3138_v42, 2 }
 0x131   : > { %v1242_v26 = vadd.f32 %v1162_v29, %v1074_v13  ;;  %2700 = vmatmul.msk.bf16.gmra.mxu1 %vm558_vm1, %v3104_v2 }
 0x132   : > { %v1167_v48 = vpop.f32.mrf.mxu3 }
 0x133   : > { %2730 = vmatmul.msk.bf16.gmra.mxu2 %vm558_vm1, %v891_v22  ;;  %v3565_v47 = vadd.f32 %v1454_v39, %v1242_v26  ;;  %v1332_v26 = vrot.slane %v3141_v46, 1 }
 0x135   : > { %v1457_v33 = vpop.f32.mrf.mxu0 }
 0x136   : > { %v997_v51 = vpop.f32.mrf.mxu2  ;;  %v791_v53 = vpop.f32.mrf.mxu1 }
 0x137   : > { %v1075_v29 = vadd.f32 %v997_v51, %v790_v11  ;;  %2761 = vmatmul.msk.bf16.gmra.mxu3 %vm558_vm1, %v895_v9  ;;  %v792_v39 = vadd.f32 %v791_v53, %v3492_v10  ;;  %v896_v51 = vrot.slane %v3135_v41, 1 }
 0x138   : > { %2790 = vmatmul.msk.bf16.gmra.mxu0 %vm558_vm1, %v1331_v61 }
 0x139   : > { %v1243_v13 = vadd.f32 %v1165_v5, %v1075_v29  ;;  %v1334_v5 = vor.u32 %v1333_v17, %v1332_v26  ;;  %v897_v29 = vsel %vm864_vm2, %v894_v60, %v896_v51  ;;  %v209_v17 = vld [vmem:[%s3010_s27 + $0x128] sm:$0xff] }
 0x13a   : > { %v1170_v22 = vpop.f32.mrf.mxu3 }
 0x13b   : > { %v3572_v38 = vadd.f32 %v1457_v33, %v1243_v13 }
 0x13d   : > { %4196 = vst [vmem:[#allocation46_spill] sm:$0xff] %v3572_v38  ;;  %v1459_v43 = vpop.f32.mrf.mxu0 }
 0x13e   : > { %v999_v3 = vpop.f32.mrf.mxu2  ;;  %v794_v16 = vpop.f32.mrf.mxu1 }
 0x13f   : > { %v1076_v58 = vadd.f32 %v999_v3, %v792_v39  ;;  %v795_v61 = vadd.f32 %v794_v16, %v3363_v1 }
 0x141   : > { %v1244_v11 = vadd.f32 %v1167_v48, %v1076_v58  ;;  %2701 = vmatmul.msk.bf16.gmra.mxu1 %vm558_vm1, %v3176_v35  ;;  %v1335_v48 = vsel %vm1276_vm3, %v1330_v54, %v1334_v5  ;;  %v4199_v54 = vld [vmem:[#allocation14_spill] sm:$0xff] }
 0x142   : > { %v1172_v33 = vpop.f32.mrf.mxu3 }
 0x143   : > { %2731 = vmatmul.msk.bf16.gmra.mxu2 %vm558_vm1, %v893_v15  ;;  %v3581_v10 = vadd.f32 %v1459_v43, %v1244_v11 }
 0x145   : > { %4197 = vst [vmem:[#allocation47_spill] sm:$0xff] %v3581_v10  ;;  %v1462_v13 = vpop.f32.mrf.mxu0  ;;  %v1336_v10 = vrot.slane %v3206_v24, 1 }
 0x146   : > { %v1002_v53 = vpop.f32.mrf.mxu2  ;;  %v796_v3 = vpop.f32.mrf.mxu1 }
 0x147   : > { %v1077_v39 = vadd.f32 %v1002_v53, %v795_v61  ;;  %2762 = vmatmul.msk.bf16.gmra.mxu3 %vm558_vm1, %v897_v29  ;;  %v797_v43 = vadd.f32 %v796_v3, %v3377_v0  ;;  %v1337_v61 = vrot.slane %v4199_v54, 2  ;;  %v250_v53 = vmax.f32 %v209_v17, 0.0 }
 0x148   : > { %2791 = vmatmul.msk.bf16.gmra.mxu0 %vm558_vm1, %v1335_v48 }
 0x149   : > { %v1245_v58 = vadd.f32 %v1170_v22, %v1077_v39  ;;  %v3595_v22 = vrot.slane %v3203_v23, 1  ;;  %v1338_v0 = vor.u32 %v1337_v61, %v1336_v10  ;;  %v291_v39 = vpack.c.bf16 %v250_v53, %v250_v53  ;;  %v210_v53 = vld [vmem:[%s3010_s27 + $0x130] sm:$0xff] }
 0x14a   : > { %v1175_v15 = vpop.f32.mrf.mxu3 }
 0x14b   : > { %v3588_v26 = vadd.f32 %v1462_v13, %v1245_v58  ;;  %v899_v58 = vsel %vm864_vm2, %v896_v51, %v3595_v22  ;;  %v1339_v17 = vsel %vm1276_vm3, %v1334_v5, %v1338_v0 }
 0x14d   : > { %4198 = vst [vmem:[#allocation48_spill] sm:$0xff] %v3588_v26  ;;  %v1464_v16 = vpop.f32.mrf.mxu0  ;;  %v4203_v26 = vld [vmem:[#allocation19_spill] sm:$0xff] }
 0x14e   : > { %v1004_v1 = vpop.f32.mrf.mxu2  ;;  %v799_v11 = vpop.f32.mrf.mxu1 }
 0x14f   : > { %v1078_v60 = vadd.f32 %v1004_v1, %v797_v43  ;;  %v800_v3 = vadd.f32 %v799_v11, %v3385_v62  ;;  %v4202_v62 = vld [vmem:[#allocation24_spill] sm:$0xff] }
 0x151   : > { %v1246_v38 = vadd.f32 %v1172_v33, %v1078_v60  ;;  %2702 = vmatmul.msk.bf16.gmra.mxu1 %vm558_vm1, %v3237_v32 }
 0x152   : > { %v1177_v13 = vpop.f32.mrf.mxu3 }
 0x153   : > { %2732 = vmatmul.msk.bf16.gmra.mxu2 %vm558_vm1, %v895_v9  ;;  %v3600_v48 = vadd.f32 %v1464_v16, %v1246_v38  ;;  %v1110_v9 = vunpack.c.l.b16 %v291_v39  ;;  %v1341_v39 = vrot.slane %v4203_v26, 2 }
 0x155   : > { %4200 = vst [vmem:[#allocation14_spill] sm:$0xff] %v3600_v48  ;;  %v1467_v43 = vpop.f32.mrf.mxu0  ;;  %v3611_v11 = vpack.c.b16 %v1110_v9, %v4202_v62 }
 0x156   : > { %v1007_v33 = vpop.f32.mrf.mxu2  ;;  %v801_v60 = vpop.f32.mrf.mxu1 }
 0x157   : > { %v1079_v1 = vadd.f32 %v1007_v33, %v800_v3  ;;  %2763 = vmatmul.msk.bf16.gmra.mxu3 %vm558_vm1, %v899_v58  ;;  %v802_v51 = vadd.f32 %v801_v60, %v3399_v4  ;;  %v1340_v33 = vrot.slane %v3282_v55, 1 }
 0x158   : > { %2792 = vmatmul.msk.bf16.gmra.mxu0 %vm558_vm1, %v1339_v17  ;;  %v1114_v17 = vrot.slane %v3611_v11, 1 }
 0x159   : > { %v1247_v10 = vadd.f32 %v1175_v15, %v1079_v1  ;;  %v251_v1 = vmax.f32 %v210_v53, 0.0 }
 0x15a   : > { %v1180_v38 = vpop.f32.mrf.mxu3 }
 0x15b   : > { %v3608_v16 = vadd.f32 %v1467_v43, %v1247_v10  ;;  %v1342_v43 = vor.u32 %v1341_v39, %v1340_v33  ;;  %v1115_v10 = vsel %vm864_vm2, %v3595_v22, %v1114_v17  ;;  %v292_v62 = vpack.c.bf16 %v251_v1, %v251_v1 }
 0x15d   : > { %4201 = vst [vmem:[#allocation49_spill] sm:$0xff] %v3608_v16  ;;  %v1469_v48 = vpop.f32.mrf.mxu0 }
 0x15e   : > { %v1009_v61 = vpop.f32.mrf.mxu2  ;;  %v804_v3 = vpop.f32.mrf.mxu1 }
 0x15f   : > { %v1080_v5 = vadd.f32 %v1009_v61, %v802_v51  ;;  %v805_v9 = vadd.f32 %v804_v3, %v3409_v28  ;;  %v1343_v61 = vsel %vm1276_vm3, %v1338_v0, %v1342_v43  ;;  %v4146_v28 = vshrl.u32 %v3611_v11, 16 }
 0x160   : > { %v4145_v3 = vshll.u32 %v3611_v11, 16 }
 0x161   : > { %v1248_v15 = vadd.f32 %v1177_v13, %v1080_v5  ;;  %2703 = vmatmul.msk.bf16.gmra.mxu1 %vm558_vm1, %v3129_v34 }
 0x162   : > { %v1182_v4 = vpop.f32.mrf.mxu3 }
 0x163   : > { %2733 = vmatmul.msk.bf16.gmra.mxu2 %vm558_vm1, %v897_v29  ;;  %v3621_v60 = vadd.f32 %v1469_v48, %v1248_v15  ;;  %v3628_v29 = vunpack.c.l.b16 %v292_v62  ;;  %v1350_v62 = vrot.slane %v4145_v3, 2 }
 0x165   : > { %v1472_v13 = vpop.f32.mrf.mxu0  ;;  %v3638_v0 = vpack.c.b16 %v3628_v29, %v3628_v29 }
 0x166   : > { %v1012_v51 = vpop.f32.mrf.mxu2  ;;  %v806_v5 = vpop.f32.mrf.mxu1 }
 0x167   : > { %v1081_v53 = vadd.f32 %v1012_v51, %v805_v9  ;;  %2764 = vmatmul.msk.bf16.gmra.mxu3 %vm558_vm1, %v1115_v10  ;;  %v807_v39 = vadd.f32 %v806_v5, %v3425_v56  ;;  %4204 = vst [vmem:[#allocation24_spill] sm:$0xff] %v3638_v0  ;;  %v1347_v10 = vrot.slane %v4146_v28, 1 }
 0x168   : > { %2793 = vmatmul.msk.bf16.gmra.mxu0 %vm558_vm1, %v1343_v61 }
 0x169   : > { %v1249_v16 = vadd.f32 %v1180_v38, %v1081_v53  ;;  %v1351_v56 = vor.u32 %v1350_v62, %v1347_v10  ;;  %v1354_v10 = vshrl.u32 %v3638_v0, 16 }
 0x16a   : > { %v1185_v48 = vpop.f32.mrf.mxu3 }
 0x16b   : > { %v3633_v33 = vadd.f32 %v1472_v13, %v1249_v16  ;;  %v1116_v16 = vrot.slane %v3638_v0, 1  ;;  %v1352_v3 = vsel %vm1276_vm3, %v1342_v43, %v1351_v56 }
 0x16d   : > { %v1474_v1 = vpop.f32.mrf.mxu0  ;;  %v1117_v5 = vsel %vm864_vm2, %v1114_v17, %v1116_v16  ;;  %v1984_v16 = vrot.slane %v3290_v25, 2  ;;  %v4206_v25 = vld [vmem:[#allocation41_spill] sm:$0xff] }
 0x16e   : > { %v1014_v15 = vpop.f32.mrf.mxu2  ;;  %v809_v9 = vpop.f32.mrf.mxu1 }
 0x16f   : > { %v1082_v38 = vadd.f32 %v1014_v15, %v807_v39  ;;  %v810_v53 = vadd.f32 %v809_v9, %v3435_v49  ;;  %v4205_v49 = vld [vmem:[#allocation27_spill] sm:$0xff]  ;;  %v1981_v9 = vrot.slane %v3214_v37, 2 }
 0x170   : > { %v900_v17 = vrot.slane %v4205_v49, 1 }
 0x171   : > { %v1250_v51 = vadd.f32 %v1182_v4, %v1082_v38  ;;  %2704 = vmatmul.msk.bf16.gmra.mxu1 %vm558_vm1, %v3135_v41 }
 0x172   : > { %v1187_v13 = vpop.f32.mrf.mxu3 }
 0x173   : > { %2734 = vmatmul.msk.bf16.gmra.mxu2 %vm558_vm1, %v899_v58  ;;  %v3648_v61 = vadd.f32 %v1474_v1, %v1250_v51  ;;  %v1357_v1 = vshll.u32 %v3638_v0, 16  ;;  %v1982_v51 = vrot.slane %v3127_v31, 3 }
 0x175   : > { %v1477_v15 = vpop.f32.mrf.mxu0  ;;  %v1359_v0 = vrot.slane %v1357_v1, 2  ;;  %v1983_v49 = vor.u32 %v1982_v51, %v1981_v9 }
 0x176   : > { %v1017_v39 = vpop.f32.mrf.mxu2  ;;  %v811_v38 = vpop.f32.mrf.mxu1 }
 0x177   : > { %v1083_v4 = vadd.f32 %v1017_v39, %v810_v53  ;;  %2765 = vmatmul.msk.bf16.gmra.mxu3 %vm558_vm1, %v1117_v5  ;;  %v812_v43 = vadd.f32 %v811_v38, %v3451_v20 }
 0x178   : > { %2794 = vmatmul.msk.bf16.gmra.mxu0 %vm558_vm1, %v1352_v3 }
 0x179   : > { %v1251_v28 = vadd.f32 %v1185_v48, %v1083_v4  ;;  %v1985_v48 = vrot.slane %v3217_v50, 3  ;;  %v1356_v4 = vrot.slane %v1354_v10, 1 }
 0x17a   : > { %v1190_v58 = vpop.f32.mrf.mxu3 }
 0x17b   : > { %v3657_v62 = vadd.f32 %v1477_v15, %v1251_v28  ;;  %v901_v28 = vsel %vm864_vm2, %v3595_v22, %v900_v17  ;;  %v1986_v37 = vor.u32 %v1985_v48, %v1984_v16  ;;  %v1360_v31 = vor.u32 %v1359_v0, %v1356_v4  ;;  %v4207_v0 = vld [vmem:[#allocation9_spill] sm:$0xff]  ;;  %v4211_v4 = vld [vmem:[#allocation44_spill] sm:$0xff] }
 0x17c   : > { %v1569_v16 = vrot.slane %v4207_v0, 2  ;;  %v4208_v48 = vld [vmem:[#allocation13_spill] sm:$0xff] }
 0x17d   : > { %v1479_v53 = vpop.f32.mrf.mxu0  ;;  %v1987_v10 = vsel %vm1980_vm4, %v1983_v49, %v1986_v37  ;;  %v1361_v22 = vsel %vm1276_vm3, %v1351_v56, %v1360_v31  ;;  %v4212_v56 = vld [vmem:[#allocation26_spill] sm:$0xff]  ;;  %v4213_v49 = vld [vmem:[#allocation25_spill] sm:$0xff] }
 0x17e   : > { %v1019_v3 = vpop.f32.mrf.mxu2  ;;  %v814_v39 = vpop.f32.mrf.mxu1  ;;  %v1989_v31 = vrot.slane %v4213_v49, 3 }
 0x17f   : > { %v1084_v5 = vadd.f32 %v1019_v3, %v812_v43  ;;  %v815_v38 = vadd.f32 %v814_v39, %v4206_v25  ;;  %v1570_v3 = vrot.slane %v4208_v48, 2 }
 0x181   : > { %v1252_v15 = vadd.f32 %v1187_v13, %v1084_v5  ;;  %2705 = vmatmul.msk.bf16.gmra.mxu1 %vm558_vm1, %v3203_v23  ;;  %v4210_v5 = vld [vmem:[#allocation18_spill] sm:$0xff] }
 0x182   : > { %v1192_v50 = vpop.f32.mrf.mxu3  ;;  %v1572_v39 = vrot.slane %v4210_v5, 2 }
 0x183   : > { %2735 = vmatmul.msk.bf16.gmra.mxu2 %vm558_vm1, %v901_v28  ;;  %v3670_v20 = vadd.f32 %v1479_v53, %v1252_v15  ;;  %v1988_v15 = vrot.slane %v4212_v56, 2 }
 0x185   : > { %v1482_v43 = vpop.f32.mrf.mxu0 }
 0x186   : > { %v1022_v1 = vpop.f32.mrf.mxu2  ;;  %v816_v17 = vpop.f32.mrf.mxu1 }
 0x187   : > { %v1085_v13 = vadd.f32 %v1022_v1, %v815_v38  ;;  %2868 = vmatmul.msk.bf16.vlgmr.msra.gmra.mxu3 %vm558_vm1, %v1987_v10  ;;  %v817_v28 = vadd.f32 %v816_v17, %v4211_v4  ;;  %v1571_v1 = vsel %vm1568_vm5, %v1569_v16, %v1570_v3  ;;  %v2273_v17 = vrot.slane %v4208_v48, 3 }
 0x188   : > { %2795 = vmatmul.msk.bf16.gmra.mxu0 %vm558_vm1, %v1361_v22  ;;  %v1573_v22 = vsel %vm1568_vm5, %v1570_v3, %v1572_v39 }
 0x189   : > { %v1253_v9 = vadd.f32 %v1190_v58, %v1085_v13 }
 0x18a   : > { %v1195_v51 = vpop.f32.mrf.mxu3 }
 0x18b   : > { %v3679_v53 = vadd.f32 %v1482_v43, %v1253_v9  ;;  %v1990_v43 = vor.u32 %v1989_v31, %v1988_v15  ;;  %v2274_v9 = vrot.slane %v4210_v5, 3 }
 0x18d   : > { %4209 = vst [vmem:[#allocation19_spill] sm:$0xff] %v3679_v53  ;;  %v1484_v58 = vpop.f32.mrf.mxu0  ;;  %v1991_v16 = vsel %vm1980_vm4, %v1986_v37, %v1990_v43 }
 0x18e   : > { %v1024_v25 = vpop.f32.mrf.mxu2  ;;  %v819_v10 = vpop.f32.mrf.mxu1 }
 0x18f   : > { %v1086_v38 = vadd.f32 %v1024_v25, %v817_v28  ;;  %v4215_v28 = vld [vmem:[#allocation28_spill] sm:$0xff] }
 0x190   : > { %v820_v56 = vadd.f32 %v819_v10, %v4215_v28  ;;  %v4220_v28 = vld [vmem:[#allocation4_spill] sm:$0xff] }
 0x191   : > { %v1254_v13 = vadd.f32 %v1192_v50, %v1086_v38  ;;  %2808 = vmatmul.msk.bf16.vlgmr.msra.gmra.mxu1 %vm558_vm1, %v1571_v1  ;;  %v2275_v50 = vsel %vm2272_vm6, %v2273_v17, %v2274_v9  ;;  %v4218_v1 = vld [vmem:[#allocation29_spill] sm:$0xff] }
 0x192   : > { %v1197_v0 = vpop.f32.mrf.mxu3 }
 0x193   : > { %2838 = vmatmul.msk.bf16.vlgmr.msra.gmra.mxu2 %vm558_vm1, %v1573_v22  ;;  %v3691_v4 = vadd.f32 %v1484_v58, %v1254_v13  ;;  %v4217_v58 = vld [vmem:[#allocation21_spill] sm:$0xff] }
 0x194   : > { %v1574_v38 = vrot.slane %v4217_v58, 2  ;;  %v4219_v13 = vld [vmem:[#allocation5_spill] sm:$0xff] }
 0x195   : > { %4214 = vst [vmem:[#allocation27_spill] sm:$0xff] %v3691_v4  ;;  %v1487_v3 = vpop.f32.mrf.mxu0  ;;  %v1992_v37 = vrot.slane %v4219_v13, 2  ;;  %v1993_v4 = vrot.slane %v4220_v28, 3 }
 0x196   : > { %v1027_v49 = vpop.f32.mrf.mxu2  ;;  %v821_v31 = vpop.f32.mrf.mxu1 }
 0x197   : > { %v1087_v15 = vadd.f32 %v1027_v49, %v820_v56  ;;  %2869 = vmatmul.msk.bf16.gmra.mxu3 %vm558_vm1, %v1991_v16  ;;  %v822_v10 = vadd.f32 %v821_v31, %v4218_v1  ;;  %v1575_v16 = vsel %vm1568_vm5, %v1572_v39, %v1574_v38 }
 0x198   : > { %2898 = vmatmul.msk.bf16.vlgmr.msra.gmra.mxu0 %vm558_vm1, %v2275_v50 }
 0x199   : > { %v1255_v25 = vadd.f32 %v1195_v51, %v1087_v15  ;;  %v1994_v15 = vor.u32 %v1993_v4, %v1992_v37  ;;  %v4224_v37 = vld [vmem:[#allocation2_spill] sm:$0xff] }
 0x19a   : > { %v1200_v48 = vpop.f32.mrf.mxu3 }
 0x19b   : > { %v3698_v5 = vadd.f32 %v1487_v3, %v1255_v25  ;;  %v2276_v3 = vrot.slane %v4217_v58, 3  ;;  %v4222_v25 = vld [vmem:[#allocation30_spill] sm:$0xff]  ;;  %v1995_v13 = vsel %vm1980_vm4, %v1990_v43, %v1994_v15 }
 0x19d   : > { %4216 = vst [vmem:[#allocation41_spill] sm:$0xff] %v3698_v5  ;;  %v1489_v17 = vpop.f32.mrf.mxu0 }
 0x19e   : > { %v1029_v53 = vpop.f32.mrf.mxu2  ;;  %v824_v49 = vpop.f32.mrf.mxu1 }
 0x19f   : > { %v1088_v56 = vadd.f32 %v1029_v53, %v822_v10  ;;  %v825_v1 = vadd.f32 %v824_v49, %v4222_v25  ;;  %v2277_v10 = vsel %vm2272_vm6, %v2274_v9, %v2276_v3  ;;  %v4227_v25 = vld [vmem:[#allocation6_spill] sm:$0xff] }
 0x1a1   : > { %v1256_v51 = vadd.f32 %v1197_v0, %v1088_v56  ;;  %2809 = vmatmul.msk.bf16.gmra.mxu1 %vm558_vm1, %v1573_v22  ;;  %v4225_v56 = vld [vmem:[#allocation32_spill] sm:$0xff] }
 0x1a2   : > { %v1202_v50 = vpop.f32.mrf.mxu3 }
 0x1a3   : > { %2839 = vmatmul.msk.bf16.gmra.mxu2 %vm558_vm1, %v1575_v16  ;;  %v3708_v31 = vadd.f32 %v1489_v17, %v1256_v51  ;;  %v1576_v17 = vrot.slane %v4224_v37, 2  ;;  %v4226_v51 = vld [vmem:[#allocation10_spill] sm:$0xff] }
 0x1a4   : > { %v1996_v43 = vrot.slane %v4226_v51, 2 }
 0x1a5   : > { %4221 = vst [vmem:[#allocation9_spill] sm:$0xff] %v3708_v31  ;;  %v1492_v53 = vpop.f32.mrf.mxu0  ;;  %v1997_v31 = vrot.slane %v4227_v25, 3 }
 0x1a6   : > { %v1032_v28 = vpop.f32.mrf.mxu2  ;;  %v826_v0 = vpop.f32.mrf.mxu1 }
 0x1a7   : > { %v1089_v39 = vadd.f32 %v1032_v28, %v825_v1  ;;  %2870 = vmatmul.msk.bf16.gmra.mxu3 %vm558_vm1, %v1995_v13  ;;  %v827_v49 = vadd.f32 %v826_v0, %v4225_v56  ;;  %v1577_v13 = vsel %vm1568_vm5, %v1574_v38, %v1576_v17 }
 0x1a8   : > { %2899 = vmatmul.msk.bf16.gmra.mxu0 %vm558_vm1, %v2277_v10 }
 0x1a9   : > { %v1257_v22 = vadd.f32 %v1200_v48, %v1089_v39  ;;  %v1998_v39 = vor.u32 %v1997_v31, %v1996_v43  ;;  %v4231_v43 = vld [vmem:[#allocation3_spill] sm:$0xff] }
 0x1aa   : > { %v1205_v4 = vpop.f32.mrf.mxu3 }
 0x1ab   : > { %v3715_v58 = vadd.f32 %v1492_v53, %v1257_v22  ;;  %v2278_v53 = vrot.slane %v4224_v37, 3  ;;  %v4229_v22 = vld [vmem:[#allocation34_spill] sm:$0xff]  ;;  %v1999_v51 = vsel %vm1980_vm4, %v1994_v15, %v1998_v39 }
 0x1ad   : > { %4223 = vst [vmem:[#allocation13_spill] sm:$0xff] %v3715_v58  ;;  %v1494_v9 = vpop.f32.mrf.mxu0 }
 0x1ae   : > { %v1034_v5 = vpop.f32.mrf.mxu2  ;;  %v829_v28 = vpop.f32.mrf.mxu1 }
 0x1af   : > { %v1090_v1 = vadd.f32 %v1034_v5, %v827_v49  ;;  %v830_v56 = vadd.f32 %v829_v28, %v4229_v22  ;;  %v2279_v49 = vsel %vm2272_vm6, %v2276_v3, %v2278_v53  ;;  %v4234_v22 = vld [vmem:[#allocation12_spill] sm:$0xff] }
 0x1b1   : > { %v1258_v48 = vadd.f32 %v1202_v50, %v1090_v1  ;;  %2810 = vmatmul.msk.bf16.gmra.mxu1 %vm558_vm1, %v1575_v16  ;;  %v4232_v1 = vld [vmem:[#allocation36_spill] sm:$0xff] }
 0x1b2   : > { %v1207_v10 = vpop.f32.mrf.mxu3 }
 0x1b3   : > { %2840 = vmatmul.msk.bf16.gmra.mxu2 %vm558_vm1, %v1577_v13  ;;  %v3725_v0 = vadd.f32 %v1494_v9, %v1258_v48  ;;  %v1578_v9 = vrot.slane %v4231_v43, 2  ;;  %v4233_v48 = vld [vmem:[#allocation16_spill] sm:$0xff] }
 0x1b4   : > { %v2000_v15 = vrot.slane %v4233_v48, 2 }
 0x1b5   : > { %4228 = vst [vmem:[#allocation18_spill] sm:$0xff] %v3725_v0  ;;  %v1497_v5 = vpop.f32.mrf.mxu0  ;;  %v2001_v0 = vrot.slane %v4234_v22, 3 }
 0x1b6   : > { %v1037_v25 = vpop.f32.mrf.mxu2  ;;  %v831_v50 = vpop.f32.mrf.mxu1 }
 0x1b7   : > { %v1091_v38 = vadd.f32 %v1037_v25, %v830_v56  ;;  %2871 = vmatmul.msk.bf16.gmra.mxu3 %vm558_vm1, %v1999_v51  ;;  %v832_v28 = vadd.f32 %v831_v50, %v4232_v1  ;;  %v1579_v51 = vsel %vm1568_vm5, %v1576_v17, %v1578_v9 }
 0x1b8   : > { %2900 = vmatmul.msk.bf16.gmra.mxu0 %vm558_vm1, %v2279_v49 }
 0x1b9   : > { %v1259_v16 = vadd.f32 %v1205_v4, %v1091_v38  ;;  %v2002_v38 = vor.u32 %v2001_v0, %v2000_v15  ;;  %v4238_v15 = vld [vmem:[#allocation11_spill] sm:$0xff] }
 0x1ba   : > { %v1210_v31 = vpop.f32.mrf.mxu3 }
 0x1bb   : > { %v3732_v37 = vadd.f32 %v1497_v5, %v1259_v16  ;;  %v2280_v5 = vrot.slane %v4231_v43, 3  ;;  %v4236_v16 = vld [vmem:[#allocation38_spill] sm:$0xff]  ;;  %v2003_v48 = vsel %vm1980_vm4, %v1998_v39, %v2002_v38 }
 0x1bd   : > { %4230 = vst [vmem:[#allocation44_spill] sm:$0xff] %v3732_v37  ;;  %v1499_v3 = vpop.f32.mrf.mxu0 }
 0x1be   : > { %v1039_v58 = vpop.f32.mrf.mxu2  ;;  %v834_v25 = vpop.f32.mrf.mxu1 }
 0x1bf   : > { %v1092_v56 = vadd.f32 %v1039_v58, %v832_v28  ;;  %v835_v1 = vadd.f32 %v834_v25, %v4236_v16  ;;  %v2281_v28 = vsel %vm2272_vm6, %v2278_v53, %v2280_v5  ;;  %v4241_v16 = vld [vmem:[#allocation17_spill] sm:$0xff] }
 0x1c1   : > { %v1260_v4 = vadd.f32 %v1207_v10, %v1092_v56  ;;  %2811 = vmatmul.msk.bf16.gmra.mxu1 %vm558_vm1, %v1577_v13  ;;  %v4239_v56 = vld [vmem:[#allocation40_spill] sm:$0xff] }
 0x1c2   : > { %v1212_v49 = vpop.f32.mrf.mxu3 }
 0x1c3   : > { %2841 = vmatmul.msk.bf16.gmra.mxu2 %vm558_vm1, %v1579_v51  ;;  %v3742_v50 = vadd.f32 %v1499_v3, %v1260_v4  ;;  %v1580_v3 = vrot.slane %v4238_v15, 2  ;;  %v4240_v4 = vld [vmem:[#allocation23_spill] sm:$0xff] }
 0x1c4   : > { %v2004_v39 = vrot.slane %v4240_v4, 2 }
 0x1c5   : > { %4235 = vst [vmem:[#allocation26_spill] sm:$0xff] %v3742_v50  ;;  %v1502_v58 = vpop.f32.mrf.mxu0  ;;  %v2005_v50 = vrot.slane %v4241_v16, 3 }
 0x1c6   : > { %v1042_v22 = vpop.f32.mrf.mxu2  ;;  %v836_v10 = vpop.f32.mrf.mxu1 }
 0x1c7   : > { %v1093_v17 = vadd.f32 %v1042_v22, %v835_v1  ;;  %2872 = vmatmul.msk.bf16.gmra.mxu3 %vm558_vm1, %v2003_v48  ;;  %v837_v25 = vadd.f32 %v836_v10, %v4239_v56  ;;  %v1581_v48 = vsel %vm1568_vm5, %v1578_v9, %v1580_v3 }
 0x1c8   : > { %2901 = vmatmul.msk.bf16.gmra.mxu0 %vm558_vm1, %v2281_v28 }
 0x1c9   : > { %v1261_v13 = vadd.f32 %v1210_v31, %v1093_v17  ;;  %v2006_v17 = vor.u32 %v2005_v50, %v2004_v39  ;;  %v4244_v39 = vld [vmem:[#allocation15_spill] sm:$0xff] }
 0x1ca   : > { %v1215_v0 = vpop.f32.mrf.mxu3 }
 0x1cb   : > { %v3749_v43 = vadd.f32 %v1502_v58, %v1261_v13  ;;  %v2282_v58 = vrot.slane %v4238_v15, 3  ;;  %v4243_v13 = vld [vmem:[#allocation43_spill] sm:$0xff]  ;;  %v2007_v4 = vsel %vm1980_vm4, %v2002_v38, %v2006_v17 }
 0x1cd   : > { %4237 = vst [vmem:[#allocation25_spill] sm:$0xff] %v3749_v43  ;;  %v1504_v53 = vpop.f32.mrf.mxu0 }
 0x1ce   : > { %v1044_v37 = vpop.f32.mrf.mxu2  ;;  %v839_v22 = vpop.f32.mrf.mxu1 }
 0x1cf   : > { %v1094_v1 = vadd.f32 %v1044_v37, %v837_v25  ;;  %v840_v56 = vadd.f32 %v839_v22, %v4243_v13  ;;  %v2283_v25 = vsel %vm2272_vm6, %v2280_v5, %v2282_v58  ;;  %v4247_v13 = vld [vmem:[#allocation20_spill] sm:$0xff] }
 0x1d1   : > { %v1262_v31 = vadd.f32 %v1212_v49, %v1094_v1  ;;  %2812 = vmatmul.msk.bf16.gmra.mxu1 %vm558_vm1, %v1579_v51  ;;  %v4245_v1 = vld [vmem:[#allocation45_spill] sm:$0xff] }
 0x1d2   : > { %v1217_v28 = vpop.f32.mrf.mxu3 }
 0x1d3   : > { %2842 = vmatmul.msk.bf16.gmra.mxu2 %vm558_vm1, %v1581_v48  ;;  %v3759_v10 = vadd.f32 %v1504_v53, %v1262_v31  ;;  %v1582_v53 = vrot.slane %v4244_v39, 2  ;;  %v4246_v31 = vld [vmem:[#allocation22_spill] sm:$0xff] }
 0x1d4   : > { %v2008_v38 = vrot.slane %v4246_v31, 2 }
 0x1d5   : > { %4242 = vst [vmem:[#allocation28_spill] sm:$0xff] %v3759_v10  ;;  %v1507_v37 = vpop.f32.mrf.mxu0  ;;  %v2009_v10 = vrot.slane %v4247_v13, 3 }
 0x1d6   : > { %v1047_v16 = vpop.f32.mrf.mxu2  ;;  %v841_v49 = vpop.f32.mrf.mxu1 }
 0x1d7   : > { %v1095_v9 = vadd.f32 %v1047_v16, %v840_v56  ;;  %2873 = vmatmul.msk.bf16.gmra.mxu3 %vm558_vm1, %v2007_v4  ;;  %v842_v22 = vadd.f32 %v841_v49, %v4245_v1  ;;  %v1583_v4 = vsel %vm1568_vm5, %v1580_v3, %v1582_v53 }
 0x1d8   : > { %2902 = vmatmul.msk.bf16.gmra.mxu0 %vm558_vm1, %v2283_v25 }
 0x1d9   : > { %v1263_v51 = vadd.f32 %v1215_v0, %v1095_v9  ;;  %v2010_v9 = vor.u32 %v2009_v10, %v2008_v38  ;;  %v1584_v38 = vrot.slane %v3223_v6, 2 }
 0x1da   : > { %v1220_v50 = vpop.f32.mrf.mxu3 }
 0x1db   : > { %v3766_v15 = vadd.f32 %v1507_v37, %v1263_v51  ;;  %v2284_v37 = vrot.slane %v4244_v39, 3  ;;  %v4249_v51 = vld [vmem:[#allocation31_spill] sm:$0xff]  ;;  %v2011_v31 = vsel %vm1980_vm4, %v2006_v17, %v2010_v9 }
 0x1dd   : > { %v1509_v5 = vpop.f32.mrf.mxu0 }
 0x1de   : > { %v1049_v43 = vpop.f32.mrf.mxu2  ;;  %v844_v16 = vpop.f32.mrf.mxu1 }
 0x1df   : > { %v1096_v56 = vadd.f32 %v1049_v43, %v842_v22  ;;  %v845_v1 = vadd.f32 %v844_v16, %v4249_v51  ;;  %v2285_v22 = vsel %vm2272_vm6, %v2282_v58, %v2284_v37  ;;  %v4251_v16 = vld [vmem:[#allocation8_spill] sm:$0xff] }
 0x1e0   : > { %v2012_v17 = vrot.slane %v4251_v16, 2 }
 0x1e1   : > { %v1264_v0 = vadd.f32 %v1217_v28, %v1096_v56  ;;  %2813 = vmatmul.msk.bf16.gmra.mxu1 %vm558_vm1, %v1581_v48 }
 0x1e2   : > { %v1222_v25 = vpop.f32.mrf.mxu3 }
 0x1e3   : > { %2843 = vmatmul.msk.bf16.gmra.mxu2 %vm558_vm1, %v1583_v4  ;;  %v3776_v49 = vadd.f32 %v1509_v5, %v1264_v0  ;;  %v4250_v5 = vld [vmem:[#allocation33_spill] sm:$0xff]  ;;  %v4252_v0 = vld [vmem:[#allocation7_spill] sm:$0xff] }
 0x1e4   : > { %v2013_v51 = vrot.slane %v4252_v0, 3 }
 0x1e5   : > { %4248 = vst [vmem:[#allocation21_spill] sm:$0xff] %v3776_v49  ;;  %v1512_v43 = vpop.f32.mrf.mxu0 }
 0x1e6   : > { %v1052_v13 = vpop.f32.mrf.mxu2  ;;  %v846_v28 = vpop.f32.mrf.mxu1 }
 0x1e7   : > { %v1097_v3 = vadd.f32 %v1052_v13, %v845_v1  ;;  %2874 = vmatmul.msk.bf16.gmra.mxu3 %vm558_vm1, %v2011_v31  ;;  %v847_v56 = vadd.f32 %v846_v28, %v4250_v5  ;;  %v1585_v31 = vsel %vm1568_vm5, %v1582_v53, %v1584_v38 }
 0x1e8   : > { %2903 = vmatmul.msk.bf16.gmra.mxu0 %vm558_vm1, %v2285_v22 }
 0x1e9   : > { %v1265_v48 = vadd.f32 %v1220_v50, %v1097_v3  ;;  %v2014_v3 = vor.u32 %v2013_v51, %v2012_v17  ;;  %v1586_v51 = vrot.slane %v3028_v45, 2 }
 0x1ea   : > { %v1225_v10 = vpop.f32.mrf.mxu3 }
 0x1eb   : > { %v3783_v39 = vadd.f32 %v1512_v43, %v1265_v48  ;;  %v2286_v43 = vrot.slane %v3223_v6, 3  ;;  %v4253_v48 = vld [vmem:[#allocation35_spill] sm:$0xff]  ;;  %v2015_v16 = vsel %vm1980_vm4, %v2010_v9, %v2014_v3  ;;  %v2016_v9 = vrot.slane %v3085_v30, 2 }
 0x1ec   : > { %v4255_v30 = vld [vmem:[#allocation39_spill] sm:$0xff] }
 0x1ed   : > { %v1514_v58 = vpop.f32.mrf.mxu0 }
 0x1ee   : > { %v1054_v49 = vpop.f32.mrf.mxu2  ;;  %v849_v13 = vpop.f32.mrf.mxu1 }
 0x1ef   : > { %v1098_v1 = vadd.f32 %v1054_v49, %v847_v56  ;;  %v850_v5 = vadd.f32 %v849_v13, %v4253_v48  ;;  %v2287_v56 = vsel %vm2272_vm6, %v2284_v37, %v2286_v43  ;;  %v2017_v13 = vrot.slane %v3053_v63, 3 }
 0x1f1   : > { %v1266_v50 = vadd.f32 %v1222_v25, %v1098_v1  ;;  %2814 = vmatmul.msk.bf16.gmra.mxu1 %vm558_vm1, %v1583_v4 }
 0x1f2   : > { %v1227_v22 = vpop.f32.mrf.mxu3 }
 0x1f3   : > { %2844 = vmatmul.msk.bf16.gmra.mxu2 %vm558_vm1, %v1585_v31  ;;  %v3793_v28 = vadd.f32 %v1514_v58, %v1266_v50  ;;  %v4254_v58 = vld [vmem:[#allocation37_spill] sm:$0xff] }
 0x1f5   : > { %v1517_v49 = vpop.f32.mrf.mxu0 }
 0x1f6   : > { %v1057_v0 = vpop.f32.mrf.mxu2  ;;  %v851_v25 = vpop.f32.mrf.mxu1 }
 0x1f7   : > { %v1099_v53 = vadd.f32 %v1057_v0, %v850_v5  ;;  %2875 = vmatmul.msk.bf16.gmra.mxu3 %vm558_vm1, %v2015_v16  ;;  %v852_v1 = vadd.f32 %v851_v25, %v4254_v58  ;;  %v1587_v16 = vsel %vm1568_vm5, %v1584_v38, %v1586_v51  ;;  %v2018_v0 = vor.u32 %v2017_v13, %v2016_v9 }
 0x1f8   : > { %2904 = vmatmul.msk.bf16.gmra.mxu0 %vm558_vm1, %v2287_v56  ;;  %v1588_v13 = vrot.slane %v3039_v52, 2 }
 0x1f9   : > { %v1267_v4 = vadd.f32 %v1225_v10, %v1099_v53  ;;  %v2019_v63 = vsel %vm1980_vm4, %v2014_v3, %v2018_v0  ;;  %v2020_v3 = vrot.slane %v3179_v36, 2 }
 0x1fa   : > { %v1230_v17 = vpop.f32.mrf.mxu3 }
 0x1fb   : > { %v3800_v6 = vadd.f32 %v1517_v49, %v1267_v4  ;;  %v2288_v49 = vrot.slane %v3028_v45, 3 }
 0x1fd   : > { %v1519_v37 = vpop.f32.mrf.mxu0 }
 0x1fe   : > { %v1059_v50 = vpop.f32.mrf.mxu2  ;;  %v854_v5 = vpop.f32.mrf.mxu1 }
 0x1ff   : > { %v1100_v48 = vadd.f32 %v1059_v50, %v852_v1  ;;  %v855_v25 = vadd.f32 %v854_v5, %v4255_v30  ;;  %v2289_v1 = vsel %vm2272_vm6, %v2286_v43, %v2288_v49  ;;  %v4256_v50 = vld [vmem:[#allocation42_spill] sm:$0xff] }
 0x201   : > { %v1268_v10 = vadd.f32 %v1227_v22, %v1100_v48  ;;  %2815 = vmatmul.msk.bf16.gmra.mxu1 %vm558_vm1, %v1585_v31  ;;  %v2021_v48 = vrot.slane %v3116_v14, 3 }
 0x202   : > { %v1232_v56 = vpop.f32.mrf.mxu3 }
 0x203   : > { %2845 = vmatmul.msk.bf16.gmra.mxu2 %vm558_vm1, %v1587_v16  ;;  %v3810_v53 = vadd.f32 %v1519_v37, %v1268_v10 }
 0x205   : > { %v1522_v58 = vpop.f32.mrf.mxu0 }
 0x206   : > { %v1062_v4 = vpop.f32.mrf.mxu2  ;;  %v856_v22 = vpop.f32.mrf.mxu1 }
 0x207   : > { %v1101_v38 = vadd.f32 %v1062_v4, %v855_v25  ;;  %2876 = vmatmul.msk.bf16.gmra.mxu3 %vm558_vm1, %v2019_v63  ;;  %v857_v37 = vadd.f32 %v856_v22, %v4256_v50  ;;  %v2022_v63 = vor.u32 %v2021_v48, %v2020_v3  ;;  %v2290_v4 = vrot.slane %v3039_v52, 3  ;;  %v3837_v52 = vld [vmem:[%s4104_s2] ss:$0 sm:$0xff] }
 0x208   : > { %2905 = vmatmul.msk.bf16.gmra.mxu0 %vm558_vm1, %v2289_v1  ;;  %v2025_v3 = vrot.slane %v3189_v59, 3 }
 0x209   : > { %v1269_v31 = vadd.f32 %v1230_v17, %v1101_v38  ;;  %v1589_v17 = vsel %vm1568_vm5, %v1586_v51, %v1588_v13  ;;  %v2023_v36 = vsel %vm1980_vm4, %v2018_v0, %v2022_v63  ;;  %v1590_v0 = vrot.slane %v3104_v2, 2 }
 0x20a   : > { %v2141_v9 = vpop.f32.mrf.mxu3 }
 0x20b   : > { %v3817_v45 = vadd.f32 %v1522_v58, %v1269_v31  ;;  %v2291_v31 = vsel %vm2272_vm6, %v2288_v49, %v2290_v4 }
 0x20d   : > { %v1524_v43 = vpop.f32.mrf.mxu0 }
 0x20e   : > { %v1064_v5 = vpop.f32.mrf.mxu2  ;;  %v1681_v30 = vpop.f32.mrf.mxu1 }
 0x20f   : > { %v1102_v10 = vadd.f32 %v1064_v5, %v857_v37  ;;  %v1771_v14 = vadd.f32 %v1681_v30, %v3508_v40  ;;  %v2024_v37 = vrot.slane %v3251_v21, 2  ;;  %v1591_v30 = vsel %vm1568_vm5, %v1588_v13, %v1590_v0 }
 0x210   : > { %v2292_v21 = vrot.slane %v3104_v2, 3 }
 0x211   : > { %v1270_v25 = vadd.f32 %v1232_v56, %v1102_v10  ;;  %2816 = vmatmul.msk.bf16.gmra.mxu1 %vm558_vm1, %v1587_v16 }
 0x212   : > { %v2143_v58 = vpop.f32.mrf.mxu3 }
 0x213   : > { %2846 = vmatmul.msk.bf16.gmra.mxu2 %vm558_vm1, %v1589_v17  ;;  %v3827_v1 = vadd.f32 %v1524_v43, %v1270_v25 }
 0x215   : > { %v2385_v22 = vpop.f32.mrf.mxu0 }
 0x216   : > { %v1849_v38 = vpop.f32.mrf.mxu2  ;;  %v1683_v56 = vpop.f32.mrf.mxu1 }
 0x217   : > { %v1939_v51 = vadd.f32 %v1849_v38, %v1771_v14  ;;  %2877 = vmatmul.msk.bf16.gmra.mxu3 %vm558_vm1, %v2023_v36  ;;  %v2026_v14 = vor.u32 %v2025_v3, %v2024_v37 }
 0x218   : > { %2906 = vmatmul.msk.bf16.gmra.mxu0 %vm558_vm1, %v2291_v31 }
 0x219   : > { %v2231_v16 = vadd.f32 %v2141_v9, %v1939_v51  ;;  %v1772_v9 = vadd.f32 %v1683_v56, %v3517_v7 }
 0x21a   : > { %v2146_v50 = vpop.f32.mrf.mxu3 }
 0x21b   : > { %v2475_v40 = vadd.f32 %v2385_v22, %v2231_v16  ;;  %v2027_v22 = vsel %vm1980_vm4, %v2022_v63, %v2026_v14 }
 0x21d   : > { %v2515_v49 = vadd.f32 %v3837_v52, %v2475_v40  ;;  %v2387_v5 = vpop.f32.mrf.mxu0 }
 0x21e   : > { %v1851_v48 = vpop.f32.mrf.mxu2  ;;  %v1686_v10 = vpop.f32.mrf.mxu1 }
 0x21f   : > { %2552 = vst.msk [vmem:[%s3843_s8] sm:$0xff] %vm2551_vm7, %v2515_v49  ;;  %v1940_v43 = vadd.f32 %v1851_v48, %v1772_v9  ;;  %v1773_v38 = vadd.f32 %v1686_v10, %v3524_v57  ;;  %v1592_v57 = vrot.slane %v3176_v35, 2  ;;  %v2028_v49 = vrot.slane %v3304_v19, 2 }
 0x220   : > { %v2029_v9 = vrot.slane %v3257_v8, 3  ;;  %v2294_v19 = vrot.slane %v3176_v35, 3 }
 0x221   : > { %v2232_v25 = vadd.f32 %v2143_v58, %v1940_v43  ;;  %2817 = vmatmul.msk.bf16.gmra.mxu1 %vm558_vm1, %v1589_v17  ;;  %v2293_v58 = vsel %vm2272_vm6, %v2290_v4, %v2292_v21  ;;  %v1593_v48 = vsel %vm1568_vm5, %v1590_v0, %v1592_v57 }
 0x222   : > { %v2148_v7 = vpop.f32.mrf.mxu3  ;;  %v2030_v43 = vor.u32 %v2029_v9, %v2028_v49 }
 0x223   : > { %v2476_v36 = vadd.f32 %v2387_v5, %v2232_v25  ;;  %2847 = vmatmul.msk.bf16.gmra.mxu2 %vm558_vm1, %v1591_v30 }
 0x225   : > { %v2516_v59 = vadd.f32 %v3837_v52, %v2476_v36  ;;  %v2390_v13 = vpop.f32.mrf.mxu0  ;;  %v2031_v36 = vsel %vm1980_vm4, %v2026_v14, %v2030_v43 }
 0x226   : > { %v1854_v31 = vpop.f32.mrf.mxu2  ;;  %v1688_v51 = vpop.f32.mrf.mxu1 }
 0x227   : > { %2553 = vst.msk [vmem:[%s3843_s8 + $0x8] sm:$0xff] %vm2551_vm7, %v2516_v59  ;;  %v1941_v17 = vadd.f32 %v1854_v31, %v1773_v38  ;;  %2878 = vmatmul.msk.bf16.gmra.mxu3 %vm558_vm1, %v2027_v22  ;;  %v1774_v40 = vadd.f32 %v1688_v51, %v3533_v44 }
 0x228   : > { %2907 = vmatmul.msk.bf16.gmra.mxu0 %vm558_vm1, %v2293_v58  ;;  %v2032_v58 = vrot.slane %v3141_v46, 2  ;;  %v2296_v46 = vrot.slane %v3237_v32, 3 }
 0x229   : > { %v2233_v56 = vadd.f32 %v2146_v50, %v1941_v17  ;;  %v2033_v17 = vrot.slane %v3138_v42, 3 }
 0x22a   : > { %v2151_v16 = vpop.f32.mrf.mxu3 }
 0x22b   : > { %v2477_v2 = vadd.f32 %v2390_v13, %v2233_v56 }
 0x22d   : > { %v2517_v63 = vadd.f32 %v3837_v52, %v2477_v2  ;;  %v2392_v37 = vpop.f32.mrf.mxu0 }
 0x22e   : > { %v1856_v4 = vpop.f32.mrf.mxu2  ;;  %v1691_v3 = vpop.f32.mrf.mxu1 }
 0x22f   : > { %2554 = vst.msk [vmem:[%s3843_s8 + $0x10] sm:$0xff] %vm2551_vm7, %v2517_v63  ;;  %v1942_v50 = vadd.f32 %v1856_v4, %v1774_v40  ;;  %v1775_v25 = vadd.f32 %v1691_v3, %v3540_v27  ;;  %v1594_v27 = vrot.slane %v3237_v32, 2  ;;  %v2034_v40 = vor.u32 %v2033_v17, %v2032_v58 }
 0x231   : > { %v2234_v5 = vadd.f32 %v2148_v7, %v1942_v50  ;;  %2818 = vmatmul.msk.bf16.gmra.mxu1 %vm558_vm1, %v1591_v30  ;;  %v2295_v7 = vsel %vm2272_vm6, %v2292_v21, %v2294_v19  ;;  %v2035_v4 = vsel %vm1980_vm4, %v2030_v43, %v2034_v40  ;;  %v2297_v50 = vsel %vm2272_vm6, %v2294_v19, %v2296_v46 }
 0x232   : > { %v2153_v44 = vpop.f32.mrf.mxu3 }
 0x233   : > { %v2478_v10 = vadd.f32 %v2392_v37, %v2234_v5  ;;  %2848 = vmatmul.msk.bf16.gmra.mxu2 %vm558_vm1, %v1593_v48 }
 0x235   : > { %v2518_v8 = vadd.f32 %v3837_v52, %v2478_v10  ;;  %v2395_v0 = vpop.f32.mrf.mxu0 }
 0x236   : > { %v1859_v59 = vpop.f32.mrf.mxu2  ;;  %v1693_v38 = vpop.f32.mrf.mxu1 }
 0x237   : > { %2555 = vst.msk [vmem:[%s3843_s8 + $0x18] sm:$0xff] %vm2551_vm7, %v2518_v8  ;;  %v1943_v30 = vadd.f32 %v1859_v59, %v1775_v25  ;;  %2879 = vmatmul.msk.bf16.gmra.mxu3 %vm558_vm1, %v2031_v36  ;;  %v1776_v13 = vadd.f32 %v1693_v38, %v3549_v18  ;;  %v2036_v8 = vrot.slane %v3206_v24, 2  ;;  %v2037_v25 = vrot.slane %v4199_v54, 3 }
 0x238   : > { %2908 = vmatmul.msk.bf16.gmra.mxu0 %vm558_vm1, %v2295_v7  ;;  %v2298_v24 = vrot.slane %v3129_v34, 3 }
 0x239   : > { %v2235_v22 = vadd.f32 %v2151_v16, %v1943_v30  ;;  %v1595_v16 = vsel %vm1568_vm5, %v1592_v57, %v1594_v27  ;;  %v2038_v38 = vor.u32 %v2037_v25, %v2036_v8 }
 0x23a   : > { %v2156_v31 = vpop.f32.mrf.mxu3  ;;  %v2299_v58 = vsel %vm2272_vm6, %v2296_v46, %v2298_v24 }
 0x23b   : > { %v2479_v35 = vadd.f32 %v2395_v0, %v2235_v22 }
 0x23d   : > { %v2519_v14 = vadd.f32 %v3837_v52, %v2479_v35  ;;  %v2397_v51 = vpop.f32.mrf.mxu0  ;;  %v4257_v35 = vld [vmem:[#allocation46_spill] sm:$0xff] }
 0x23e   : > { %v1861_v21 = vpop.f32.mrf.mxu2  ;;  %v1696_v2 = vpop.f32.mrf.mxu1 }
 0x23f   : > { %2556 = vst.msk [vmem:[%s3843_s8 + $0x20] sm:$0xff] %vm2551_vm7, %v2519_v14  ;;  %v1944_v56 = vadd.f32 %v1861_v21, %v1776_v13  ;;  %v1777_v9 = vadd.f32 %v1696_v2, %v3556_v12  ;;  %v1596_v12 = vrot.slane %v3129_v34, 2  ;;  %v2039_v14 = vsel %vm1980_vm4, %v2034_v40, %v2038_v38 }
 0x240   : > { %v1598_v2 = vrot.slane %v3135_v41, 2 }
 0x241   : > { %v2236_v63 = vadd.f32 %v2153_v44, %v1944_v56  ;;  %2819 = vmatmul.msk.bf16.gmra.mxu1 %vm558_vm1, %v1593_v48  ;;  %v1597_v7 = vsel %vm1568_vm5, %v1594_v27, %v1596_v12 }
 0x242   : > { %v2158_v18 = vpop.f32.mrf.mxu3 }
 0x243   : > { %v2480_v49 = vadd.f32 %v2397_v51, %v2236_v63  ;;  %2849 = vmatmul.msk.bf16.gmra.mxu2 %vm558_vm1, %v1595_v16  ;;  %v4258_v63 = vld [vmem:[#allocation47_spill] sm:$0xff] }
 0x245   : > { %v2520_v42 = vadd.f32 %v3837_v52, %v2480_v49  ;;  %v2400_v57 = vpop.f32.mrf.mxu0  ;;  %v2040_v49 = vrot.slane %v3282_v55, 2  ;;  %v2300_v55 = vrot.slane %v3135_v41, 3 }
 0x246   : > { %v1864_v37 = vpop.f32.mrf.mxu2  ;;  %v1698_v48 = vpop.f32.mrf.mxu1 }
 0x247   : > { %2557 = vst.msk [vmem:[%s3843_s8 + $0x28] sm:$0xff] %vm2551_vm7, %v2520_v42  ;;  %v1945_v3 = vadd.f32 %v1864_v37, %v1777_v9  ;;  %2880 = vmatmul.msk.bf16.gmra.mxu3 %vm558_vm1, %v2035_v4  ;;  %v1778_v44 = vadd.f32 %v1698_v48, %v3565_v47  ;;  %v1599_v37 = vsel %vm1568_vm5, %v1596_v12, %v1598_v2 }
 0x248   : > { %2909 = vmatmul.msk.bf16.gmra.mxu0 %vm558_vm1, %v2297_v50  ;;  %v2301_v8 = vsel %vm2272_vm6, %v2298_v24, %v2300_v55  ;;  %v4261_v24 = vshrl.u32 %v3611_v11, 16 }
 0x249   : > { %v2237_v5 = vadd.f32 %v2156_v31, %v1945_v3 }
 0x24a   : > { %v2161_v10 = vpop.f32.mrf.mxu3 }
 0x24b   : > { %v2481_v32 = vadd.f32 %v2400_v57, %v2237_v5  ;;  %v4259_v5 = vld [vmem:[#allocation48_spill] sm:$0xff] }
 0x24d   : > { %v2521_v43 = vadd.f32 %v3837_v52, %v2481_v32  ;;  %v2402_v36 = vpop.f32.mrf.mxu0 }
 0x24e   : > { %v1866_v19 = vpop.f32.mrf.mxu2  ;;  %v1701_v0 = vpop.f32.mrf.mxu1 }
 0x24f   : > { %2558 = vst.msk [vmem:[%s3843_s8 + $0x30] sm:$0xff] %vm2551_vm7, %v2521_v43  ;;  %v1946_v59 = vadd.f32 %v1866_v19, %v1778_v44  ;;  %v1779_v31 = vadd.f32 %v1701_v0, %v4257_v35  ;;  %v211_v43 = vld [vmem:[%s3010_s27 + $0x138] sm:$0xff]  ;;  %v4262_v35 = vshll.u32 %v3611_v11, 16 }
 0x250   : > { %v252_v41 = vmax.f32 %v211_v43, 0.0 }
 0x251   : > { %v2238_v30 = vadd.f32 %v2158_v18, %v1946_v59  ;;  %2820 = vmatmul.msk.bf16.gmra.mxu1 %vm558_vm1, %v1595_v16  ;;  %v2041_v18 = vrot.slane %v4203_v26, 3 }
 0x252   : > { %v2163_v47 = vpop.f32.mrf.mxu3 }
 0x253   : > { %v2482_v22 = vadd.f32 %v2402_v36, %v2238_v30  ;;  %2850 = vmatmul.msk.bf16.gmra.mxu2 %vm558_vm1, %v1597_v7  ;;  %v2042_v50 = vor.u32 %v2041_v18, %v2040_v49  ;;  %v293_v30 = vpack.c.bf16 %v252_v41, %v252_v41  ;;  %v4263_v18 = vld [vmem:[#allocation49_spill] sm:$0xff] }
 0x255   : > { %v2522_v54 = vadd.f32 %v3837_v52, %v2482_v22  ;;  %v2405_v27 = vpop.f32.mrf.mxu0  ;;  %v4260_v22 = vld [vmem:[#allocation14_spill] sm:$0xff] }
 0x256   : > { %v1869_v13 = vpop.f32.mrf.mxu2  ;;  %v1703_v21 = vpop.f32.mrf.mxu1 }
 0x257   : > { %2559 = vst.msk [vmem:[%s3843_s8 + $0x38] sm:$0xff] %vm2551_vm7, %v2522_v54  ;;  %v1947_v17 = vadd.f32 %v1869_v13, %v1779_v31  ;;  %2881 = vmatmul.msk.bf16.gmra.mxu3 %vm558_vm1, %v2039_v14  ;;  %v1780_v40 = vadd.f32 %v1703_v21, %v4258_v63  ;;  %v2044_v54 = vrot.slane %v4261_v24, 2  ;;  %v2045_v31 = vrot.slane %v4262_v35, 3 }
 0x258   : > { %2910 = vmatmul.msk.bf16.gmra.mxu0 %vm558_vm1, %v2299_v58  ;;  %v1814_v21 = vunpack.c.l.b16 %v293_v30 }
 0x259   : > { %v2239_v51 = vadd.f32 %v2161_v10, %v1947_v17  ;;  %v2043_v10 = vsel %vm1980_vm4, %v2038_v38, %v2042_v50 }
 0x25a   : > { %v2166_v56 = vpop.f32.mrf.mxu3 }
 0x25b   : > { %v2483_v34 = vadd.f32 %v2405_v27, %v2239_v51 }
 0x25d   : > { %v2523_v16 = vadd.f32 %v3837_v52, %v2483_v34  ;;  %v2407_v42 = vpop.f32.mrf.mxu0  ;;  %v2046_v34 = vor.u32 %v2045_v31, %v2044_v54 }
 0x25e   : > { %v1871_v46 = vpop.f32.mrf.mxu2  ;;  %v1706_v4 = vpop.f32.mrf.mxu1 }
 0x25f   : > { %2560 = vst.msk [vmem:[%s3843_s8 + $0x40] sm:$0xff] %vm2551_vm7, %v2523_v16  ;;  %v1948_v9 = vadd.f32 %v1871_v46, %v1780_v40  ;;  %v1781_v32 = vadd.f32 %v1706_v4, %v4259_v5  ;;  %v2302_v16 = vrot.slane %v3203_v23, 3  ;;  %v3955_v40 = vpack.c.b16 %v1814_v21, %v3628_v29 }
 0x261   : > { %v2240_v57 = vadd.f32 %v2163_v47, %v1948_v9  ;;  %2821 = vmatmul.msk.bf16.gmra.mxu1 %vm558_vm1, %v1597_v7  ;;  %v1600_v7 = vrot.slane %v3203_v23, 2  ;;  %v212_v9 = vld [vmem:[%s3010_s27 + $0x140] sm:$0xff]  ;;  %v2049_v23 = vshrl.u32 %v3955_v40, 16 }
 0x262   : > { %v2168_v26 = vpop.f32.mrf.mxu3 }
 0x263   : > { %v2484_v3 = vadd.f32 %v2407_v42, %v2240_v57  ;;  %2851 = vmatmul.msk.bf16.gmra.mxu2 %vm558_vm1, %v1599_v37  ;;  %v1601_v17 = vsel %vm1568_vm5, %v1598_v2, %v1600_v7  ;;  %v2047_v2 = vsel %vm1980_vm4, %v2042_v50, %v2046_v34 }
 0x265   : > { %v2524_v48 = vadd.f32 %v3837_v52, %v2484_v3  ;;  %v2410_v12 = vpop.f32.mrf.mxu0 }
 0x266   : > { %v1874_v44 = vpop.f32.mrf.mxu2  ;;  %v1708_v19 = vpop.f32.mrf.mxu1 }
 0x267   : > { %2561 = vst.msk [vmem:[%s3843_s8 + $0x48] sm:$0xff] %vm2551_vm7, %v2524_v48  ;;  %v1949_v25 = vadd.f32 %v1874_v44, %v1781_v32  ;;  %2882 = vmatmul.msk.bf16.gmra.mxu3 %vm558_vm1, %v2043_v10  ;;  %v1782_v47 = vadd.f32 %v1708_v19, %v4260_v22  ;;  %v253_v48 = vmax.f32 %v212_v9, 0.0  ;;  %v3969_v32 = vrot.slane %v3611_v11, 2 }
 0x268   : > { %2911 = vmatmul.msk.bf16.gmra.mxu0 %vm558_vm1, %v2301_v8  ;;  %v2051_v10 = vrot.slane %v2049_v23, 2 }
 0x269   : > { %v2241_v36 = vadd.f32 %v2166_v56, %v1949_v25 }
 0x26a   : > { %v2171_v0 = vpop.f32.mrf.mxu3 }
 0x26b   : > { %v2485_v59 = vadd.f32 %v2410_v12, %v2241_v36  ;;  %v294_v12 = vpack.c.bf16 %v253_v48, %v253_v48  ;;  %v1603_v36 = vsel %vm1568_vm5, %v1600_v7, %v3969_v32 }
 0x26d   : > { %v2525_v38 = vadd.f32 %v3837_v52, %v2485_v59  ;;  %v2412_v13 = vpop.f32.mrf.mxu0  ;;  %v1815_v30 = vunpack.c.l.b16 %v294_v12 }
 0x26e   : > { %v1876_v14 = vpop.f32.mrf.mxu2  ;;  %v1711_v58 = vpop.f32.mrf.mxu1 }
 0x26f   : > { %2562 = vst.msk [vmem:[%s3843_s8 + $0x50] sm:$0xff] %vm2551_vm7, %v2525_v38  ;;  %v1950_v27 = vadd.f32 %v1876_v14, %v1782_v47  ;;  %v1783_v46 = vadd.f32 %v1711_v58, %v4263_v18  ;;  %v3983_v35 = vpack.c.b16 %v1815_v30, %v1815_v30 }
 0x271   : > { %v2242_v51 = vadd.f32 %v2168_v26, %v1950_v27  ;;  %2822 = vmatmul.msk.bf16.gmra.mxu1 %vm558_vm1, %v1599_v37  ;;  %v2303_v37 = vsel %vm2272_vm6, %v2300_v55, %v2302_v16  ;;  %v2052_v26 = vshll.u32 %v3955_v40, 16  ;;  %v2058_v58 = vshrl.u32 %v3983_v35, 16 }
 0x272   : > { %v2173_v63 = vpop.f32.mrf.mxu3  ;;  %v1820_v12 = vrot.slane %v3983_v35, 2 }
 0x273   : > { %v2486_v56 = vadd.f32 %v2412_v13, %v2242_v51  ;;  %2852 = vmatmul.msk.bf16.gmra.mxu2 %vm558_vm1, %v1601_v17  ;;  %v2054_v44 = vrot.slane %v2052_v26, 3  ;;  %v1818_v51 = vrot.slane %v3955_v40, 2 }
 0x275   : > { %v2526_v49 = vadd.f32 %v3837_v52, %v2486_v56  ;;  %v2415_v4 = vpop.f32.mrf.mxu0  ;;  %v1821_v30 = vsel %vm1568_vm5, %v1818_v51, %v1820_v12 }
 0x276   : > { %v1879_v42 = vpop.f32.mrf.mxu2  ;;  %v1713_v3 = vpop.f32.mrf.mxu1 }
 0x277   : > { %2563 = vst.msk [vmem:[%s3843_s8 + $0x58] sm:$0xff] %vm2551_vm7, %v2526_v49  ;;  %v1951_v57 = vadd.f32 %v1879_v42, %v1783_v46  ;;  %2883 = vmatmul.msk.bf16.gmra.mxu3 %vm558_vm1, %v2047_v2  ;;  %v1784_v43 = vadd.f32 %v1713_v3, %v3621_v60  ;;  %v2304_v60 = vrot.slane %v3611_v11, 3  ;;  %v1819_v42 = vsel %vm1568_vm5, %v3969_v32, %v1818_v51 }
 0x278   : > { %2912 = vmatmul.msk.bf16.gmra.mxu0 %vm558_vm1, %v2303_v37 }
 0x279   : > { %v2243_v29 = vadd.f32 %v2171_v0, %v1951_v57  ;;  %v2055_v0 = vor.u32 %v2054_v44, %v2051_v10  ;;  %v2305_v14 = vsel %vm2272_vm6, %v2302_v16, %v2304_v60  ;;  %v2060_v16 = vrot.slane %v2058_v58, 2  ;;  %v4264_v44 = vld [vmem:[#allocation24_spill] sm:$0xff] }
 0x27a   : > { %v2176_v5 = vpop.f32.mrf.mxu3 }
 0x27b   : > { %v2487_v50 = vadd.f32 %v2415_v4, %v2243_v29  ;;  %v2056_v54 = vsel %vm1980_vm4, %v2046_v34, %v2055_v0 }
 0x27d   : > { %v2527_v55 = vadd.f32 %v3837_v52, %v2487_v50  ;;  %v2417_v25 = vpop.f32.mrf.mxu0 }
 0x27e   : > { %v1881_v8 = vpop.f32.mrf.mxu2  ;;  %v1716_v41 = vpop.f32.mrf.mxu1 }
 0x27f   : > { %2564 = vst.msk [vmem:[%s3843_s8 + $0x60] sm:$0xff] %vm2551_vm7, %v2527_v55  ;;  %v1952_v19 = vadd.f32 %v1881_v8, %v1784_v43  ;;  %v1785_v24 = vadd.f32 %v1716_v41, %v3633_v33  ;;  %v2061_v33 = vshll.u32 %v3983_v35, 16 }
 0x281   : > { %v2244_v59 = vadd.f32 %v2173_v63, %v1952_v19  ;;  %2823 = vmatmul.msk.bf16.gmra.mxu1 %vm558_vm1, %v1601_v17  ;;  %v2063_v63 = vrot.slane %v2061_v33, 3  ;;  %v4266_v33 = vld [vmem:[#allocation27_spill] sm:$0xff] }
 0x282   : > { %v2178_v22 = vpop.f32.mrf.mxu3 }
 0x283   : > { %v2488_v38 = vadd.f32 %v2417_v25, %v2244_v59  ;;  %2853 = vmatmul.msk.bf16.gmra.mxu2 %vm558_vm1, %v1603_v36  ;;  %v2064_v4 = vor.u32 %v2063_v63, %v2060_v16 }
 0x285   : > { %v2528_v47 = vadd.f32 %v3837_v52, %v2488_v38  ;;  %v2420_v31 = vpop.f32.mrf.mxu0  ;;  %v2065_v29 = vsel %vm1980_vm4, %v2055_v0, %v2064_v4 }
 0x286   : > { %v1884_v7 = vpop.f32.mrf.mxu2  ;;  %v1718_v27 = vpop.f32.mrf.mxu1 }
 0x287   : > { %2565 = vst.msk [vmem:[%s3843_s8 + $0x68] sm:$0xff] %vm2551_vm7, %v2528_v47  ;;  %v1953_v13 = vadd.f32 %v1884_v7, %v1785_v24  ;;  %2884 = vmatmul.msk.bf16.gmra.mxu3 %vm558_vm1, %v2056_v54  ;;  %v1786_v56 = vadd.f32 %v1718_v27, %v3648_v61  ;;  %v2306_v61 = vrot.slane %v3955_v40, 3  ;;  %v4265_v24 = vld [vmem:[#allocation19_spill] sm:$0xff] }
 0x288   : > { %2913 = vmatmul.msk.bf16.gmra.mxu0 %vm558_vm1, %v2305_v14 }
 0x289   : > { %v2245_v11 = vadd.f32 %v2176_v5, %v1953_v13  ;;  %v2307_v50 = vsel %vm2272_vm6, %v2304_v60, %v2306_v61 }
 0x28a   : > { %v2181_v21 = vpop.f32.mrf.mxu3 }
 0x28b   : > { %v2489_v17 = vadd.f32 %v2420_v31, %v2245_v11 }
 0x28d   : > { %v2529_v34 = vadd.f32 %v3837_v52, %v2489_v17  ;;  %v2422_v18 = vpop.f32.mrf.mxu0 }
 0x28e   : > { %v1886_v49 = vpop.f32.mrf.mxu2  ;;  %v1721_v2 = vpop.f32.mrf.mxu1 }
 0x28f   : > { %2566 = vst.msk [vmem:[%s3843_s8 + $0x70] sm:$0xff] %vm2551_vm7, %v2529_v34  ;;  %v1954_v46 = vadd.f32 %v1886_v49, %v1786_v56  ;;  %v1787_v23 = vadd.f32 %v1721_v2, %v3657_v62  ;;  %v1604_v62 = vrot.slane %v4264_v44, 2 }
 0x291   : > { %v2246_v9 = vadd.f32 %v2178_v22, %v1954_v46  ;;  %2824 = vmatmul.msk.bf16.gmra.mxu1 %vm558_vm1, %v1603_v36  ;;  %v1605_v0 = vsel %vm1568_vm5, %v3969_v32, %v1604_v62  ;;  %v4267_v46 = vld [vmem:[#allocation41_spill] sm:$0xff] }
 0x292   : > { %v2183_v57 = vpop.f32.mrf.mxu3  ;;  %v4269_v62 = vld [vmem:[#allocation13_spill] sm:$0xff] }
 0x293   : > { %v2490_v37 = vadd.f32 %v2422_v18, %v2246_v9  ;;  %2854 = vmatmul.msk.bf16.gmra.mxu2 %vm558_vm1, %v1819_v42 }
 0x295   : > { %v2530_v3 = vadd.f32 %v3837_v52, %v2490_v37  ;;  %v2425_v48 = vpop.f32.mrf.mxu0 }
 0x296   : > { %v1889_v26 = vpop.f32.mrf.mxu2  ;;  %v1723_v10 = vpop.f32.mrf.mxu1 }
 0x297   : > { %2567 = vst.msk [vmem:[%s3843_s8 + $0x78] sm:$0xff] %vm2551_vm7, %v2530_v3  ;;  %v1955_v5 = vadd.f32 %v1889_v26, %v1787_v23  ;;  %2885 = vmatmul.msk.bf16.gmra.mxu3 %vm558_vm1, %v2065_v29  ;;  %v1788_v25 = vadd.f32 %v1723_v10, %v3670_v20  ;;  %v2308_v20 = vrot.slane %v3983_v35, 3  ;;  %v4268_v29 = vld [vmem:[#allocation9_spill] sm:$0xff] }
 0x298   : > { %2914 = vmatmul.msk.bf16.gmra.mxu0 %vm558_vm1, %v2307_v50 }
 0x299   : > { %v2247_v55 = vadd.f32 %v2181_v21, %v1955_v5  ;;  %v2309_v31 = vsel %vm2272_vm6, %v2306_v61, %v2308_v20 }
 0x29a   : > { %v2186_v43 = vpop.f32.mrf.mxu3 }
 0x29b   : > { %v2491_v40 = vadd.f32 %v2425_v48, %v2247_v55 }
 0x29d   : > { %v2531_v8 = vadd.f32 %v3837_v52, %v2491_v40  ;;  %v2427_v41 = vpop.f32.mrf.mxu0 }
 0x29e   : > { %v1891_v19 = vpop.f32.mrf.mxu2  ;;  %v1726_v59 = vpop.f32.mrf.mxu1 }
 0x29f   : > { %2568 = vst.msk [vmem:[%s3843_s8 + $0x80] sm:$0xff] %vm2551_vm7, %v2531_v8  ;;  %v1956_v36 = vadd.f32 %v1891_v19, %v1788_v25  ;;  %v1789_v54 = vadd.f32 %v1726_v59, %v4265_v24 }
 0x2a1   : > { %v2248_v38 = vadd.f32 %v2183_v57, %v1956_v36  ;;  %2825 = vmatmul.msk.bf16.gmra.mxu1 %vm558_vm1, %v1605_v0 }
 0x2a2   : > { %v2188_v22 = vpop.f32.mrf.mxu3 }
 0x2a3   : > { %v2492_v60 = vadd.f32 %v2427_v41, %v2248_v38  ;;  %2855 = vmatmul.msk.bf16.gmra.mxu2 %vm558_vm1, %v1821_v30  ;;  %v4270_v38 = vld [vmem:[#allocation18_spill] sm:$0xff] }
 0x2a5   : > { %v2532_v47 = vadd.f32 %v3837_v52, %v2492_v60  ;;  %v2430_v32 = vpop.f32.mrf.mxu0 }
 0x2a6   : > { %v1894_v7 = vpop.f32.mrf.mxu2  ;;  %v1728_v13 = vpop.f32.mrf.mxu1 }
 0x2a7   : > { %2569 = vst.msk [vmem:[%s3843_s8 + $0x88] sm:$0xff] %vm2551_vm7, %v2532_v47  ;;  %v1957_v14 = vadd.f32 %v1894_v7, %v1789_v54  ;;  %v1790_v17 = vadd.f32 %v1728_v13, %v4266_v33 }
 0x2a8   : > { %2915 = vmatmul.msk.bf16.gmra.mxu0 %vm558_vm1, %v2309_v31 }
 0x2a9   : > { %v2249_v27 = vadd.f32 %v2186_v43, %v1957_v14  ;;  %v4271_v14 = vld [vmem:[#allocation44_spill] sm:$0xff] }
 0x2aa   : > { %v2191_v35 = vpop.f32.mrf.mxu3 }
 0x2ab   : > { %v2493_v11 = vadd.f32 %v2430_v32, %v2249_v27 }
 0x2ad   : > { %v2533_v58 = vadd.f32 %v3837_v52, %v2493_v11  ;;  %v2432_v51 = vpop.f32.mrf.mxu0 }
 0x2ae   : > { %v1896_v21 = vpop.f32.mrf.mxu2  ;;  %v1731_v56 = vpop.f32.mrf.mxu1 }
 0x2af   : > { %2570 = vst.msk [vmem:[%s3843_s8 + $0x90] sm:$0xff] %vm2551_vm7, %v2533_v58  ;;  %v1958_v34 = vadd.f32 %v1896_v21, %v1790_v17  ;;  %v1791_v2 = vadd.f32 %v1731_v56, %v4267_v46 }
 0x2b1   : > { %v2250_v16 = vadd.f32 %v2188_v22, %v1958_v34  ;;  %v4272_v34 = vld [vmem:[#allocation26_spill] sm:$0xff] }
 0x2b2   : > { %v2193_v49 = vpop.f32.mrf.mxu3 }
 0x2b3   : > { %v2494_v63 = vadd.f32 %v2432_v51, %v2250_v16 }
 0x2b5   : > { %v2534_v18 = vadd.f32 %v3837_v52, %v2494_v63  ;;  %v2435_v9 = vpop.f32.mrf.mxu0 }
 0x2b6   : > { %v1899_v42 = vpop.f32.mrf.mxu2  ;;  %v1733_v37 = vpop.f32.mrf.mxu1 }
 0x2b7   : > { %2571 = vst.msk [vmem:[%s3843_s8 + $0x98] sm:$0xff] %vm2551_vm7, %v2534_v18  ;;  %v1959_v4 = vadd.f32 %v1899_v42, %v1791_v2  ;;  %v1792_v26 = vadd.f32 %v1733_v37, %v4268_v29 }
 0x2b9   : > { %v2251_v61 = vadd.f32 %v2191_v35, %v1959_v4  ;;  %v4273_v4 = vld [vmem:[#allocation25_spill] sm:$0xff] }
 0x2ba   : > { %v2196_v3 = vpop.f32.mrf.mxu3 }
 0x2bb   : > { %v2495_v57 = vadd.f32 %v2435_v9, %v2251_v61 }
 0x2bd   : > { %v2535_v23 = vadd.f32 %v3837_v52, %v2495_v57  ;;  %v2437_v50 = vpop.f32.mrf.mxu0 }
 0x2be   : > { %v1901_v48 = vpop.f32.mrf.mxu2  ;;  %v1736_v10 = vpop.f32.mrf.mxu1 }
 0x2bf   : > { %2572 = vst.msk [vmem:[%s3843_s8 + $0xa0] sm:$0xff] %vm2551_vm7, %v2535_v23  ;;  %v1960_v5 = vadd.f32 %v1901_v48, %v1792_v26  ;;  %v1793_v12 = vadd.f32 %v1736_v10, %v4269_v62 }
 0x2c1   : > { %v2252_v55 = vadd.f32 %v2193_v49, %v1960_v5  ;;  %v4274_v5 = vld [vmem:[#allocation28_spill] sm:$0xff] }
 0x2c2   : > { %v2198_v43 = vpop.f32.mrf.mxu3 }
 0x2c3   : > { %v2496_v40 = vadd.f32 %v2437_v50, %v2252_v55 }
 0x2c5   : > { %v2536_v44 = vadd.f32 %v3837_v52, %v2496_v40  ;;  %v2440_v25 = vpop.f32.mrf.mxu0 }
 0x2c6   : > { %v1904_v8 = vpop.f32.mrf.mxu2  ;;  %v1738_v41 = vpop.f32.mrf.mxu1 }
 0x2c7   : > { %2573 = vst.msk [vmem:[%s3843_s8 + $0xa8] sm:$0xff] %vm2551_vm7, %v2536_v44  ;;  %v1961_v19 = vadd.f32 %v1904_v8, %v1793_v12  ;;  %v1794_v60 = vadd.f32 %v1738_v41, %v4270_v38 }
 0x2c9   : > { %v2253_v36 = vadd.f32 %v2196_v3, %v1961_v19 }
 0x2ca   : > { %v2201_v0 = vpop.f32.mrf.mxu3 }
 0x2cb   : > { %v2497_v59 = vadd.f32 %v2440_v25, %v2253_v36 }
 0x2cd   : > { %v2537_v30 = vadd.f32 %v3837_v52, %v2497_v59  ;;  %v2442_v22 = vpop.f32.mrf.mxu0 }
 0x2ce   : > { %v1906_v20 = vpop.f32.mrf.mxu2  ;;  %v1741_v24 = vpop.f32.mrf.mxu1 }
 0x2cf   : > { %2574 = vst.msk [vmem:[%s3843_s8 + $0xb0] sm:$0xff] %vm2551_vm7, %v2537_v30  ;;  %v1962_v47 = vadd.f32 %v1906_v20, %v1794_v60  ;;  %v1795_v13 = vadd.f32 %v1741_v24, %v4271_v14  ;;  %v4275_v20 = vld [vmem:[#allocation21_spill] sm:$0xff] }
 0x2d1   : > { %v2254_v54 = vadd.f32 %v2198_v43, %v1962_v47 }
 0x2d2   : > { %v2203_v32 = vpop.f32.mrf.mxu3 }
 0x2d3   : > { %v2498_v7 = vadd.f32 %v2442_v22, %v2254_v54 }
 0x2d5   : > { %v2538_v31 = vadd.f32 %v3837_v52, %v2498_v7  ;;  %v2445_v11 = vpop.f32.mrf.mxu0 }
 0x2d6   : > { %v1909_v27 = vpop.f32.mrf.mxu2  ;;  %v1743_v58 = vpop.f32.mrf.mxu1 }
 0x2d7   : > { %2575 = vst.msk [vmem:[%s3843_s8 + $0xb8] sm:$0xff] %vm2551_vm7, %v2538_v31  ;;  %v1963_v35 = vadd.f32 %v1909_v27, %v1795_v13  ;;  %v1796_v56 = vadd.f32 %v1743_v58, %v4272_v34 }
 0x2d9   : > { %v2255_v33 = vadd.f32 %v2201_v0, %v1963_v35 }
 0x2da   : > { %v2206_v21 = vpop.f32.mrf.mxu3 }
 0x2db   : > { %v2499_v17 = vadd.f32 %v2445_v11, %v2255_v33 }
 0x2dd   : > { %v2539_v51 = vadd.f32 %v3837_v52, %v2499_v17  ;;  %v2447_v63 = vpop.f32.mrf.mxu0 }
 0x2de   : > { %v1911_v16 = vpop.f32.mrf.mxu2  ;;  %v1746_v18 = vpop.f32.mrf.mxu1 }
 0x2df   : > { %2576 = vst.msk [vmem:[%s3843_s8 + $0xc0] sm:$0xff] %vm2551_vm7, %v2539_v51  ;;  %v1964_v49 = vadd.f32 %v1911_v16, %v1796_v56  ;;  %v1797_v37 = vadd.f32 %v1746_v18, %v4273_v4 }
 0x2e1   : > { %v2256_v46 = vadd.f32 %v2203_v32, %v1964_v49 }
 0x2e2   : > { %v2208_v42 = vpop.f32.mrf.mxu3 }
 0x2e3   : > { %v2500_v2 = vadd.f32 %v2447_v63, %v2256_v46 }
 0x2e5   : > { %v2540_v9 = vadd.f32 %v3837_v52, %v2500_v2  ;;  %v2450_v57 = vpop.f32.mrf.mxu0 }
 0x2e6   : > { %v1914_v61 = vpop.f32.mrf.mxu2  ;;  %v1748_v23 = vpop.f32.mrf.mxu1 }
 0x2e7   : > { %2577 = vst.msk [vmem:[%s3843_s8 + $0xc8] sm:$0xff] %vm2551_vm7, %v2540_v9  ;;  %v1965_v3 = vadd.f32 %v1914_v61, %v1797_v37  ;;  %v1798_v10 = vadd.f32 %v1748_v23, %v4274_v5 }
 0x2e9   : > { %v2257_v29 = vadd.f32 %v2206_v21, %v1965_v3 }
 0x2ea   : > { %v2211_v48 = vpop.f32.mrf.mxu3 }
 0x2eb   : > { %v2501_v26 = vadd.f32 %v2450_v57, %v2257_v29 }
 0x2ed   : > { %v2541_v50 = vadd.f32 %v3837_v52, %v2501_v26  ;;  %v2452_v40 = vpop.f32.mrf.mxu0 }
 0x2ee   : > { %v1916_v55 = vpop.f32.mrf.mxu2  ;;  %v1751_v44 = vpop.f32.mrf.mxu1 }
 0x2ef   : > { %2578 = vst.msk [vmem:[%s3843_s8 + $0xd0] sm:$0xff] %vm2551_vm7, %v2541_v50  ;;  %v1966_v43 = vadd.f32 %v1916_v55, %v1798_v10  ;;  %v1799_v19 = vadd.f32 %v1751_v44, %v3766_v15 }
 0x2f1   : > { %v2258_v62 = vadd.f32 %v2208_v42, %v1966_v43 }
 0x2f2   : > { %v2213_v8 = vpop.f32.mrf.mxu3 }
 0x2f3   : > { %v2502_v12 = vadd.f32 %v2452_v40, %v2258_v62 }
 0x2f5   : > { %v2542_v25 = vadd.f32 %v3837_v52, %v2502_v12  ;;  %v2455_v36 = vpop.f32.mrf.mxu0 }
 0x2f6   : > { %v1919_v41 = vpop.f32.mrf.mxu2  ;;  %v1753_v0 = vpop.f32.mrf.mxu1 }
 0x2f7   : > { %2579 = vst.msk [vmem:[%s3843_s8 + $0xd8] sm:$0xff] %vm2551_vm7, %v2542_v25  ;;  %v1967_v59 = vadd.f32 %v1919_v41, %v1799_v19  ;;  %v1800_v22 = vadd.f32 %v1753_v0, %v4275_v20 }
 0x2f9   : > { %v2259_v30 = vadd.f32 %v2211_v48, %v1967_v59 }
 0x2fa   : > { %v2216_v24 = vpop.f32.mrf.mxu3 }
 0x2fb   : > { %v2503_v38 = vadd.f32 %v2455_v36, %v2259_v30 }
 0x2fd   : > { %v2543_v60 = vadd.f32 %v3837_v52, %v2503_v38  ;;  %v2457_v54 = vpop.f32.mrf.mxu0 }
 0x2fe   : > { %v1921_v47 = vpop.f32.mrf.mxu2  ;;  %v1756_v15 = vpop.f32.mrf.mxu1 }
 0x2ff   : > { %2580 = vst.msk [vmem:[%s3843_s8 + $0xe0] sm:$0xff] %vm2551_vm7, %v2543_v60  ;;  %v1968_v7 = vadd.f32 %v1921_v47, %v1800_v22  ;;  %v1801_v13 = vadd.f32 %v1756_v15, %v3783_v39 }
 0x301   : > { %v2260_v32 = vadd.f32 %v2213_v8, %v1968_v7 }
 0x302   : > { %v2218_v33 = vpop.f32.mrf.mxu3 }
 0x303   : > { %v2504_v31 = vadd.f32 %v2457_v54, %v2260_v32 }
 0x305   : > { %v2544_v14 = vadd.f32 %v3837_v52, %v2504_v31  ;;  %v2460_v11 = vpop.f32.mrf.mxu0 }
 0x306   : > { %v1924_v27 = vpop.f32.mrf.mxu2  ;;  %v1758_v58 = vpop.f32.mrf.mxu1 }
 0x307   : > { %2581 = vst.msk [vmem:[%s3843_s8 + $0xe8] sm:$0xff] %vm2551_vm7, %v2544_v14  ;;  %v1969_v35 = vadd.f32 %v1924_v27, %v1801_v13  ;;  %v1802_v34 = vadd.f32 %v1758_v58, %v3793_v28 }
 0x309   : > { %v2261_v17 = vadd.f32 %v2216_v24, %v1969_v35 }
 0x30a   : > { %v2221_v18 = vpop.f32.mrf.mxu3 }
 0x30b   : > { %v2505_v21 = vadd.f32 %v2460_v11, %v2261_v17 }
 0x30d   : > { %v2545_v51 = vadd.f32 %v3837_v52, %v2505_v21  ;;  %v2462_v16 = vpop.f32.mrf.mxu0 }
 0x30e   : > { %v1926_v56 = vpop.f32.mrf.mxu2  ;;  %v1761_v39 = vpop.f32.mrf.mxu1 }
 0x30f   : > { %2582 = vst.msk [vmem:[%s3843_s8 + $0xf0] sm:$0xff] %vm2551_vm7, %v2545_v51  ;;  %v1970_v63 = vadd.f32 %v1926_v56, %v1802_v34  ;;  %v1803_v42 = vadd.f32 %v1761_v39, %v3800_v6 }
 0x311   : > { %v2262_v49 = vadd.f32 %v2218_v33, %v1970_v63 }
 0x312   : > { %v2223_v3 = vpop.f32.mrf.mxu3 }
 0x313   : > { %v2506_v46 = vadd.f32 %v2462_v16, %v2262_v49 }
 0x315   : > { %v2546_v2 = vadd.f32 %v3837_v52, %v2506_v46  ;;  %v2465_v4 = vpop.f32.mrf.mxu0 }
 0x316   : > { %v1929_v9 = vpop.f32.mrf.mxu2  ;;  %v1763_v28 = vpop.f32.mrf.mxu1 }
 0x317   : > { %2583 = vst.msk [vmem:[%s3843_s8 + $0xf8] sm:$0xff] %vm2551_vm7, %v2546_v2  ;;  %v1971_v37 = vadd.f32 %v1929_v9, %v1803_v42  ;;  %v1804_v29 = vadd.f32 %v1763_v28, %v3810_v53 }
 0x319   : > { %v2263_v61 = vadd.f32 %v2221_v18, %v1971_v37 }
 0x31a   : > { %v2226_v43 = vpop.f32.mrf.mxu3 }
 0x31b   : > { %v2507_v57 = vadd.f32 %v2465_v4, %v2263_v61 }
 0x31d   : > { %v2547_v23 = vadd.f32 %v3837_v52, %v2507_v57  ;;  %v2467_v48 = vpop.f32.mrf.mxu0 }
 0x31e   : > { %v1931_v26 = vpop.f32.mrf.mxu2  ;;  %v1766_v6 = vpop.f32.mrf.mxu1 }
 0x31f   : > { %2584 = vst.msk [vmem:[%s3843_s8 + $0x100] sm:$0xff] %vm2551_vm7, %v2547_v23  ;;  %v1972_v50 = vadd.f32 %v1931_v26, %v1804_v29  ;;  %v1805_v40 = vadd.f32 %v1766_v6, %v3817_v45 }
 0x321   : > { %v2264_v5 = vadd.f32 %v2223_v3, %v1972_v50 }
 0x322   : > { %v2228_v0 = vpop.f32.mrf.mxu3 }
 0x323   : > { %v2508_v10 = vadd.f32 %v2467_v48, %v2264_v5 }
 0x325   : > { %v2548_v55 = vadd.f32 %v3837_v52, %v2508_v10  ;;  %v2470_v53 = vpop.f32.mrf.mxu0 }
 0x326   : > { %v1934_v44 = vpop.f32.mrf.mxu2  ;;  %v1768_v8 = vpop.f32.mrf.mxu1 }
 0x327   : > { %2585 = vst.msk [vmem:[%s3843_s8 + $0x108] sm:$0xff] %vm2551_vm7, %v2548_v55  ;;  %v1973_v62 = vadd.f32 %v1934_v44, %v1805_v40  ;;  %v1806_v41 = vadd.f32 %v1768_v8, %v3827_v1 }
 0x329   : > { %v2265_v12 = vadd.f32 %v2226_v43, %v1973_v62 }
 0x32b   : > { %v2509_v25 = vadd.f32 %v2470_v53, %v2265_v12 }
 0x32d   : > { %v2549_v19 = vadd.f32 %v3837_v52, %v2509_v25  ;;  %v2472_v30 = vpop.f32.mrf.mxu0 }
 0x32e   : > { %v1936_v36 = vpop.f32.mrf.mxu2 }
 0x32f   : > { %2586 = vst.msk [vmem:[%s3843_s8 + $0x110] sm:$0xff] %vm2551_vm7, %v2549_v19  ;;  %v1974_v59 = vadd.f32 %v1936_v36, %v1806_v41 }
 0x331   : > { %v2266_v45 = vadd.f32 %v2228_v0, %v1974_v59 }
 0x333   : > { %v2510_v38 = vadd.f32 %v2472_v30, %v2266_v45 }
 0x335   : > { %v2550_v60 = vadd.f32 %v3837_v52, %v2510_v38 }
 0x337   : > { %2587 = vst.msk [vmem:[%s3843_s8 + $0x118] sm:$0xff] %vm2551_vm7, %v2550_v60 }
 0x338 PF: > { %s13_s12 = sadd.s32 1, %s2959_s12  }
 0x339   : > { %p10_p4 = scmp.ge.s32.totalorder %s13_s12, 4  }
 0x33b   :  { %12 = sbr.rel (!%p10_p4) target bundleno = 1 (0x1), region = 70 }

</bundles_post_ra>
